<compile_context>
chip_gen: v7x
topology: tpu7x:2x2x1
jax: 0.10.0
libtpu: 0.0.40
codegen_flags: <defaults>
</compile_context>

<pallas_src>
import math

import jax
import jax.numpy as jnp
import numpy as np
from jax import lax
from jax.experimental import pallas as pl
from jax.experimental.pallas import tpu as pltpu


def make_encoder_kernel(num_layers, V, E, H, T, B, latent_dim, compute_dtype):
    """Build the fused encoder kernel (all shapes are trace-time constants)."""
    TB = T * B

    def kernel(*refs):
        # ---- unpack refs: inputs..., outputs..., scratch ----
        seq_ref = refs[0]        # SMEM (T*B,) int32, index i = t*B + b
        emb_ref = refs[1]        # VMEM (V, 1, E) f32 embedding table
        idx = 2
        layers = []
        for _ in range(num_layers):
            # (w_ir, w_iz, w_in, w_hr, w_hz, w_hn, b_r, b_z, b_in, b_hn)
            layers.append(refs[idx:idx + 10])
            idx += 10
        wheads_ref, bheads_ref = refs[idx], refs[idx + 1]   # (L*H, 2*latent), (1, 2*latent)
        idx += 2
        mean_ref, logv_ref = refs[idx], refs[idx + 1]
        x_buf = refs[idx + 2]                               # (T*B, E) f32 gathered embeddings
        gi_r_buf, gi_z_buf, gi_n_buf = refs[idx + 3], refs[idx + 4], refs[idx + 5]

        # ---- embedding gather: T*B dynamic-row loads (leading-axis index) ----
        # (static Python loop is fine at these sizes; at real scale this would be a
        #  manual DMA gather from an HBM-resident table.)
        for i in range(TB):
            tok = seq_ref[i]                                # SMEM scalar
            x_buf[pl.ds(i, 1), :] = emb_ref[tok]            # (1, E) row

        # ---- layer-0 input projections for ALL timesteps (wide matmuls, M = T*B) ----
        (w0ir, w0iz, w0in, w0hr, w0hz, w0hn, b0r, b0z, b0in, b0hn) = layers[0]
        x_all = x_buf[...].astype(compute_dtype)            # (T*B, E)
        gi_r_buf[...] = (jnp.dot(x_all, w0ir[...], preferred_element_type=jnp.float32)
                         + b0r[...]).reshape(T, B, H)       # b_ih_r + b_hh_r folded in
        gi_z_buf[...] = (jnp.dot(x_all, w0iz[...], preferred_element_type=jnp.float32)
                         + b0z[...]).reshape(T, B, H)       # b_ih_z + b_hh_z folded in
        gi_n_buf[...] = (jnp.dot(x_all, w0in[...], preferred_element_type=jnp.float32)
                         + b0in[...]).reshape(T, B, H)      # only b_ih_n (b_hh_n stays inside r*(.))

        # ---- hoist loop-invariant weights / biases into vregs ----
        w0hr_v, w0hz_v, w0hn_v = w0hr[...], w0hz[...], w0hn[...]
        b0hn_v = b0hn[...]
        upper = []
        for l in range(1, num_layers):
            (wir, wiz, win, whr, whz, whn, br, bz, bin_, bhn) = layers[l]
            upper.append((wir[...], wiz[...], win[...], whr[...], whz[...], whn[...],
                          br[...], bz[...], bin_[...], bhn[...]))

        # ---- stacked GRU recurrence (PyTorch gate order r, z, n), fully unrolled ----
        def step(t, hs):
            new_hs = []
            # layer 0: input projection already precomputed, only h @ Whh remains
            h0 = hs[0]
            h0q = h0.astype(compute_dtype)
            gh_r = jnp.dot(h0q, w0hr_v, preferred_element_type=jnp.float32)
            gh_z = jnp.dot(h0q, w0hz_v, preferred_element_type=jnp.float32)
            gh_n = jnp.dot(h0q, w0hn_v, preferred_element_type=jnp.float32)
            r = jax.nn.sigmoid(gi_r_buf[t] + gh_r)
            z = jax.nn.sigmoid(gi_z_buf[t] + gh_z)
            n = jnp.tanh(gi_n_buf[t] + r * (gh_n + b0hn_v))
            h_new = (1.0 - z) * n + z * h0
            new_hs.append(h_new)
            x = h_new

            # upper layers: input = previous layer's fresh hidden state
            for l in range(1, num_layers):
                (wir, wiz, win, whr, whz, whn, br, bz, bin_, bhn) = upper[l - 1]
                h = hs[l]
                xq = x.astype(compute_dtype)
                hq = h.astype(compute_dtype)
                r = jax.nn.sigmoid(
                    jnp.dot(xq, wir, preferred_element_type=jnp.float32)
                    + jnp.dot(hq, whr, preferred_element_type=jnp.float32) + br)
                z = jax.nn.sigmoid(
                    jnp.dot(xq, wiz, preferred_element_type=jnp.float32)
                    + jnp.dot(hq, whz, preferred_element_type=jnp.float32) + bz)
                n = jnp.tanh(
                    jnp.dot(xq, win, preferred_element_type=jnp.float32) + bin_
                    + r * (jnp.dot(hq, whn, preferred_element_type=jnp.float32) + bhn))
                h_new = (1.0 - z) * n + z * h
                new_hs.append(h_new)
                x = h_new
            return tuple(new_hs)

        hs0 = tuple(jnp.zeros((B, H), jnp.float32) for _ in range(num_layers))
        hs = lax.fori_loop(0, T, step, hs0, unroll=True)

        # ---- fused output heads: [mean | logv] in one matmul, lane-aligned split ----
        # equivalent to concat(hs, -1) @ [wm^T | wl^T] + [bm | bl]
        head = bheads_ref[...]
        for l in range(num_layers):
            hq = hs[l].astype(compute_dtype)
            head = head + jnp.dot(hq, wheads_ref[pl.ds(l * H, H), :],
                                  preferred_element_type=jnp.float32)
        mean_ref[...] = head[:, :latent_dim]
        logv_ref[...] = head[:, latent_dim:]

    return kernel


def init_params(key, vocab_size, embedding_dim, hidden_size, num_layers, latent_dim):
    """Deterministic, PyTorch-default-style parameter init."""
    n_keys = 1 + 4 * num_layers + 4
    keys = iter(jax.random.split(key, n_keys))
    params = {}
    params["embedding"] = jax.random.normal(
        next(keys), (vocab_size, embedding_dim), jnp.float32)  # nn.Embedding ~ N(0,1)

    k = 1.0 / math.sqrt(hidden_size)
    gru = []
    for l in range(num_layers):
        in_dim = embedding_dim if l == 0 else hidden_size
        wih = jax.random.uniform(next(keys), (3 * hidden_size, in_dim), jnp.float32, -k, k)
        whh = jax.random.uniform(next(keys), (3 * hidden_size, hidden_size), jnp.float32, -k, k)
        bih = jax.random.uniform(next(keys), (3 * hidden_size,), jnp.float32, -k, k)
        bhh = jax.random.uniform(next(keys), (3 * hidden_size,), jnp.float32, -k, k)
        gru.append((wih, whh, bih, bhh))
    params["gru"] = gru

    kl = 1.0 / math.sqrt(num_layers * hidden_size)
    params["wm"] = jax.random.uniform(next(keys), (latent_dim, num_layers * hidden_size),
                                      jnp.float32, -kl, kl)
    params["bm"] = jax.random.uniform(next(keys), (latent_dim,), jnp.float32, -kl, kl)
    params["wl"] = jax.random.uniform(next(keys), (latent_dim, num_layers * hidden_size),
                                      jnp.float32, -kl, kl)
    params["bl"] = jax.random.uniform(next(keys), (latent_dim,), jnp.float32, -kl, kl)
    return params


def encoder_forward_pallas(input_seq, params, *, hidden_size, num_layers, latent_dim,
                           matmul_dtype=jnp.float32):
    """Fused Pallas forward. matmul_dtype=jnp.bfloat16 enables the bf16 MXU-operand path
    (recommended on v6e/v7x); gate elementwise math always stays f32."""
    B, T = input_seq.shape
    emb = params["embedding"]
    V, E = emb.shape
    H = hidden_size
    L = num_layers

    # ---- plain-JAX glue: layout + per-gate weight split + bias pre-adds ----
    seq_flat = jnp.transpose(input_seq).astype(jnp.int32).reshape(T * B)   # index = t*B + b
    emb3 = emb.reshape(V, 1, E)                                            # rows gathered by leading idx

    def gate_split_t(w):  # (3H, in) -> three (in, H) transposed per-gate blocks (r, z, n)
        return (jnp.transpose(w[0 * H:1 * H]),
                jnp.transpose(w[1 * H:2 * H]),
                jnp.transpose(w[2 * H:3 * H]))

    inputs = [seq_flat, emb3]
    for (wih, whh, bih, bhh) in params["gru"]:
        wir, wiz, win = (w.astype(matmul_dtype) for w in gate_split_t(wih))
        whr, whz, whn = (w.astype(matmul_dtype) for w in gate_split_t(whh))
        b_r = (bih[0 * H:1 * H] + bhh[0 * H:1 * H]).reshape(1, H)   # pre-added (r)
        b_z = (bih[1 * H:2 * H] + bhh[1 * H:2 * H]).reshape(1, H)   # pre-added (z)
        b_in = bih[2 * H:3 * H].reshape(1, H)                       # n: input-side bias
        b_hn = bhh[2 * H:3 * H].reshape(1, H)                       # n: hidden-side bias (inside r*(.))
        inputs += [wir, wiz, win, whr, whz, whn, b_r, b_z, b_in, b_hn]

    # fused heads: columns = [mean | logv]
    wheads = jnp.concatenate([jnp.transpose(params["wm"]), jnp.transpose(params["wl"])],
                             axis=1).astype(matmul_dtype)                  # (L*H, 2*latent)
    bheads = jnp.concatenate([params["bm"], params["bl"]]).reshape(1, 2 * latent_dim)
    inputs += [wheads, bheads]

    kernel = make_encoder_kernel(L, V, E, H, T, B, latent_dim, matmul_dtype)

    vmem = pl.BlockSpec(memory_space=pltpu.MemorySpace.VMEM)
    smem = pl.BlockSpec(memory_space=pltpu.MemorySpace.SMEM)
    in_specs = [smem] + [vmem] * (len(inputs) - 1)

    mean, logv = pl.pallas_call(
        kernel,
        out_shape=(jax.ShapeDtypeStruct((B, latent_dim), jnp.float32),
                   jax.ShapeDtypeStruct((B, latent_dim), jnp.float32)),
        in_specs=in_specs,
        out_specs=(vmem, vmem),
        scratch_shapes=[
            pltpu.VMEM((T * B, E), jnp.float32),   # gathered embedding rows
            pltpu.VMEM((T, B, H), jnp.float32),    # layer-0 gi_r (biases folded)
            pltpu.VMEM((T, B, H), jnp.float32),    # layer-0 gi_z
            pltpu.VMEM((T, B, H), jnp.float32),    # layer-0 gi_n
        ],
        compiler_params=pltpu.CompilerParams(vmem_limit_bytes=32 * 1024 * 1024),
    )(*inputs)
    return mean, logv


def encoder_forward_ref(input_seq, params, *, hidden_size, num_layers):
    """Pure-JAX reference matching torch semantics (for the correctness check)."""
    H = hidden_size
    emb = params["embedding"]
    x = emb[input_seq]                                               # (B, T, E)
    B, T, _ = x.shape
    hs = [jnp.zeros((B, H), jnp.float32) for _ in range(num_layers)]
    for t in range(T):
        inp = x[:, t, :]
        for l in range(num_layers):
            wih, whh, bih, bhh = params["gru"][l]
            gi = inp @ wih.T + bih
            gh = hs[l] @ whh.T + bhh
            r = jax.nn.sigmoid(gi[:, :H] + gh[:, :H])
            z = jax.nn.sigmoid(gi[:, H:2 * H] + gh[:, H:2 * H])
            n = jnp.tanh(gi[:, 2 * H:] + r * gh[:, 2 * H:])
            hs[l] = (1.0 - z) * n + z * hs[l]
            inp = hs[l]
    hidden = jnp.concatenate(hs, axis=-1)                            # (B, L*H)
    mean = hidden @ params["wm"].T + params["bm"]
    logv = hidden @ params["wl"].T + params["bl"]
    return mean, logv


if __name__ == "__main__":
    # Small, module-consistent shapes.
    vocab_size, embedding_dim, hidden_size, num_layers = 20, 16, 32, 2
    latent_dim = 1024        # fixed inside Encoder.__init__
    B, T = 2, 8

    key = jax.random.PRNGKey(0)
    pkey, dkey = jax.random.split(key)
    params = init_params(pkey, vocab_size, embedding_dim, hidden_size, num_layers, latent_dim)
    input_seq = jax.random.randint(dkey, (B, T), 0, vocab_size, dtype=jnp.int32)

    mean_ref, logv_ref = encoder_forward_ref(
        input_seq, params, hidden_size=hidden_size, num_layers=num_layers)

    # f32 path: tight correctness check.
    mean, logv = encoder_forward_pallas(
        input_seq, params,
        hidden_size=hidden_size, num_layers=num_layers, latent_dim=latent_dim)
    jax.block_until_ready((mean, logv))
    assert mean.shape == (B, latent_dim) and logv.shape == (B, latent_dim)
    np.testing.assert_allclose(np.asarray(mean), np.asarray(mean_ref), rtol=1e-3, atol=1e-3)
    np.testing.assert_allclose(np.asarray(logv), np.asarray(logv_ref), rtol=1e-3, atol=1e-3)

    # bf16 MXU-operand path (recommended on v6e/v7x): smoke test with a loose tolerance,
    # since bf16 operand rounding through the 16-step serial recurrence is expected.
    mean16, logv16 = encoder_forward_pallas(
        input_seq, params,
        hidden_size=hidden_size, num_layers=num_layers, latent_dim=latent_dim,
        matmul_dtype=jnp.bfloat16)
    jax.block_until_ready((mean16, logv16))
    np.testing.assert_allclose(np.asarray(mean16), np.asarray(mean_ref), rtol=1e-1, atol=1e-1)
    np.testing.assert_allclose(np.asarray(logv16), np.asarray(logv_ref), rtol=1e-1, atol=1e-1)

    print("KERNEL_OK")
</pallas_src>

<mosaic_0001>
module attributes {stable_mosaic.version = 11 : i64} {
  func.func @kernel(%arg0: memref<16xi32, #tpu.memory_space<smem>>, %arg1: memref<20x1x16xf32, #tpu.memory_space<vmem>>, %arg2: memref<16x32xf32, #tpu.memory_space<vmem>>, %arg3: memref<16x32xf32, #tpu.memory_space<vmem>>, %arg4: memref<16x32xf32, #tpu.memory_space<vmem>>, %arg5: memref<32x32xf32, #tpu.memory_space<vmem>>, %arg6: memref<32x32xf32, #tpu.memory_space<vmem>>, %arg7: memref<32x32xf32, #tpu.memory_space<vmem>>, %arg8: memref<1x32xf32, #tpu.memory_space<vmem>>, %arg9: memref<1x32xf32, #tpu.memory_space<vmem>>, %arg10: memref<1x32xf32, #tpu.memory_space<vmem>>, %arg11: memref<1x32xf32, #tpu.memory_space<vmem>>, %arg12: memref<32x32xf32, #tpu.memory_space<vmem>>, %arg13: memref<32x32xf32, #tpu.memory_space<vmem>>, %arg14: memref<32x32xf32, #tpu.memory_space<vmem>>, %arg15: memref<32x32xf32, #tpu.memory_space<vmem>>, %arg16: memref<32x32xf32, #tpu.memory_space<vmem>>, %arg17: memref<32x32xf32, #tpu.memory_space<vmem>>, %arg18: memref<1x32xf32, #tpu.memory_space<vmem>>, %arg19: memref<1x32xf32, #tpu.memory_space<vmem>>, %arg20: memref<1x32xf32, #tpu.memory_space<vmem>>, %arg21: memref<1x32xf32, #tpu.memory_space<vmem>>, %arg22: memref<64x2048xf32, #tpu.memory_space<vmem>>, %arg23: memref<1x2048xf32, #tpu.memory_space<vmem>>, %arg24: memref<2x1024xf32, #tpu.memory_space<vmem>>, %arg25: memref<2x1024xf32, #tpu.memory_space<vmem>>, %arg26: memref<16x16xf32, #tpu.memory_space<vmem>>, %arg27: memref<8x2x32xf32, #tpu.memory_space<vmem>>, %arg28: memref<8x2x32xf32, #tpu.memory_space<vmem>>, %arg29: memref<8x2x32xf32, #tpu.memory_space<vmem>>) attributes {dimension_semantics = [], scalar_prefetch = 0 : i64, scratch_operands = 4 : i64, tpu.core_type = #tpu.core_type<tc>} {
    %c0 = arith.constant 0 : index
    %0 = memref.load %arg0[%c0] : memref<16xi32, #tpu.memory_space<smem>>
    %1 = arith.index_cast %0 : i32 to index
    %c0_0 = arith.constant 0 : index
    %c0_1 = arith.constant 0 : index
    %2 = vector.load %arg1[%1, %c0_0, %c0_1] : memref<20x1x16xf32, #tpu.memory_space<vmem>>, vector<1x1x16xf32>
    %3 = vector.shape_cast %2 : vector<1x1x16xf32> to vector<1x16xf32>
    %c0_2 = arith.constant 0 : index
    %c0_3 = arith.constant 0 : index
    %4 = vector.load %arg26[%c0_2, %c0_3] : memref<16x16xf32, #tpu.memory_space<vmem>>, vector<1x16xf32>
    tpu.vector_store %arg26[%c0_2, %c0_3], %3 {strides = array<i32>} : memref<16x16xf32, #tpu.memory_space<vmem>>, vector<1x16xf32>,
    %c1 = arith.constant 1 : index
    %5 = memref.load %arg0[%c1] : memref<16xi32, #tpu.memory_space<smem>>
    %6 = arith.index_cast %5 : i32 to index
    %c0_4 = arith.constant 0 : index
    %c0_5 = arith.constant 0 : index
    %7 = vector.load %arg1[%6, %c0_4, %c0_5] : memref<20x1x16xf32, #tpu.memory_space<vmem>>, vector<1x1x16xf32>
    %8 = vector.shape_cast %7 : vector<1x1x16xf32> to vector<1x16xf32>
    %c1_6 = arith.constant 1 : index
    %c0_7 = arith.constant 0 : index
    %9 = vector.load %arg26[%c1_6, %c0_7] : memref<16x16xf32, #tpu.memory_space<vmem>>, vector<1x16xf32>
    tpu.vector_store %arg26[%c1_6, %c0_7], %8 {strides = array<i32>} : memref<16x16xf32, #tpu.memory_space<vmem>>, vector<1x16xf32>,
    %c2 = arith.constant 2 : index
    %10 = memref.load %arg0[%c2] : memref<16xi32, #tpu.memory_space<smem>>
    %11 = arith.index_cast %10 : i32 to index
    %c0_8 = arith.constant 0 : index
    %c0_9 = arith.constant 0 : index
    %12 = vector.load %arg1[%11, %c0_8, %c0_9] : memref<20x1x16xf32, #tpu.memory_space<vmem>>, vector<1x1x16xf32>
    %13 = vector.shape_cast %12 : vector<1x1x16xf32> to vector<1x16xf32>
    %c2_10 = arith.constant 2 : index
    %c0_11 = arith.constant 0 : index
    %14 = vector.load %arg26[%c2_10, %c0_11] : memref<16x16xf32, #tpu.memory_space<vmem>>, vector<1x16xf32>
    tpu.vector_store %arg26[%c2_10, %c0_11], %13 {strides = array<i32>} : memref<16x16xf32, #tpu.memory_space<vmem>>, vector<1x16xf32>,
    %c3 = arith.constant 3 : index
    %15 = memref.load %arg0[%c3] : memref<16xi32, #tpu.memory_space<smem>>
    %16 = arith.index_cast %15 : i32 to index
    %c0_12 = arith.constant 0 : index
    %c0_13 = arith.constant 0 : index
    %17 = vector.load %arg1[%16, %c0_12, %c0_13] : memref<20x1x16xf32, #tpu.memory_space<vmem>>, vector<1x1x16xf32>
    %18 = vector.shape_cast %17 : vector<1x1x16xf32> to vector<1x16xf32>
    %c3_14 = arith.constant 3 : index
    %c0_15 = arith.constant 0 : index
    %19 = vector.load %arg26[%c3_14, %c0_15] : memref<16x16xf32, #tpu.memory_space<vmem>>, vector<1x16xf32>
    tpu.vector_store %arg26[%c3_14, %c0_15], %18 {strides = array<i32>} : memref<16x16xf32, #tpu.memory_space<vmem>>, vector<1x16xf32>,
    %c4 = arith.constant 4 : index
    %20 = memref.load %arg0[%c4] : memref<16xi32, #tpu.memory_space<smem>>
    %21 = arith.index_cast %20 : i32 to index
    %c0_16 = arith.constant 0 : index
    %c0_17 = arith.constant 0 : index
    %22 = vector.load %arg1[%21, %c0_16, %c0_17] : memref<20x1x16xf32, #tpu.memory_space<vmem>>, vector<1x1x16xf32>
    %23 = vector.shape_cast %22 : vector<1x1x16xf32> to vector<1x16xf32>
    %c4_18 = arith.constant 4 : index
    %c0_19 = arith.constant 0 : index
    %24 = vector.load %arg26[%c4_18, %c0_19] : memref<16x16xf32, #tpu.memory_space<vmem>>, vector<1x16xf32>
    tpu.vector_store %arg26[%c4_18, %c0_19], %23 {strides = array<i32>} : memref<16x16xf32, #tpu.memory_space<vmem>>, vector<1x16xf32>,
    %c5 = arith.constant 5 : index
    %25 = memref.load %arg0[%c5] : memref<16xi32, #tpu.memory_space<smem>>
    %26 = arith.index_cast %25 : i32 to index
    %c0_20 = arith.constant 0 : index
    %c0_21 = arith.constant 0 : index
    %27 = vector.load %arg1[%26, %c0_20, %c0_21] : memref<20x1x16xf32, #tpu.memory_space<vmem>>, vector<1x1x16xf32>
    %28 = vector.shape_cast %27 : vector<1x1x16xf32> to vector<1x16xf32>
    %c5_22 = arith.constant 5 : index
    %c0_23 = arith.constant 0 : index
    %29 = vector.load %arg26[%c5_22, %c0_23] : memref<16x16xf32, #tpu.memory_space<vmem>>, vector<1x16xf32>
    tpu.vector_store %arg26[%c5_22, %c0_23], %28 {strides = array<i32>} : memref<16x16xf32, #tpu.memory_space<vmem>>, vector<1x16xf32>,
    %c6 = arith.constant 6 : index
    %30 = memref.load %arg0[%c6] : memref<16xi32, #tpu.memory_space<smem>>
    %31 = arith.index_cast %30 : i32 to index
    %c0_24 = arith.constant 0 : index
    %c0_25 = arith.constant 0 : index
    %32 = vector.load %arg1[%31, %c0_24, %c0_25] : memref<20x1x16xf32, #tpu.memory_space<vmem>>, vector<1x1x16xf32>
    %33 = vector.shape_cast %32 : vector<1x1x16xf32> to vector<1x16xf32>
    %c6_26 = arith.constant 6 : index
    %c0_27 = arith.constant 0 : index
    %34 = vector.load %arg26[%c6_26, %c0_27] : memref<16x16xf32, #tpu.memory_space<vmem>>, vector<1x16xf32>
    tpu.vector_store %arg26[%c6_26, %c0_27], %33 {strides = array<i32>} : memref<16x16xf32, #tpu.memory_space<vmem>>, vector<1x16xf32>,
    %c7 = arith.constant 7 : index
    %35 = memref.load %arg0[%c7] : memref<16xi32, #tpu.memory_space<smem>>
    %36 = arith.index_cast %35 : i32 to index
    %c0_28 = arith.constant 0 : index
    %c0_29 = arith.constant 0 : index
    %37 = vector.load %arg1[%36, %c0_28, %c0_29] : memref<20x1x16xf32, #tpu.memory_space<vmem>>, vector<1x1x16xf32>
    %38 = vector.shape_cast %37 : vector<1x1x16xf32> to vector<1x16xf32>
    %c7_30 = arith.constant 7 : index
    %c0_31 = arith.constant 0 : index
    %39 = vector.load %arg26[%c7_30, %c0_31] : memref<16x16xf32, #tpu.memory_space<vmem>>, vector<1x16xf32>
    tpu.vector_store %arg26[%c7_30, %c0_31], %38 {strides = array<i32>} : memref<16x16xf32, #tpu.memory_space<vmem>>, vector<1x16xf32>,
    %c8 = arith.constant 8 : index
    %40 = memref.load %arg0[%c8] : memref<16xi32, #tpu.memory_space<smem>>
    %41 = arith.index_cast %40 : i32 to index
    %c0_32 = arith.constant 0 : index
    %c0_33 = arith.constant 0 : index
    %42 = vector.load %arg1[%41, %c0_32, %c0_33] : memref<20x1x16xf32, #tpu.memory_space<vmem>>, vector<1x1x16xf32>
    %43 = vector.shape_cast %42 : vector<1x1x16xf32> to vector<1x16xf32>
    %c8_34 = arith.constant 8 : index
    %c0_35 = arith.constant 0 : index
    %44 = vector.load %arg26[%c8_34, %c0_35] : memref<16x16xf32, #tpu.memory_space<vmem>>, vector<1x16xf32>
    tpu.vector_store %arg26[%c8_34, %c0_35], %43 {strides = array<i32>} : memref<16x16xf32, #tpu.memory_space<vmem>>, vector<1x16xf32>,
    %c9 = arith.constant 9 : index
    %45 = memref.load %arg0[%c9] : memref<16xi32, #tpu.memory_space<smem>>
    %46 = arith.index_cast %45 : i32 to index
    %c0_36 = arith.constant 0 : index
    %c0_37 = arith.constant 0 : index
    %47 = vector.load %arg1[%46, %c0_36, %c0_37] : memref<20x1x16xf32, #tpu.memory_space<vmem>>, vector<1x1x16xf32>
    %48 = vector.shape_cast %47 : vector<1x1x16xf32> to vector<1x16xf32>
    %c9_38 = arith.constant 9 : index
    %c0_39 = arith.constant 0 : index
    %49 = vector.load %arg26[%c9_38, %c0_39] : memref<16x16xf32, #tpu.memory_space<vmem>>, vector<1x16xf32>
    tpu.vector_store %arg26[%c9_38, %c0_39], %48 {strides = array<i32>} : memref<16x16xf32, #tpu.memory_space<vmem>>, vector<1x16xf32>,
    %c10 = arith.constant 10 : index
    %50 = memref.load %arg0[%c10] : memref<16xi32, #tpu.memory_space<smem>>
    %51 = arith.index_cast %50 : i32 to index
    %c0_40 = arith.constant 0 : index
    %c0_41 = arith.constant 0 : index
    %52 = vector.load %arg1[%51, %c0_40, %c0_41] : memref<20x1x16xf32, #tpu.memory_space<vmem>>, vector<1x1x16xf32>
    %53 = vector.shape_cast %52 : vector<1x1x16xf32> to vector<1x16xf32>
    %c10_42 = arith.constant 10 : index
    %c0_43 = arith.constant 0 : index
    %54 = vector.load %arg26[%c10_42, %c0_43] : memref<16x16xf32, #tpu.memory_space<vmem>>, vector<1x16xf32>
    tpu.vector_store %arg26[%c10_42, %c0_43], %53 {strides = array<i32>} : memref<16x16xf32, #tpu.memory_space<vmem>>, vector<1x16xf32>,
    %c11 = arith.constant 11 : index
    %55 = memref.load %arg0[%c11] : memref<16xi32, #tpu.memory_space<smem>>
    %56 = arith.index_cast %55 : i32 to index
    %c0_44 = arith.constant 0 : index
    %c0_45 = arith.constant 0 : index
    %57 = vector.load %arg1[%56, %c0_44, %c0_45] : memref<20x1x16xf32, #tpu.memory_space<vmem>>, vector<1x1x16xf32>
    %58 = vector.shape_cast %57 : vector<1x1x16xf32> to vector<1x16xf32>
    %c11_46 = arith.constant 11 : index
    %c0_47 = arith.constant 0 : index
    %59 = vector.load %arg26[%c11_46, %c0_47] : memref<16x16xf32, #tpu.memory_space<vmem>>, vector<1x16xf32>
    tpu.vector_store %arg26[%c11_46, %c0_47], %58 {strides = array<i32>} : memref<16x16xf32, #tpu.memory_space<vmem>>, vector<1x16xf32>,
    %c12 = arith.constant 12 : index
    %60 = memref.load %arg0[%c12] : memref<16xi32, #tpu.memory_space<smem>>
    %61 = arith.index_cast %60 : i32 to index
    %c0_48 = arith.constant 0 : index
    %c0_49 = arith.constant 0 : index
    %62 = vector.load %arg1[%61, %c0_48, %c0_49] : memref<20x1x16xf32, #tpu.memory_space<vmem>>, vector<1x1x16xf32>
    %63 = vector.shape_cast %62 : vector<1x1x16xf32> to vector<1x16xf32>
    %c12_50 = arith.constant 12 : index
    %c0_51 = arith.constant 0 : index
    %64 = vector.load %arg26[%c12_50, %c0_51] : memref<16x16xf32, #tpu.memory_space<vmem>>, vector<1x16xf32>
    tpu.vector_store %arg26[%c12_50, %c0_51], %63 {strides = array<i32>} : memref<16x16xf32, #tpu.memory_space<vmem>>, vector<1x16xf32>,
    %c13 = arith.constant 13 : index
    %65 = memref.load %arg0[%c13] : memref<16xi32, #tpu.memory_space<smem>>
    %66 = arith.index_cast %65 : i32 to index
    %c0_52 = arith.constant 0 : index
    %c0_53 = arith.constant 0 : index
    %67 = vector.load %arg1[%66, %c0_52, %c0_53] : memref<20x1x16xf32, #tpu.memory_space<vmem>>, vector<1x1x16xf32>
    %68 = vector.shape_cast %67 : vector<1x1x16xf32> to vector<1x16xf32>
    %c13_54 = arith.constant 13 : index
    %c0_55 = arith.constant 0 : index
    %69 = vector.load %arg26[%c13_54, %c0_55] : memref<16x16xf32, #tpu.memory_space<vmem>>, vector<1x16xf32>
    tpu.vector_store %arg26[%c13_54, %c0_55], %68 {strides = array<i32>} : memref<16x16xf32, #tpu.memory_space<vmem>>, vector<1x16xf32>,
    %c14 = arith.constant 14 : index
    %70 = memref.load %arg0[%c14] : memref<16xi32, #tpu.memory_space<smem>>
    %71 = arith.index_cast %70 : i32 to index
    %c0_56 = arith.constant 0 : index
    %c0_57 = arith.constant 0 : index
    %72 = vector.load %arg1[%71, %c0_56, %c0_57] : memref<20x1x16xf32, #tpu.memory_space<vmem>>, vector<1x1x16xf32>
    %73 = vector.shape_cast %72 : vector<1x1x16xf32> to vector<1x16xf32>
    %c14_58 = arith.constant 14 : index
    %c0_59 = arith.constant 0 : index
    %74 = vector.load %arg26[%c14_58, %c0_59] : memref<16x16xf32, #tpu.memory_space<vmem>>, vector<1x16xf32>
    tpu.vector_store %arg26[%c14_58, %c0_59], %73 {strides = array<i32>} : memref<16x16xf32, #tpu.memory_space<vmem>>, vector<1x16xf32>,
    %c15 = arith.constant 15 : index
    %75 = memref.load %arg0[%c15] : memref<16xi32, #tpu.memory_space<smem>>
    %76 = arith.index_cast %75 : i32 to index
    %c0_60 = arith.constant 0 : index
    %c0_61 = arith.constant 0 : index
    %77 = vector.load %arg1[%76, %c0_60, %c0_61] : memref<20x1x16xf32, #tpu.memory_space<vmem>>, vector<1x1x16xf32>
    %78 = vector.shape_cast %77 : vector<1x1x16xf32> to vector<1x16xf32>
    %c15_62 = arith.constant 15 : index
    %c0_63 = arith.constant 0 : index
    %79 = vector.load %arg26[%c15_62, %c0_63] : memref<16x16xf32, #tpu.memory_space<vmem>>, vector<1x16xf32>
    tpu.vector_store %arg26[%c15_62, %c0_63], %78 {strides = array<i32>} : memref<16x16xf32, #tpu.memory_space<vmem>>, vector<1x16xf32>,
    %c0_64 = arith.constant 0 : index
    %c0_65 = arith.constant 0 : index
    %80 = vector.load %arg26[%c0_64, %c0_65] : memref<16x16xf32, #tpu.memory_space<vmem>>, vector<16x16xf32>
    %c0_66 = arith.constant 0 : index
    %c0_67 = arith.constant 0 : index
    %81 = vector.load %arg2[%c0_66, %c0_67] : memref<16x32xf32, #tpu.memory_space<vmem>>, vector<16x32xf32>
    %cst = arith.constant dense<0.000000e+00> : vector<16x32xf32>
    %82 = tpu.matmul %80, %81, %cst {dimension_numbers = #tpu.dot_dimension_numbers<[1], [0], [0], [1], [0, 0, 1, 1], [], []>} : vector<16x16xf32>, vector<16x32xf32>, vector<16x32xf32> -> vector<16x32xf32>
    %c0_68 = arith.constant 0 : index
    %c0_69 = arith.constant 0 : index
    %83 = vector.load %arg8[%c0_68, %c0_69] : memref<1x32xf32, #tpu.memory_space<vmem>>, vector<1x32xf32>
    %84 = vector.broadcast %83 : vector<1x32xf32> to vector<16x32xf32>
    %85 = arith.addf %82, %84 : vector<16x32xf32>
    %86 = vector.shape_cast %85 : vector<16x32xf32> to vector<8x2x32xf32>
    %c0_70 = arith.constant 0 : index
    %c0_71 = arith.constant 0 : index
    %c0_72 = arith.constant 0 : index
    %87 = vector.load %arg27[%c0_70, %c0_71, %c0_72] : memref<8x2x32xf32, #tpu.memory_space<vmem>>, vector<8x2x32xf32>
    tpu.vector_store %arg27[%c0_70, %c0_71, %c0_72], %86 {strides = array<i32>} : memref<8x2x32xf32, #tpu.memory_space<vmem>>, vector<8x2x32xf32>,
    %c0_73 = arith.constant 0 : index
    %c0_74 = arith.constant 0 : index
    %88 = vector.load %arg3[%c0_73, %c0_74] : memref<16x32xf32, #tpu.memory_space<vmem>>, vector<16x32xf32>
    %cst_75 = arith.constant dense<0.000000e+00> : vector<16x32xf32>
    %89 = tpu.matmul %80, %88, %cst_75 {dimension_numbers = #tpu.dot_dimension_numbers<[1], [0], [0], [1], [0, 0, 1, 1], [], []>} : vector<16x16xf32>, vector<16x32xf32>, vector<16x32xf32> -> vector<16x32xf32>
    %c0_76 = arith.constant 0 : index
    %c0_77 = arith.constant 0 : index
    %90 = vector.load %arg9[%c0_76, %c0_77] : memref<1x32xf32, #tpu.memory_space<vmem>>, vector<1x32xf32>
    %91 = vector.broadcast %90 : vector<1x32xf32> to vector<16x32xf32>
    %92 = arith.addf %89, %91 : vector<16x32xf32>
    %93 = vector.shape_cast %92 : vector<16x32xf32> to vector<8x2x32xf32>
    %c0_78 = arith.constant 0 : index
    %c0_79 = arith.constant 0 : index
    %c0_80 = arith.constant 0 : index
    %94 = vector.load %arg28[%c0_78, %c0_79, %c0_80] : memref<8x2x32xf32, #tpu.memory_space<vmem>>, vector<8x2x32xf32>
    tpu.vector_store %arg28[%c0_78, %c0_79, %c0_80], %93 {strides = array<i32>} : memref<8x2x32xf32, #tpu.memory_space<vmem>>, vector<8x2x32xf32>,
    %c0_81 = arith.constant 0 : index
    %c0_82 = arith.constant 0 : index
    %95 = vector.load %arg4[%c0_81, %c0_82] : memref<16x32xf32, #tpu.memory_space<vmem>>, vector<16x32xf32>
    %cst_83 = arith.constant dense<0.000000e+00> : vector<16x32xf32>
    %96 = tpu.matmul %80, %95, %cst_83 {dimension_numbers = #tpu.dot_dimension_numbers<[1], [0], [0], [1], [0, 0, 1, 1], [], []>} : vector<16x16xf32>, vector<16x32xf32>, vector<16x32xf32> -> vector<16x32xf32>
    %c0_84 = arith.constant 0 : index
    %c0_85 = arith.constant 0 : index
    %97 = vector.load %arg10[%c0_84, %c0_85] : memref<1x32xf32, #tpu.memory_space<vmem>>, vector<1x32xf32>
    %98 = vector.broadcast %97 : vector<1x32xf32> to vector<16x32xf32>
    %99 = arith.addf %96, %98 : vector<16x32xf32>
    %100 = vector.shape_cast %99 : vector<16x32xf32> to vector<8x2x32xf32>
    %c0_86 = arith.constant 0 : index
    %c0_87 = arith.constant 0 : index
    %c0_88 = arith.constant 0 : index
    %101 = vector.load %arg29[%c0_86, %c0_87, %c0_88] : memref<8x2x32xf32, #tpu.memory_space<vmem>>, vector<8x2x32xf32>
    tpu.vector_store %arg29[%c0_86, %c0_87, %c0_88], %100 {strides = array<i32>} : memref<8x2x32xf32, #tpu.memory_space<vmem>>, vector<8x2x32xf32>,
    %c0_89 = arith.constant 0 : index
    %c0_90 = arith.constant 0 : index
    %102 = vector.load %arg5[%c0_89, %c0_90] : memref<32x32xf32, #tpu.memory_space<vmem>>, vector<32x32xf32>
    %c0_91 = arith.constant 0 : index
    %c0_92 = arith.constant 0 : index
    %103 = vector.load %arg6[%c0_91, %c0_92] : memref<32x32xf32, #tpu.memory_space<vmem>>, vector<32x32xf32>
    %c0_93 = arith.constant 0 : index
    %c0_94 = arith.constant 0 : index
    %104 = vector.load %arg7[%c0_93, %c0_94] : memref<32x32xf32, #tpu.memory_space<vmem>>, vector<32x32xf32>
    %c0_95 = arith.constant 0 : index
    %c0_96 = arith.constant 0 : index
    %105 = vector.load %arg11[%c0_95, %c0_96] : memref<1x32xf32, #tpu.memory_space<vmem>>, vector<1x32xf32>
    %c0_97 = arith.constant 0 : index
    %c0_98 = arith.constant 0 : index
    %106 = vector.load %arg12[%c0_97, %c0_98] : memref<32x32xf32, #tpu.memory_space<vmem>>, vector<32x32xf32>
    %c0_99 = arith.constant 0 : index
    %c0_100 = arith.constant 0 : index
    %107 = vector.load %arg13[%c0_99, %c0_100] : memref<32x32xf32, #tpu.memory_space<vmem>>, vector<32x32xf32>
    %c0_101 = arith.constant 0 : index
    %c0_102 = arith.constant 0 : index
    %108 = vector.load %arg14[%c0_101, %c0_102] : memref<32x32xf32, #tpu.memory_space<vmem>>, vector<32x32xf32>
    %c0_103 = arith.constant 0 : index
    %c0_104 = arith.constant 0 : index
    %109 = vector.load %arg15[%c0_103, %c0_104] : memref<32x32xf32, #tpu.memory_space<vmem>>, vector<32x32xf32>
    %c0_105 = arith.constant 0 : index
    %c0_106 = arith.constant 0 : index
    %110 = vector.load %arg16[%c0_105, %c0_106] : memref<32x32xf32, #tpu.memory_space<vmem>>, vector<32x32xf32>
    %c0_107 = arith.constant 0 : index
    %c0_108 = arith.constant 0 : index
    %111 = vector.load %arg17[%c0_107, %c0_108] : memref<32x32xf32, #tpu.memory_space<vmem>>, vector<32x32xf32>
    %c0_109 = arith.constant 0 : index
    %c0_110 = arith.constant 0 : index
    %112 = vector.load %arg18[%c0_109, %c0_110] : memref<1x32xf32, #tpu.memory_space<vmem>>, vector<1x32xf32>
    %c0_111 = arith.constant 0 : index
    %c0_112 = arith.constant 0 : index
    %113 = vector.load %arg19[%c0_111, %c0_112] : memref<1x32xf32, #tpu.memory_space<vmem>>, vector<1x32xf32>
    %c0_113 = arith.constant 0 : index
    %c0_114 = arith.constant 0 : index
    %114 = vector.load %arg20[%c0_113, %c0_114] : memref<1x32xf32, #tpu.memory_space<vmem>>, vector<1x32xf32>
    %c0_115 = arith.constant 0 : index
    %c0_116 = arith.constant 0 : index
    %115 = vector.load %arg21[%c0_115, %c0_116] : memref<1x32xf32, #tpu.memory_space<vmem>>, vector<1x32xf32>
    %cst_117 = arith.constant 0.000000e+00 : f32
    %116 = vector.broadcast %cst_117 : f32 to vector<2x32xf32>
    %cst_118 = arith.constant 0.000000e+00 : f32
    %117 = vector.broadcast %cst_118 : f32 to vector<2x32xf32>
    %c0_i32 = arith.constant 0 : i32
    %cst_119 = arith.constant dense<0.000000e+00> : vector<2x32xf32>
    %118 = tpu.matmul %116, %102, %cst_119 {dimension_numbers = #tpu.dot_dimension_numbers<[1], [0], [0], [1], [0, 0, 1, 1], [], []>} : vector<2x32xf32>, vector<32x32xf32>, vector<2x32xf32> -> vector<2x32xf32>
    %cst_120 = arith.constant dense<0.000000e+00> : vector<2x32xf32>
    %119 = tpu.matmul %116, %103, %cst_120 {dimension_numbers = #tpu.dot_dimension_numbers<[1], [0], [0], [1], [0, 0, 1, 1], [], []>} : vector<2x32xf32>, vector<32x32xf32>, vector<2x32xf32> -> vector<2x32xf32>
    %cst_121 = arith.constant dense<0.000000e+00> : vector<2x32xf32>
    %120 = tpu.matmul %116, %104, %cst_121 {dimension_numbers = #tpu.dot_dimension_numbers<[1], [0], [0], [1], [0, 0, 1, 1], [], []>} : vector<2x32xf32>, vector<32x32xf32>, vector<2x32xf32> -> vector<2x32xf32>
    %121 = arith.index_cast %c0_i32 : i32 to index
    %c0_122 = arith.constant 0 : index
    %c0_123 = arith.constant 0 : index
    %122 = vector.load %arg27[%121, %c0_122, %c0_123] : memref<8x2x32xf32, #tpu.memory_space<vmem>>, vector<1x2x32xf32>
    %123 = vector.shape_cast %122 : vector<1x2x32xf32> to vector<2x32xf32>
    %124 = arith.addf %123, %118 : vector<2x32xf32>
    %125 = arith.negf %124 : vector<2x32xf32>
    %126 = math.exp %125 : vector<2x32xf32>
    %cst_124 = arith.constant 1.000000e+00 : f32
    %127 = vector.broadcast %cst_124 : f32 to vector<2x32xf32>
    %128 = arith.addf %127, %126 : vector<2x32xf32>
    %129 = arith.divf %127, %128 : vector<2x32xf32>
    %130 = arith.index_cast %c0_i32 : i32 to index
    %c0_125 = arith.constant 0 : index
    %c0_126 = arith.constant 0 : index
    %131 = vector.load %arg28[%130, %c0_125, %c0_126] : memref<8x2x32xf32, #tpu.memory_space<vmem>>, vector<1x2x32xf32>
    %132 = vector.shape_cast %131 : vector<1x2x32xf32> to vector<2x32xf32>
    %133 = arith.addf %132, %119 : vector<2x32xf32>
    %134 = arith.negf %133 : vector<2x32xf32>
    %135 = math.exp %134 : vector<2x32xf32>
    %cst_127 = arith.constant 1.000000e+00 : f32
    %136 = vector.broadcast %cst_127 : f32 to vector<2x32xf32>
    %137 = arith.addf %136, %135 : vector<2x32xf32>
    %138 = arith.divf %136, %137 : vector<2x32xf32>
    %139 = arith.index_cast %c0_i32 : i32 to index
    %c0_128 = arith.constant 0 : index
    %c0_129 = arith.constant 0 : index
    %140 = vector.load %arg29[%139, %c0_128, %c0_129] : memref<8x2x32xf32, #tpu.memory_space<vmem>>, vector<1x2x32xf32>
    %141 = vector.shape_cast %140 : vector<1x2x32xf32> to vector<2x32xf32>
    %142 = vector.broadcast %105 : vector<1x32xf32> to vector<2x32xf32>
    %143 = arith.addf %120, %142 : vector<2x32xf32>
    %144 = arith.mulf %129, %143 : vector<2x32xf32>
    %145 = arith.addf %141, %144 : vector<2x32xf32>
    %146 = math.tanh %145 : vector<2x32xf32>
    %cst_130 = arith.constant 1.000000e+00 : f32
    %147 = vector.broadcast %cst_130 : f32 to vector<2x32xf32>
    %148 = arith.subf %147, %138 : vector<2x32xf32>
    %149 = arith.mulf %148, %146 : vector<2x32xf32>
    %150 = arith.mulf %138, %116 : vector<2x32xf32>
    %151 = arith.addf %149, %150 : vector<2x32xf32>
    %cst_131 = arith.constant dense<0.000000e+00> : vector<2x32xf32>
    %152 = tpu.matmul %151, %106, %cst_131 {dimension_numbers = #tpu.dot_dimension_numbers<[1], [0], [0], [1], [0, 0, 1, 1], [], []>} : vector<2x32xf32>, vector<32x32xf32>, vector<2x32xf32> -> vector<2x32xf32>
    %cst_132 = arith.constant dense<0.000000e+00> : vector<2x32xf32>
    %153 = tpu.matmul %117, %109, %cst_132 {dimension_numbers = #tpu.dot_dimension_numbers<[1], [0], [0], [1], [0, 0, 1, 1], [], []>} : vector<2x32xf32>, vector<32x32xf32>, vector<2x32xf32> -> vector<2x32xf32>
    %154 = arith.addf %152, %153 : vector<2x32xf32>
    %155 = vector.broadcast %112 : vector<1x32xf32> to vector<2x32xf32>
    %156 = arith.addf %154, %155 : vector<2x32xf32>
    %157 = arith.negf %156 : vector<2x32xf32>
    %158 = math.exp %157 : vector<2x32xf32>
    %cst_133 = arith.constant 1.000000e+00 : f32
    %159 = vector.broadcast %cst_133 : f32 to vector<2x32xf32>
    %160 = arith.addf %159, %158 : vector<2x32xf32>
    %161 = arith.divf %159, %160 : vector<2x32xf32>
    %cst_134 = arith.constant dense<0.000000e+00> : vector<2x32xf32>
    %162 = tpu.matmul %151, %107, %cst_134 {dimension_numbers = #tpu.dot_dimension_numbers<[1], [0], [0], [1], [0, 0, 1, 1], [], []>} : vector<2x32xf32>, vector<32x32xf32>, vector<2x32xf32> -> vector<2x32xf32>
    %cst_135 = arith.constant dense<0.000000e+00> : vector<2x32xf32>
    %163 = tpu.matmul %117, %110, %cst_135 {dimension_numbers = #tpu.dot_dimension_numbers<[1], [0], [0], [1], [0, 0, 1, 1], [], []>} : vector<2x32xf32>, vector<32x32xf32>, vector<2x32xf32> -> vector<2x32xf32>
    %164 = arith.addf %162, %163 : vector<2x32xf32>
    %165 = vector.broadcast %113 : vector<1x32xf32> to vector<2x32xf32>
    %166 = arith.addf %164, %165 : vector<2x32xf32>
    %167 = arith.negf %166 : vector<2x32xf32>
    %168 = math.exp %167 : vector<2x32xf32>
    %cst_136 = arith.constant 1.000000e+00 : f32
    %169 = vector.broadcast %cst_136 : f32 to vector<2x32xf32>
    %170 = arith.addf %169, %168 : vector<2x32xf32>
    %171 = arith.divf %169, %170 : vector<2x32xf32>
    %cst_137 = arith.constant dense<0.000000e+00> : vector<2x32xf32>
    %172 = tpu.matmul %151, %108, %cst_137 {dimension_numbers = #tpu.dot_dimension_numbers<[1], [0], [0], [1], [0, 0, 1, 1], [], []>} : vector<2x32xf32>, vector<32x32xf32>, vector<2x32xf32> -> vector<2x32xf32>
    %173 = vector.broadcast %114 : vector<1x32xf32> to vector<2x32xf32>
    %174 = arith.addf %172, %173 : vector<2x32xf32>
    %cst_138 = arith.constant dense<0.000000e+00> : vector<2x32xf32>
    %175 = tpu.matmul %117, %111, %cst_138 {dimension_numbers = #tpu.dot_dimension_numbers<[1], [0], [0], [1], [0, 0, 1, 1], [], []>} : vector<2x32xf32>, vector<32x32xf32>, vector<2x32xf32> -> vector<2x32xf32>
    %176 = vector.broadcast %115 : vector<1x32xf32> to vector<2x32xf32>
    %177 = arith.addf %175, %176 : vector<2x32xf32>
    %178 = arith.mulf %161, %177 : vector<2x32xf32>
    %179 = arith.addf %174, %178 : vector<2x32xf32>
    %180 = math.tanh %179 : vector<2x32xf32>
    %cst_139 = arith.constant 1.000000e+00 : f32
    %181 = vector.broadcast %cst_139 : f32 to vector<2x32xf32>
    %182 = arith.subf %181, %171 : vector<2x32xf32>
    %183 = arith.mulf %182, %180 : vector<2x32xf32>
    %184 = arith.mulf %171, %117 : vector<2x32xf32>
    %185 = arith.addf %183, %184 : vector<2x32xf32>
    %c1_i32 = arith.constant 1 : i32
    %cst_140 = arith.constant dense<0.000000e+00> : vector<2x32xf32>
    %186 = tpu.matmul %151, %102, %cst_140 {dimension_numbers = #tpu.dot_dimension_numbers<[1], [0], [0], [1], [0, 0, 1, 1], [], []>} : vector<2x32xf32>, vector<32x32xf32>, vector<2x32xf32> -> vector<2x32xf32>
    %cst_141 = arith.constant dense<0.000000e+00> : vector<2x32xf32>
    %187 = tpu.matmul %151, %103, %cst_141 {dimension_numbers = #tpu.dot_dimension_numbers<[1], [0], [0], [1], [0, 0, 1, 1], [], []>} : vector<2x32xf32>, vector<32x32xf32>, vector<2x32xf32> -> vector<2x32xf32>
    %cst_142 = arith.constant dense<0.000000e+00> : vector<2x32xf32>
    %188 = tpu.matmul %151, %104, %cst_142 {dimension_numbers = #tpu.dot_dimension_numbers<[1], [0], [0], [1], [0, 0, 1, 1], [], []>} : vector<2x32xf32>, vector<32x32xf32>, vector<2x32xf32> -> vector<2x32xf32>
    %189 = arith.index_cast %c1_i32 : i32 to index
    %c0_143 = arith.constant 0 : index
    %c0_144 = arith.constant 0 : index
    %190 = vector.load %arg27[%189, %c0_143, %c0_144] : memref<8x2x32xf32, #tpu.memory_space<vmem>>, vector<1x2x32xf32>
    %191 = vector.shape_cast %190 : vector<1x2x32xf32> to vector<2x32xf32>
    %192 = arith.addf %191, %186 : vector<2x32xf32>
    %193 = arith.negf %192 : vector<2x32xf32>
    %194 = math.exp %193 : vector<2x32xf32>
    %cst_145 = arith.constant 1.000000e+00 : f32
    %195 = vector.broadcast %cst_145 : f32 to vector<2x32xf32>
    %196 = arith.addf %195, %194 : vector<2x32xf32>
    %197 = arith.divf %195, %196 : vector<2x32xf32>
    %198 = arith.index_cast %c1_i32 : i32 to index
    %c0_146 = arith.constant 0 : index
    %c0_147 = arith.constant 0 : index
    %199 = vector.load %arg28[%198, %c0_146, %c0_147] : memref<8x2x32xf32, #tpu.memory_space<vmem>>, vector<1x2x32xf32>
    %200 = vector.shape_cast %199 : vector<1x2x32xf32> to vector<2x32xf32>
    %201 = arith.addf %200, %187 : vector<2x32xf32>
    %202 = arith.negf %201 : vector<2x32xf32>
    %203 = math.exp %202 : vector<2x32xf32>
    %cst_148 = arith.constant 1.000000e+00 : f32
    %204 = vector.broadcast %cst_148 : f32 to vector<2x32xf32>
    %205 = arith.addf %204, %203 : vector<2x32xf32>
    %206 = arith.divf %204, %205 : vector<2x32xf32>
    %207 = arith.index_cast %c1_i32 : i32 to index
    %c0_149 = arith.constant 0 : index
    %c0_150 = arith.constant 0 : index
    %208 = vector.load %arg29[%207, %c0_149, %c0_150] : memref<8x2x32xf32, #tpu.memory_space<vmem>>, vector<1x2x32xf32>
    %209 = vector.shape_cast %208 : vector<1x2x32xf32> to vector<2x32xf32>
    %210 = vector.broadcast %105 : vector<1x32xf32> to vector<2x32xf32>
    %211 = arith.addf %188, %210 : vector<2x32xf32>
    %212 = arith.mulf %197, %211 : vector<2x32xf32>
    %213 = arith.addf %209, %212 : vector<2x32xf32>
    %214 = math.tanh %213 : vector<2x32xf32>
    %cst_151 = arith.constant 1.000000e+00 : f32
    %215 = vector.broadcast %cst_151 : f32 to vector<2x32xf32>
    %216 = arith.subf %215, %206 : vector<2x32xf32>
    %217 = arith.mulf %216, %214 : vector<2x32xf32>
    %218 = arith.mulf %206, %151 : vector<2x32xf32>
    %219 = arith.addf %217, %218 : vector<2x32xf32>
    %cst_152 = arith.constant dense<0.000000e+00> : vector<2x32xf32>
    %220 = tpu.matmul %219, %106, %cst_152 {dimension_numbers = #tpu.dot_dimension_numbers<[1], [0], [0], [1], [0, 0, 1, 1], [], []>} : vector<2x32xf32>, vector<32x32xf32>, vector<2x32xf32> -> vector<2x32xf32>
    %cst_153 = arith.constant dense<0.000000e+00> : vector<2x32xf32>
    %221 = tpu.matmul %185, %109, %cst_153 {dimension_numbers = #tpu.dot_dimension_numbers<[1], [0], [0], [1], [0, 0, 1, 1], [], []>} : vector<2x32xf32>, vector<32x32xf32>, vector<2x32xf32> -> vector<2x32xf32>
    %222 = arith.addf %220, %221 : vector<2x32xf32>
    %223 = vector.broadcast %112 : vector<1x32xf32> to vector<2x32xf32>
    %224 = arith.addf %222, %223 : vector<2x32xf32>
    %225 = arith.negf %224 : vector<2x32xf32>
    %226 = math.exp %225 : vector<2x32xf32>
    %cst_154 = arith.constant 1.000000e+00 : f32
    %227 = vector.broadcast %cst_154 : f32 to vector<2x32xf32>
    %228 = arith.addf %227, %226 : vector<2x32xf32>
    %229 = arith.divf %227, %228 : vector<2x32xf32>
    %cst_155 = arith.constant dense<0.000000e+00> : vector<2x32xf32>
    %230 = tpu.matmul %219, %107, %cst_155 {dimension_numbers = #tpu.dot_dimension_numbers<[1], [0], [0], [1], [0, 0, 1, 1], [], []>} : vector<2x32xf32>, vector<32x32xf32>, vector<2x32xf32> -> vector<2x32xf32>
    %cst_156 = arith.constant dense<0.000000e+00> : vector<2x32xf32>
    %231 = tpu.matmul %185, %110, %cst_156 {dimension_numbers = #tpu.dot_dimension_numbers<[1], [0], [0], [1], [0, 0, 1, 1], [], []>} : vector<2x32xf32>, vector<32x32xf32>, vector<2x32xf32> -> vector<2x32xf32>
    %232 = arith.addf %230, %231 : vector<2x32xf32>
    %233 = vector.broadcast %113 : vector<1x32xf32> to vector<2x32xf32>
    %234 = arith.addf %232, %233 : vector<2x32xf32>
    %235 = arith.negf %234 : vector<2x32xf32>
    %236 = math.exp %235 : vector<2x32xf32>
    %cst_157 = arith.constant 1.000000e+00 : f32
    %237 = vector.broadcast %cst_157 : f32 to vector<2x32xf32>
    %238 = arith.addf %237, %236 : vector<2x32xf32>
    %239 = arith.divf %237, %238 : vector<2x32xf32>
    %cst_158 = arith.constant dense<0.000000e+00> : vector<2x32xf32>
    %240 = tpu.matmul %219, %108, %cst_158 {dimension_numbers = #tpu.dot_dimension_numbers<[1], [0], [0], [1], [0, 0, 1, 1], [], []>} : vector<2x32xf32>, vector<32x32xf32>, vector<2x32xf32> -> vector<2x32xf32>
    %241 = vector.broadcast %114 : vector<1x32xf32> to vector<2x32xf32>
    %242 = arith.addf %240, %241 : vector<2x32xf32>
    %cst_159 = arith.constant dense<0.000000e+00> : vector<2x32xf32>
    %243 = tpu.matmul %185, %111, %cst_159 {dimension_numbers = #tpu.dot_dimension_numbers<[1], [0], [0], [1], [0, 0, 1, 1], [], []>} : vector<2x32xf32>, vector<32x32xf32>, vector<2x32xf32> -> vector<2x32xf32>
    %244 = vector.broadcast %115 : vector<1x32xf32> to vector<2x32xf32>
    %245 = arith.addf %243, %244 : vector<2x32xf32>
    %246 = arith.mulf %229, %245 : vector<2x32xf32>
    %247 = arith.addf %242, %246 : vector<2x32xf32>
    %248 = math.tanh %247 : vector<2x32xf32>
    %cst_160 = arith.constant 1.000000e+00 : f32
    %249 = vector.broadcast %cst_160 : f32 to vector<2x32xf32>
    %250 = arith.subf %249, %239 : vector<2x32xf32>
    %251 = arith.mulf %250, %248 : vector<2x32xf32>
    %252 = arith.mulf %239, %185 : vector<2x32xf32>
    %253 = arith.addf %251, %252 : vector<2x32xf32>
    %c2_i32 = arith.constant 2 : i32
    %cst_161 = arith.constant dense<0.000000e+00> : vector<2x32xf32>
    %254 = tpu.matmul %219, %102, %cst_161 {dimension_numbers = #tpu.dot_dimension_numbers<[1], [0], [0], [1], [0, 0, 1, 1], [], []>} : vector<2x32xf32>, vector<32x32xf32>, vector<2x32xf32> -> vector<2x32xf32>
    %cst_162 = arith.constant dense<0.000000e+00> : vector<2x32xf32>
    %255 = tpu.matmul %219, %103, %cst_162 {dimension_numbers = #tpu.dot_dimension_numbers<[1], [0], [0], [1], [0, 0, 1, 1], [], []>} : vector<2x32xf32>, vector<32x32xf32>, vector<2x32xf32> -> vector<2x32xf32>
    %cst_163 = arith.constant dense<0.000000e+00> : vector<2x32xf32>
    %256 = tpu.matmul %219, %104, %cst_163 {dimension_numbers = #tpu.dot_dimension_numbers<[1], [0], [0], [1], [0, 0, 1, 1], [], []>} : vector<2x32xf32>, vector<32x32xf32>, vector<2x32xf32> -> vector<2x32xf32>
    %257 = arith.index_cast %c2_i32 : i32 to index
    %c0_164 = arith.constant 0 : index
    %c0_165 = arith.constant 0 : index
    %258 = vector.load %arg27[%257, %c0_164, %c0_165] : memref<8x2x32xf32, #tpu.memory_space<vmem>>, vector<1x2x32xf32>
    %259 = vector.shape_cast %258 : vector<1x2x32xf32> to vector<2x32xf32>
    %260 = arith.addf %259, %254 : vector<2x32xf32>
    %261 = arith.negf %260 : vector<2x32xf32>
    %262 = math.exp %261 : vector<2x32xf32>
    %cst_166 = arith.constant 1.000000e+00 : f32
    %263 = vector.broadcast %cst_166 : f32 to vector<2x32xf32>
    %264 = arith.addf %263, %262 : vector<2x32xf32>
    %265 = arith.divf %263, %264 : vector<2x32xf32>
    %266 = arith.index_cast %c2_i32 : i32 to index
    %c0_167 = arith.constant 0 : index
    %c0_168 = arith.constant 0 : index
    %267 = vector.load %arg28[%266, %c0_167, %c0_168] : memref<8x2x32xf32, #tpu.memory_space<vmem>>, vector<1x2x32xf32>
    %268 = vector.shape_cast %267 : vector<1x2x32xf32> to vector<2x32xf32>
    %269 = arith.addf %268, %255 : vector<2x32xf32>
    %270 = arith.negf %269 : vector<2x32xf32>
    %271 = math.exp %270 : vector<2x32xf32>
    %cst_169 = arith.constant 1.000000e+00 : f32
    %272 = vector.broadcast %cst_169 : f32 to vector<2x32xf32>
    %273 = arith.addf %272, %271 : vector<2x32xf32>
    %274 = arith.divf %272, %273 : vector<2x32xf32>
    %275 = arith.index_cast %c2_i32 : i32 to index
    %c0_170 = arith.constant 0 : index
    %c0_171 = arith.constant 0 : index
    %276 = vector.load %arg29[%275, %c0_170, %c0_171] : memref<8x2x32xf32, #tpu.memory_space<vmem>>, vector<1x2x32xf32>
    %277 = vector.shape_cast %276 : vector<1x2x32xf32> to vector<2x32xf32>
    %278 = vector.broadcast %105 : vector<1x32xf32> to vector<2x32xf32>
    %279 = arith.addf %256, %278 : vector<2x32xf32>
    %280 = arith.mulf %265, %279 : vector<2x32xf32>
    %281 = arith.addf %277, %280 : vector<2x32xf32>
    %282 = math.tanh %281 : vector<2x32xf32>
    %cst_172 = arith.constant 1.000000e+00 : f32
    %283 = vector.broadcast %cst_172 : f32 to vector<2x32xf32>
    %284 = arith.subf %283, %274 : vector<2x32xf32>
    %285 = arith.mulf %284, %282 : vector<2x32xf32>
    %286 = arith.mulf %274, %219 : vector<2x32xf32>
    %287 = arith.addf %285, %286 : vector<2x32xf32>
    %cst_173 = arith.constant dense<0.000000e+00> : vector<2x32xf32>
    %288 = tpu.matmul %287, %106, %cst_173 {dimension_numbers = #tpu.dot_dimension_numbers<[1], [0], [0], [1], [0, 0, 1, 1], [], []>} : vector<2x32xf32>, vector<32x32xf32>, vector<2x32xf32> -> vector<2x32xf32>
    %cst_174 = arith.constant dense<0.000000e+00> : vector<2x32xf32>
    %289 = tpu.matmul %253, %109, %cst_174 {dimension_numbers = #tpu.dot_dimension_numbers<[1], [0], [0], [1], [0, 0, 1, 1], [], []>} : vector<2x32xf32>, vector<32x32xf32>, vector<2x32xf32> -> vector<2x32xf32>
    %290 = arith.addf %288, %289 : vector<2x32xf32>
    %291 = vector.broadcast %112 : vector<1x32xf32> to vector<2x32xf32>
    %292 = arith.addf %290, %291 : vector<2x32xf32>
    %293 = arith.negf %292 : vector<2x32xf32>
    %294 = math.exp %293 : vector<2x32xf32>
    %cst_175 = arith.constant 1.000000e+00 : f32
    %295 = vector.broadcast %cst_175 : f32 to vector<2x32xf32>
    %296 = arith.addf %295, %294 : vector<2x32xf32>
    %297 = arith.divf %295, %296 : vector<2x32xf32>
    %cst_176 = arith.constant dense<0.000000e+00> : vector<2x32xf32>
    %298 = tpu.matmul %287, %107, %cst_176 {dimension_numbers = #tpu.dot_dimension_numbers<[1], [0], [0], [1], [0, 0, 1, 1], [], []>} : vector<2x32xf32>, vector<32x32xf32>, vector<2x32xf32> -> vector<2x32xf32>
    %cst_177 = arith.constant dense<0.000000e+00> : vector<2x32xf32>
    %299 = tpu.matmul %253, %110, %cst_177 {dimension_numbers = #tpu.dot_dimension_numbers<[1], [0], [0], [1], [0, 0, 1, 1], [], []>} : vector<2x32xf32>, vector<32x32xf32>, vector<2x32xf32> -> vector<2x32xf32>
    %300 = arith.addf %298, %299 : vector<2x32xf32>
    %301 = vector.broadcast %113 : vector<1x32xf32> to vector<2x32xf32>
    %302 = arith.addf %300, %301 : vector<2x32xf32>
    %303 = arith.negf %302 : vector<2x32xf32>
    %304 = math.exp %303 : vector<2x32xf32>
    %cst_178 = arith.constant 1.000000e+00 : f32
    %305 = vector.broadcast %cst_178 : f32 to vector<2x32xf32>
    %306 = arith.addf %305, %304 : vector<2x32xf32>
    %307 = arith.divf %305, %306 : vector<2x32xf32>
    %cst_179 = arith.constant dense<0.000000e+00> : vector<2x32xf32>
    %308 = tpu.matmul %287, %108, %cst_179 {dimension_numbers = #tpu.dot_dimension_numbers<[1], [0], [0], [1], [0, 0, 1, 1], [], []>} : vector<2x32xf32>, vector<32x32xf32>, vector<2x32xf32> -> vector<2x32xf32>
    %309 = vector.broadcast %114 : vector<1x32xf32> to vector<2x32xf32>
    %310 = arith.addf %308, %309 : vector<2x32xf32>
    %cst_180 = arith.constant dense<0.000000e+00> : vector<2x32xf32>
    %311 = tpu.matmul %253, %111, %cst_180 {dimension_numbers = #tpu.dot_dimension_numbers<[1], [0], [0], [1], [0, 0, 1, 1], [], []>} : vector<2x32xf32>, vector<32x32xf32>, vector<2x32xf32> -> vector<2x32xf32>
    %312 = vector.broadcast %115 : vector<1x32xf32> to vector<2x32xf32>
    %313 = arith.addf %311, %312 : vector<2x32xf32>
    %314 = arith.mulf %297, %313 : vector<2x32xf32>
    %315 = arith.addf %310, %314 : vector<2x32xf32>
    %316 = math.tanh %315 : vector<2x32xf32>
    %cst_181 = arith.constant 1.000000e+00 : f32
    %317 = vector.broadcast %cst_181 : f32 to vector<2x32xf32>
    %318 = arith.subf %317, %307 : vector<2x32xf32>
    %319 = arith.mulf %318, %316 : vector<2x32xf32>
    %320 = arith.mulf %307, %253 : vector<2x32xf32>
    %321 = arith.addf %319, %320 : vector<2x32xf32>
    %c3_i32 = arith.constant 3 : i32
    %cst_182 = arith.constant dense<0.000000e+00> : vector<2x32xf32>
    %322 = tpu.matmul %287, %102, %cst_182 {dimension_numbers = #tpu.dot_dimension_numbers<[1], [0], [0], [1], [0, 0, 1, 1], [], []>} : vector<2x32xf32>, vector<32x32xf32>, vector<2x32xf32> -> vector<2x32xf32>
    %cst_183 = arith.constant dense<0.000000e+00> : vector<2x32xf32>
    %323 = tpu.matmul %287, %103, %cst_183 {dimension_numbers = #tpu.dot_dimension_numbers<[1], [0], [0], [1], [0, 0, 1, 1], [], []>} : vector<2x32xf32>, vector<32x32xf32>, vector<2x32xf32> -> vector<2x32xf32>
    %cst_184 = arith.constant dense<0.000000e+00> : vector<2x32xf32>
    %324 = tpu.matmul %287, %104, %cst_184 {dimension_numbers = #tpu.dot_dimension_numbers<[1], [0], [0], [1], [0, 0, 1, 1], [], []>} : vector<2x32xf32>, vector<32x32xf32>, vector<2x32xf32> -> vector<2x32xf32>
    %325 = arith.index_cast %c3_i32 : i32 to index
    %c0_185 = arith.constant 0 : index
    %c0_186 = arith.constant 0 : index
    %326 = vector.load %arg27[%325, %c0_185, %c0_186] : memref<8x2x32xf32, #tpu.memory_space<vmem>>, vector<1x2x32xf32>
    %327 = vector.shape_cast %326 : vector<1x2x32xf32> to vector<2x32xf32>
    %328 = arith.addf %327, %322 : vector<2x32xf32>
    %329 = arith.negf %328 : vector<2x32xf32>
    %330 = math.exp %329 : vector<2x32xf32>
    %cst_187 = arith.constant 1.000000e+00 : f32
    %331 = vector.broadcast %cst_187 : f32 to vector<2x32xf32>
    %332 = arith.addf %331, %330 : vector<2x32xf32>
    %333 = arith.divf %331, %332 : vector<2x32xf32>
    %334 = arith.index_cast %c3_i32 : i32 to index
    %c0_188 = arith.constant 0 : index
    %c0_189 = arith.constant 0 : index
    %335 = vector.load %arg28[%334, %c0_188, %c0_189] : memref<8x2x32xf32, #tpu.memory_space<vmem>>, vector<1x2x32xf32>
    %336 = vector.shape_cast %335 : vector<1x2x32xf32> to vector<2x32xf32>
    %337 = arith.addf %336, %323 : vector<2x32xf32>
    %338 = arith.negf %337 : vector<2x32xf32>
    %339 = math.exp %338 : vector<2x32xf32>
    %cst_190 = arith.constant 1.000000e+00 : f32
    %340 = vector.broadcast %cst_190 : f32 to vector<2x32xf32>
    %341 = arith.addf %340, %339 : vector<2x32xf32>
    %342 = arith.divf %340, %341 : vector<2x32xf32>
    %343 = arith.index_cast %c3_i32 : i32 to index
    %c0_191 = arith.constant 0 : index
    %c0_192 = arith.constant 0 : index
    %344 = vector.load %arg29[%343, %c0_191, %c0_192] : memref<8x2x32xf32, #tpu.memory_space<vmem>>, vector<1x2x32xf32>
    %345 = vector.shape_cast %344 : vector<1x2x32xf32> to vector<2x32xf32>
    %346 = vector.broadcast %105 : vector<1x32xf32> to vector<2x32xf32>
    %347 = arith.addf %324, %346 : vector<2x32xf32>
    %348 = arith.mulf %333, %347 : vector<2x32xf32>
    %349 = arith.addf %345, %348 : vector<2x32xf32>
    %350 = math.tanh %349 : vector<2x32xf32>
    %cst_193 = arith.constant 1.000000e+00 : f32
    %351 = vector.broadcast %cst_193 : f32 to vector<2x32xf32>
    %352 = arith.subf %351, %342 : vector<2x32xf32>
    %353 = arith.mulf %352, %350 : vector<2x32xf32>
    %354 = arith.mulf %342, %287 : vector<2x32xf32>
    %355 = arith.addf %353, %354 : vector<2x32xf32>
    %cst_194 = arith.constant dense<0.000000e+00> : vector<2x32xf32>
    %356 = tpu.matmul %355, %106, %cst_194 {dimension_numbers = #tpu.dot_dimension_numbers<[1], [0], [0], [1], [0, 0, 1, 1], [], []>} : vector<2x32xf32>, vector<32x32xf32>, vector<2x32xf32> -> vector<2x32xf32>
    %cst_195 = arith.constant dense<0.000000e+00> : vector<2x32xf32>
    %357 = tpu.matmul %321, %109, %cst_195 {dimension_numbers = #tpu.dot_dimension_numbers<[1], [0], [0], [1], [0, 0, 1, 1], [], []>} : vector<2x32xf32>, vector<32x32xf32>, vector<2x32xf32> -> vector<2x32xf32>
    %358 = arith.addf %356, %357 : vector<2x32xf32>
    %359 = vector.broadcast %112 : vector<1x32xf32> to vector<2x32xf32>
    %360 = arith.addf %358, %359 : vector<2x32xf32>
    %361 = arith.negf %360 : vector<2x32xf32>
    %362 = math.exp %361 : vector<2x32xf32>
    %cst_196 = arith.constant 1.000000e+00 : f32
    %363 = vector.broadcast %cst_196 : f32 to vector<2x32xf32>
    %364 = arith.addf %363, %362 : vector<2x32xf32>
    %365 = arith.divf %363, %364 : vector<2x32xf32>
    %cst_197 = arith.constant dense<0.000000e+00> : vector<2x32xf32>
    %366 = tpu.matmul %355, %107, %cst_197 {dimension_numbers = #tpu.dot_dimension_numbers<[1], [0], [0], [1], [0, 0, 1, 1], [], []>} : vector<2x32xf32>, vector<32x32xf32>, vector<2x32xf32> -> vector<2x32xf32>
    %cst_198 = arith.constant dense<0.000000e+00> : vector<2x32xf32>
    %367 = tpu.matmul %321, %110, %cst_198 {dimension_numbers = #tpu.dot_dimension_numbers<[1], [0], [0], [1], [0, 0, 1, 1], [], []>} : vector<2x32xf32>, vector<32x32xf32>, vector<2x32xf32> -> vector<2x32xf32>
    %368 = arith.addf %366, %367 : vector<2x32xf32>
    %369 = vector.broadcast %113 : vector<1x32xf32> to vector<2x32xf32>
    %370 = arith.addf %368, %369 : vector<2x32xf32>
    %371 = arith.negf %370 : vector<2x32xf32>
    %372 = math.exp %371 : vector<2x32xf32>
    %cst_199 = arith.constant 1.000000e+00 : f32
    %373 = vector.broadcast %cst_199 : f32 to vector<2x32xf32>
    %374 = arith.addf %373, %372 : vector<2x32xf32>
    %375 = arith.divf %373, %374 : vector<2x32xf32>
    %cst_200 = arith.constant dense<0.000000e+00> : vector<2x32xf32>
    %376 = tpu.matmul %355, %108, %cst_200 {dimension_numbers = #tpu.dot_dimension_numbers<[1], [0], [0], [1], [0, 0, 1, 1], [], []>} : vector<2x32xf32>, vector<32x32xf32>, vector<2x32xf32> -> vector<2x32xf32>
    %377 = vector.broadcast %114 : vector<1x32xf32> to vector<2x32xf32>
    %378 = arith.addf %376, %377 : vector<2x32xf32>
    %cst_201 = arith.constant dense<0.000000e+00> : vector<2x32xf32>
    %379 = tpu.matmul %321, %111, %cst_201 {dimension_numbers = #tpu.dot_dimension_numbers<[1], [0], [0], [1], [0, 0, 1, 1], [], []>} : vector<2x32xf32>, vector<32x32xf32>, vector<2x32xf32> -> vector<2x32xf32>
    %380 = vector.broadcast %115 : vector<1x32xf32> to vector<2x32xf32>
    %381 = arith.addf %379, %380 : vector<2x32xf32>
    %382 = arith.mulf %365, %381 : vector<2x32xf32>
    %383 = arith.addf %378, %382 : vector<2x32xf32>
    %384 = math.tanh %383 : vector<2x32xf32>
    %cst_202 = arith.constant 1.000000e+00 : f32
    %385 = vector.broadcast %cst_202 : f32 to vector<2x32xf32>
    %386 = arith.subf %385, %375 : vector<2x32xf32>
    %387 = arith.mulf %386, %384 : vector<2x32xf32>
    %388 = arith.mulf %375, %321 : vector<2x32xf32>
    %389 = arith.addf %387, %388 : vector<2x32xf32>
    %c4_i32 = arith.constant 4 : i32
    %cst_203 = arith.constant dense<0.000000e+00> : vector<2x32xf32>
    %390 = tpu.matmul %355, %102, %cst_203 {dimension_numbers = #tpu.dot_dimension_numbers<[1], [0], [0], [1], [0, 0, 1, 1], [], []>} : vector<2x32xf32>, vector<32x32xf32>, vector<2x32xf32> -> vector<2x32xf32>
    %cst_204 = arith.constant dense<0.000000e+00> : vector<2x32xf32>
    %391 = tpu.matmul %355, %103, %cst_204 {dimension_numbers = #tpu.dot_dimension_numbers<[1], [0], [0], [1], [0, 0, 1, 1], [], []>} : vector<2x32xf32>, vector<32x32xf32>, vector<2x32xf32> -> vector<2x32xf32>
    %cst_205 = arith.constant dense<0.000000e+00> : vector<2x32xf32>
    %392 = tpu.matmul %355, %104, %cst_205 {dimension_numbers = #tpu.dot_dimension_numbers<[1], [0], [0], [1], [0, 0, 1, 1], [], []>} : vector<2x32xf32>, vector<32x32xf32>, vector<2x32xf32> -> vector<2x32xf32>
    %393 = arith.index_cast %c4_i32 : i32 to index
    %c0_206 = arith.constant 0 : index
    %c0_207 = arith.constant 0 : index
    %394 = vector.load %arg27[%393, %c0_206, %c0_207] : memref<8x2x32xf32, #tpu.memory_space<vmem>>, vector<1x2x32xf32>
    %395 = vector.shape_cast %394 : vector<1x2x32xf32> to vector<2x32xf32>
    %396 = arith.addf %395, %390 : vector<2x32xf32>
    %397 = arith.negf %396 : vector<2x32xf32>
    %398 = math.exp %397 : vector<2x32xf32>
    %cst_208 = arith.constant 1.000000e+00 : f32
    %399 = vector.broadcast %cst_208 : f32 to vector<2x32xf32>
    %400 = arith.addf %399, %398 : vector<2x32xf32>
    %401 = arith.divf %399, %400 : vector<2x32xf32>
    %402 = arith.index_cast %c4_i32 : i32 to index
    %c0_209 = arith.constant 0 : index
    %c0_210 = arith.constant 0 : index
    %403 = vector.load %arg28[%402, %c0_209, %c0_210] : memref<8x2x32xf32, #tpu.memory_space<vmem>>, vector<1x2x32xf32>
    %404 = vector.shape_cast %403 : vector<1x2x32xf32> to vector<2x32xf32>
    %405 = arith.addf %404, %391 : vector<2x32xf32>
    %406 = arith.negf %405 : vector<2x32xf32>
    %407 = math.exp %406 : vector<2x32xf32>
    %cst_211 = arith.constant 1.000000e+00 : f32
    %408 = vector.broadcast %cst_211 : f32 to vector<2x32xf32>
    %409 = arith.addf %408, %407 : vector<2x32xf32>
    %410 = arith.divf %408, %409 : vector<2x32xf32>
    %411 = arith.index_cast %c4_i32 : i32 to index
    %c0_212 = arith.constant 0 : index
    %c0_213 = arith.constant 0 : index
    %412 = vector.load %arg29[%411, %c0_212, %c0_213] : memref<8x2x32xf32, #tpu.memory_space<vmem>>, vector<1x2x32xf32>
    %413 = vector.shape_cast %412 : vector<1x2x32xf32> to vector<2x32xf32>
    %414 = vector.broadcast %105 : vector<1x32xf32> to vector<2x32xf32>
    %415 = arith.addf %392, %414 : vector<2x32xf32>
    %416 = arith.mulf %401, %415 : vector<2x32xf32>
    %417 = arith.addf %413, %416 : vector<2x32xf32>
    %418 = math.tanh %417 : vector<2x32xf32>
    %cst_214 = arith.constant 1.000000e+00 : f32
    %419 = vector.broadcast %cst_214 : f32 to vector<2x32xf32>
    %420 = arith.subf %419, %410 : vector<2x32xf32>
    %421 = arith.mulf %420, %418 : vector<2x32xf32>
    %422 = arith.mulf %410, %355 : vector<2x32xf32>
    %423 = arith.addf %421, %422 : vector<2x32xf32>
    %cst_215 = arith.constant dense<0.000000e+00> : vector<2x32xf32>
    %424 = tpu.matmul %423, %106, %cst_215 {dimension_numbers = #tpu.dot_dimension_numbers<[1], [0], [0], [1], [0, 0, 1, 1], [], []>} : vector<2x32xf32>, vector<32x32xf32>, vector<2x32xf32> -> vector<2x32xf32>
    %cst_216 = arith.constant dense<0.000000e+00> : vector<2x32xf32>
    %425 = tpu.matmul %389, %109, %cst_216 {dimension_numbers = #tpu.dot_dimension_numbers<[1], [0], [0], [1], [0, 0, 1, 1], [], []>} : vector<2x32xf32>, vector<32x32xf32>, vector<2x32xf32> -> vector<2x32xf32>
    %426 = arith.addf %424, %425 : vector<2x32xf32>
    %427 = vector.broadcast %112 : vector<1x32xf32> to vector<2x32xf32>
    %428 = arith.addf %426, %427 : vector<2x32xf32>
    %429 = arith.negf %428 : vector<2x32xf32>
    %430 = math.exp %429 : vector<2x32xf32>
    %cst_217 = arith.constant 1.000000e+00 : f32
    %431 = vector.broadcast %cst_217 : f32 to vector<2x32xf32>
    %432 = arith.addf %431, %430 : vector<2x32xf32>
    %433 = arith.divf %431, %432 : vector<2x32xf32>
    %cst_218 = arith.constant dense<0.000000e+00> : vector<2x32xf32>
    %434 = tpu.matmul %423, %107, %cst_218 {dimension_numbers = #tpu.dot_dimension_numbers<[1], [0], [0], [1], [0, 0, 1, 1], [], []>} : vector<2x32xf32>, vector<32x32xf32>, vector<2x32xf32> -> vector<2x32xf32>
    %cst_219 = arith.constant dense<0.000000e+00> : vector<2x32xf32>
    %435 = tpu.matmul %389, %110, %cst_219 {dimension_numbers = #tpu.dot_dimension_numbers<[1], [0], [0], [1], [0, 0, 1, 1], [], []>} : vector<2x32xf32>, vector<32x32xf32>, vector<2x32xf32> -> vector<2x32xf32>
    %436 = arith.addf %434, %435 : vector<2x32xf32>
    %437 = vector.broadcast %113 : vector<1x32xf32> to vector<2x32xf32>
    %438 = arith.addf %436, %437 : vector<2x32xf32>
    %439 = arith.negf %438 : vector<2x32xf32>
    %440 = math.exp %439 : vector<2x32xf32>
    %cst_220 = arith.constant 1.000000e+00 : f32
    %441 = vector.broadcast %cst_220 : f32 to vector<2x32xf32>
    %442 = arith.addf %441, %440 : vector<2x32xf32>
    %443 = arith.divf %441, %442 : vector<2x32xf32>
    %cst_221 = arith.constant dense<0.000000e+00> : vector<2x32xf32>
    %444 = tpu.matmul %423, %108, %cst_221 {dimension_numbers = #tpu.dot_dimension_numbers<[1], [0], [0], [1], [0, 0, 1, 1], [], []>} : vector<2x32xf32>, vector<32x32xf32>, vector<2x32xf32> -> vector<2x32xf32>
    %445 = vector.broadcast %114 : vector<1x32xf32> to vector<2x32xf32>
    %446 = arith.addf %444, %445 : vector<2x32xf32>
    %cst_222 = arith.constant dense<0.000000e+00> : vector<2x32xf32>
    %447 = tpu.matmul %389, %111, %cst_222 {dimension_numbers = #tpu.dot_dimension_numbers<[1], [0], [0], [1], [0, 0, 1, 1], [], []>} : vector<2x32xf32>, vector<32x32xf32>, vector<2x32xf32> -> vector<2x32xf32>
    %448 = vector.broadcast %115 : vector<1x32xf32> to vector<2x32xf32>
    %449 = arith.addf %447, %448 : vector<2x32xf32>
    %450 = arith.mulf %433, %449 : vector<2x32xf32>
    %451 = arith.addf %446, %450 : vector<2x32xf32>
    %452 = math.tanh %451 : vector<2x32xf32>
    %cst_223 = arith.constant 1.000000e+00 : f32
    %453 = vector.broadcast %cst_223 : f32 to vector<2x32xf32>
    %454 = arith.subf %453, %443 : vector<2x32xf32>
    %455 = arith.mulf %454, %452 : vector<2x32xf32>
    %456 = arith.mulf %443, %389 : vector<2x32xf32>
    %457 = arith.addf %455, %456 : vector<2x32xf32>
    %c5_i32 = arith.constant 5 : i32
    %cst_224 = arith.constant dense<0.000000e+00> : vector<2x32xf32>
    %458 = tpu.matmul %423, %102, %cst_224 {dimension_numbers = #tpu.dot_dimension_numbers<[1], [0], [0], [1], [0, 0, 1, 1], [], []>} : vector<2x32xf32>, vector<32x32xf32>, vector<2x32xf32> -> vector<2x32xf32>
    %cst_225 = arith.constant dense<0.000000e+00> : vector<2x32xf32>
    %459 = tpu.matmul %423, %103, %cst_225 {dimension_numbers = #tpu.dot_dimension_numbers<[1], [0], [0], [1], [0, 0, 1, 1], [], []>} : vector<2x32xf32>, vector<32x32xf32>, vector<2x32xf32> -> vector<2x32xf32>
    %cst_226 = arith.constant dense<0.000000e+00> : vector<2x32xf32>
    %460 = tpu.matmul %423, %104, %cst_226 {dimension_numbers = #tpu.dot_dimension_numbers<[1], [0], [0], [1], [0, 0, 1, 1], [], []>} : vector<2x32xf32>, vector<32x32xf32>, vector<2x32xf32> -> vector<2x32xf32>
    %461 = arith.index_cast %c5_i32 : i32 to index
    %c0_227 = arith.constant 0 : index
    %c0_228 = arith.constant 0 : index
    %462 = vector.load %arg27[%461, %c0_227, %c0_228] : memref<8x2x32xf32, #tpu.memory_space<vmem>>, vector<1x2x32xf32>
    %463 = vector.shape_cast %462 : vector<1x2x32xf32> to vector<2x32xf32>
    %464 = arith.addf %463, %458 : vector<2x32xf32>
    %465 = arith.negf %464 : vector<2x32xf32>
    %466 = math.exp %465 : vector<2x32xf32>
    %cst_229 = arith.constant 1.000000e+00 : f32
    %467 = vector.broadcast %cst_229 : f32 to vector<2x32xf32>
    %468 = arith.addf %467, %466 : vector<2x32xf32>
    %469 = arith.divf %467, %468 : vector<2x32xf32>
    %470 = arith.index_cast %c5_i32 : i32 to index
    %c0_230 = arith.constant 0 : index
    %c0_231 = arith.constant 0 : index
    %471 = vector.load %arg28[%470, %c0_230, %c0_231] : memref<8x2x32xf32, #tpu.memory_space<vmem>>, vector<1x2x32xf32>
    %472 = vector.shape_cast %471 : vector<1x2x32xf32> to vector<2x32xf32>
    %473 = arith.addf %472, %459 : vector<2x32xf32>
    %474 = arith.negf %473 : vector<2x32xf32>
    %475 = math.exp %474 : vector<2x32xf32>
    %cst_232 = arith.constant 1.000000e+00 : f32
    %476 = vector.broadcast %cst_232 : f32 to vector<2x32xf32>
    %477 = arith.addf %476, %475 : vector<2x32xf32>
    %478 = arith.divf %476, %477 : vector<2x32xf32>
    %479 = arith.index_cast %c5_i32 : i32 to index
    %c0_233 = arith.constant 0 : index
    %c0_234 = arith.constant 0 : index
    %480 = vector.load %arg29[%479, %c0_233, %c0_234] : memref<8x2x32xf32, #tpu.memory_space<vmem>>, vector<1x2x32xf32>
    %481 = vector.shape_cast %480 : vector<1x2x32xf32> to vector<2x32xf32>
    %482 = vector.broadcast %105 : vector<1x32xf32> to vector<2x32xf32>
    %483 = arith.addf %460, %482 : vector<2x32xf32>
    %484 = arith.mulf %469, %483 : vector<2x32xf32>
    %485 = arith.addf %481, %484 : vector<2x32xf32>
    %486 = math.tanh %485 : vector<2x32xf32>
    %cst_235 = arith.constant 1.000000e+00 : f32
    %487 = vector.broadcast %cst_235 : f32 to vector<2x32xf32>
    %488 = arith.subf %487, %478 : vector<2x32xf32>
    %489 = arith.mulf %488, %486 : vector<2x32xf32>
    %490 = arith.mulf %478, %423 : vector<2x32xf32>
    %491 = arith.addf %489, %490 : vector<2x32xf32>
    %cst_236 = arith.constant dense<0.000000e+00> : vector<2x32xf32>
    %492 = tpu.matmul %491, %106, %cst_236 {dimension_numbers = #tpu.dot_dimension_numbers<[1], [0], [0], [1], [0, 0, 1, 1], [], []>} : vector<2x32xf32>, vector<32x32xf32>, vector<2x32xf32> -> vector<2x32xf32>
    %cst_237 = arith.constant dense<0.000000e+00> : vector<2x32xf32>
    %493 = tpu.matmul %457, %109, %cst_237 {dimension_numbers = #tpu.dot_dimension_numbers<[1], [0], [0], [1], [0, 0, 1, 1], [], []>} : vector<2x32xf32>, vector<32x32xf32>, vector<2x32xf32> -> vector<2x32xf32>
    %494 = arith.addf %492, %493 : vector<2x32xf32>
    %495 = vector.broadcast %112 : vector<1x32xf32> to vector<2x32xf32>
    %496 = arith.addf %494, %495 : vector<2x32xf32>
    %497 = arith.negf %496 : vector<2x32xf32>
    %498 = math.exp %497 : vector<2x32xf32>
    %cst_238 = arith.constant 1.000000e+00 : f32
    %499 = vector.broadcast %cst_238 : f32 to vector<2x32xf32>
    %500 = arith.addf %499, %498 : vector<2x32xf32>
    %501 = arith.divf %499, %500 : vector<2x32xf32>
    %cst_239 = arith.constant dense<0.000000e+00> : vector<2x32xf32>
    %502 = tpu.matmul %491, %107, %cst_239 {dimension_numbers = #tpu.dot_dimension_numbers<[1], [0], [0], [1], [0, 0, 1, 1], [], []>} : vector<2x32xf32>, vector<32x32xf32>, vector<2x32xf32> -> vector<2x32xf32>
    %cst_240 = arith.constant dense<0.000000e+00> : vector<2x32xf32>
    %503 = tpu.matmul %457, %110, %cst_240 {dimension_numbers = #tpu.dot_dimension_numbers<[1], [0], [0], [1], [0, 0, 1, 1], [], []>} : vector<2x32xf32>, vector<32x32xf32>, vector<2x32xf32> -> vector<2x32xf32>
    %504 = arith.addf %502, %503 : vector<2x32xf32>
    %505 = vector.broadcast %113 : vector<1x32xf32> to vector<2x32xf32>
    %506 = arith.addf %504, %505 : vector<2x32xf32>
    %507 = arith.negf %506 : vector<2x32xf32>
    %508 = math.exp %507 : vector<2x32xf32>
    %cst_241 = arith.constant 1.000000e+00 : f32
    %509 = vector.broadcast %cst_241 : f32 to vector<2x32xf32>
    %510 = arith.addf %509, %508 : vector<2x32xf32>
    %511 = arith.divf %509, %510 : vector<2x32xf32>
    %cst_242 = arith.constant dense<0.000000e+00> : vector<2x32xf32>
    %512 = tpu.matmul %491, %108, %cst_242 {dimension_numbers = #tpu.dot_dimension_numbers<[1], [0], [0], [1], [0, 0, 1, 1], [], []>} : vector<2x32xf32>, vector<32x32xf32>, vector<2x32xf32> -> vector<2x32xf32>
    %513 = vector.broadcast %114 : vector<1x32xf32> to vector<2x32xf32>
    %514 = arith.addf %512, %513 : vector<2x32xf32>
    %cst_243 = arith.constant dense<0.000000e+00> : vector<2x32xf32>
    %515 = tpu.matmul %457, %111, %cst_243 {dimension_numbers = #tpu.dot_dimension_numbers<[1], [0], [0], [1], [0, 0, 1, 1], [], []>} : vector<2x32xf32>, vector<32x32xf32>, vector<2x32xf32> -> vector<2x32xf32>
    %516 = vector.broadcast %115 : vector<1x32xf32> to vector<2x32xf32>
    %517 = arith.addf %515, %516 : vector<2x32xf32>
    %518 = arith.mulf %501, %517 : vector<2x32xf32>
    %519 = arith.addf %514, %518 : vector<2x32xf32>
    %520 = math.tanh %519 : vector<2x32xf32>
    %cst_244 = arith.constant 1.000000e+00 : f32
    %521 = vector.broadcast %cst_244 : f32 to vector<2x32xf32>
    %522 = arith.subf %521, %511 : vector<2x32xf32>
    %523 = arith.mulf %522, %520 : vector<2x32xf32>
    %524 = arith.mulf %511, %457 : vector<2x32xf32>
    %525 = arith.addf %523, %524 : vector<2x32xf32>
    %c6_i32 = arith.constant 6 : i32
    %cst_245 = arith.constant dense<0.000000e+00> : vector<2x32xf32>
    %526 = tpu.matmul %491, %102, %cst_245 {dimension_numbers = #tpu.dot_dimension_numbers<[1], [0], [0], [1], [0, 0, 1, 1], [], []>} : vector<2x32xf32>, vector<32x32xf32>, vector<2x32xf32> -> vector<2x32xf32>
    %cst_246 = arith.constant dense<0.000000e+00> : vector<2x32xf32>
    %527 = tpu.matmul %491, %103, %cst_246 {dimension_numbers = #tpu.dot_dimension_numbers<[1], [0], [0], [1], [0, 0, 1, 1], [], []>} : vector<2x32xf32>, vector<32x32xf32>, vector<2x32xf32> -> vector<2x32xf32>
    %cst_247 = arith.constant dense<0.000000e+00> : vector<2x32xf32>
    %528 = tpu.matmul %491, %104, %cst_247 {dimension_numbers = #tpu.dot_dimension_numbers<[1], [0], [0], [1], [0, 0, 1, 1], [], []>} : vector<2x32xf32>, vector<32x32xf32>, vector<2x32xf32> -> vector<2x32xf32>
    %529 = arith.index_cast %c6_i32 : i32 to index
    %c0_248 = arith.constant 0 : index
    %c0_249 = arith.constant 0 : index
    %530 = vector.load %arg27[%529, %c0_248, %c0_249] : memref<8x2x32xf32, #tpu.memory_space<vmem>>, vector<1x2x32xf32>
    %531 = vector.shape_cast %530 : vector<1x2x32xf32> to vector<2x32xf32>
    %532 = arith.addf %531, %526 : vector<2x32xf32>
    %533 = arith.negf %532 : vector<2x32xf32>
    %534 = math.exp %533 : vector<2x32xf32>
    %cst_250 = arith.constant 1.000000e+00 : f32
    %535 = vector.broadcast %cst_250 : f32 to vector<2x32xf32>
    %536 = arith.addf %535, %534 : vector<2x32xf32>
    %537 = arith.divf %535, %536 : vector<2x32xf32>
    %538 = arith.index_cast %c6_i32 : i32 to index
    %c0_251 = arith.constant 0 : index
    %c0_252 = arith.constant 0 : index
    %539 = vector.load %arg28[%538, %c0_251, %c0_252] : memref<8x2x32xf32, #tpu.memory_space<vmem>>, vector<1x2x32xf32>
    %540 = vector.shape_cast %539 : vector<1x2x32xf32> to vector<2x32xf32>
    %541 = arith.addf %540, %527 : vector<2x32xf32>
    %542 = arith.negf %541 : vector<2x32xf32>
    %543 = math.exp %542 : vector<2x32xf32>
    %cst_253 = arith.constant 1.000000e+00 : f32
    %544 = vector.broadcast %cst_253 : f32 to vector<2x32xf32>
    %545 = arith.addf %544, %543 : vector<2x32xf32>
    %546 = arith.divf %544, %545 : vector<2x32xf32>
    %547 = arith.index_cast %c6_i32 : i32 to index
    %c0_254 = arith.constant 0 : index
    %c0_255 = arith.constant 0 : index
    %548 = vector.load %arg29[%547, %c0_254, %c0_255] : memref<8x2x32xf32, #tpu.memory_space<vmem>>, vector<1x2x32xf32>
    %549 = vector.shape_cast %548 : vector<1x2x32xf32> to vector<2x32xf32>
    %550 = vector.broadcast %105 : vector<1x32xf32> to vector<2x32xf32>
    %551 = arith.addf %528, %550 : vector<2x32xf32>
    %552 = arith.mulf %537, %551 : vector<2x32xf32>
    %553 = arith.addf %549, %552 : vector<2x32xf32>
    %554 = math.tanh %553 : vector<2x32xf32>
    %cst_256 = arith.constant 1.000000e+00 : f32
    %555 = vector.broadcast %cst_256 : f32 to vector<2x32xf32>
    %556 = arith.subf %555, %546 : vector<2x32xf32>
    %557 = arith.mulf %556, %554 : vector<2x32xf32>
    %558 = arith.mulf %546, %491 : vector<2x32xf32>
    %559 = arith.addf %557, %558 : vector<2x32xf32>
    %cst_257 = arith.constant dense<0.000000e+00> : vector<2x32xf32>
    %560 = tpu.matmul %559, %106, %cst_257 {dimension_numbers = #tpu.dot_dimension_numbers<[1], [0], [0], [1], [0, 0, 1, 1], [], []>} : vector<2x32xf32>, vector<32x32xf32>, vector<2x32xf32> -> vector<2x32xf32>
    %cst_258 = arith.constant dense<0.000000e+00> : vector<2x32xf32>
    %561 = tpu.matmul %525, %109, %cst_258 {dimension_numbers = #tpu.dot_dimension_numbers<[1], [0], [0], [1], [0, 0, 1, 1], [], []>} : vector<2x32xf32>, vector<32x32xf32>, vector<2x32xf32> -> vector<2x32xf32>
    %562 = arith.addf %560, %561 : vector<2x32xf32>
    %563 = vector.broadcast %112 : vector<1x32xf32> to vector<2x32xf32>
    %564 = arith.addf %562, %563 : vector<2x32xf32>
    %565 = arith.negf %564 : vector<2x32xf32>
    %566 = math.exp %565 : vector<2x32xf32>
    %cst_259 = arith.constant 1.000000e+00 : f32
    %567 = vector.broadcast %cst_259 : f32 to vector<2x32xf32>
    %568 = arith.addf %567, %566 : vector<2x32xf32>
    %569 = arith.divf %567, %568 : vector<2x32xf32>
    %cst_260 = arith.constant dense<0.000000e+00> : vector<2x32xf32>
    %570 = tpu.matmul %559, %107, %cst_260 {dimension_numbers = #tpu.dot_dimension_numbers<[1], [0], [0], [1], [0, 0, 1, 1], [], []>} : vector<2x32xf32>, vector<32x32xf32>, vector<2x32xf32> -> vector<2x32xf32>
    %cst_261 = arith.constant dense<0.000000e+00> : vector<2x32xf32>
    %571 = tpu.matmul %525, %110, %cst_261 {dimension_numbers = #tpu.dot_dimension_numbers<[1], [0], [0], [1], [0, 0, 1, 1], [], []>} : vector<2x32xf32>, vector<32x32xf32>, vector<2x32xf32> -> vector<2x32xf32>
    %572 = arith.addf %570, %571 : vector<2x32xf32>
    %573 = vector.broadcast %113 : vector<1x32xf32> to vector<2x32xf32>
    %574 = arith.addf %572, %573 : vector<2x32xf32>
    %575 = arith.negf %574 : vector<2x32xf32>
    %576 = math.exp %575 : vector<2x32xf32>
    %cst_262 = arith.constant 1.000000e+00 : f32
    %577 = vector.broadcast %cst_262 : f32 to vector<2x32xf32>
    %578 = arith.addf %577, %576 : vector<2x32xf32>
    %579 = arith.divf %577, %578 : vector<2x32xf32>
    %cst_263 = arith.constant dense<0.000000e+00> : vector<2x32xf32>
    %580 = tpu.matmul %559, %108, %cst_263 {dimension_numbers = #tpu.dot_dimension_numbers<[1], [0], [0], [1], [0, 0, 1, 1], [], []>} : vector<2x32xf32>, vector<32x32xf32>, vector<2x32xf32> -> vector<2x32xf32>
    %581 = vector.broadcast %114 : vector<1x32xf32> to vector<2x32xf32>
    %582 = arith.addf %580, %581 : vector<2x32xf32>
    %cst_264 = arith.constant dense<0.000000e+00> : vector<2x32xf32>
    %583 = tpu.matmul %525, %111, %cst_264 {dimension_numbers = #tpu.dot_dimension_numbers<[1], [0], [0], [1], [0, 0, 1, 1], [], []>} : vector<2x32xf32>, vector<32x32xf32>, vector<2x32xf32> -> vector<2x32xf32>
    %584 = vector.broadcast %115 : vector<1x32xf32> to vector<2x32xf32>
    %585 = arith.addf %583, %584 : vector<2x32xf32>
    %586 = arith.mulf %569, %585 : vector<2x32xf32>
    %587 = arith.addf %582, %586 : vector<2x32xf32>
    %588 = math.tanh %587 : vector<2x32xf32>
    %cst_265 = arith.constant 1.000000e+00 : f32
    %589 = vector.broadcast %cst_265 : f32 to vector<2x32xf32>
    %590 = arith.subf %589, %579 : vector<2x32xf32>
    %591 = arith.mulf %590, %588 : vector<2x32xf32>
    %592 = arith.mulf %579, %525 : vector<2x32xf32>
    %593 = arith.addf %591, %592 : vector<2x32xf32>
    %c7_i32 = arith.constant 7 : i32
    %cst_266 = arith.constant dense<0.000000e+00> : vector<2x32xf32>
    %594 = tpu.matmul %559, %102, %cst_266 {dimension_numbers = #tpu.dot_dimension_numbers<[1], [0], [0], [1], [0, 0, 1, 1], [], []>} : vector<2x32xf32>, vector<32x32xf32>, vector<2x32xf32> -> vector<2x32xf32>
    %cst_267 = arith.constant dense<0.000000e+00> : vector<2x32xf32>
    %595 = tpu.matmul %559, %103, %cst_267 {dimension_numbers = #tpu.dot_dimension_numbers<[1], [0], [0], [1], [0, 0, 1, 1], [], []>} : vector<2x32xf32>, vector<32x32xf32>, vector<2x32xf32> -> vector<2x32xf32>
    %cst_268 = arith.constant dense<0.000000e+00> : vector<2x32xf32>
    %596 = tpu.matmul %559, %104, %cst_268 {dimension_numbers = #tpu.dot_dimension_numbers<[1], [0], [0], [1], [0, 0, 1, 1], [], []>} : vector<2x32xf32>, vector<32x32xf32>, vector<2x32xf32> -> vector<2x32xf32>
    %597 = arith.index_cast %c7_i32 : i32 to index
    %c0_269 = arith.constant 0 : index
    %c0_270 = arith.constant 0 : index
    %598 = vector.load %arg27[%597, %c0_269, %c0_270] : memref<8x2x32xf32, #tpu.memory_space<vmem>>, vector<1x2x32xf32>
    %599 = vector.shape_cast %598 : vector<1x2x32xf32> to vector<2x32xf32>
    %600 = arith.addf %599, %594 : vector<2x32xf32>
    %601 = arith.negf %600 : vector<2x32xf32>
    %602 = math.exp %601 : vector<2x32xf32>
    %cst_271 = arith.constant 1.000000e+00 : f32
    %603 = vector.broadcast %cst_271 : f32 to vector<2x32xf32>
    %604 = arith.addf %603, %602 : vector<2x32xf32>
    %605 = arith.divf %603, %604 : vector<2x32xf32>
    %606 = arith.index_cast %c7_i32 : i32 to index
    %c0_272 = arith.constant 0 : index
    %c0_273 = arith.constant 0 : index
    %607 = vector.load %arg28[%606, %c0_272, %c0_273] : memref<8x2x32xf32, #tpu.memory_space<vmem>>, vector<1x2x32xf32>
    %608 = vector.shape_cast %607 : vector<1x2x32xf32> to vector<2x32xf32>
    %609 = arith.addf %608, %595 : vector<2x32xf32>
    %610 = arith.negf %609 : vector<2x32xf32>
    %611 = math.exp %610 : vector<2x32xf32>
    %cst_274 = arith.constant 1.000000e+00 : f32
    %612 = vector.broadcast %cst_274 : f32 to vector<2x32xf32>
    %613 = arith.addf %612, %611 : vector<2x32xf32>
    %614 = arith.divf %612, %613 : vector<2x32xf32>
    %615 = arith.index_cast %c7_i32 : i32 to index
    %c0_275 = arith.constant 0 : index
    %c0_276 = arith.constant 0 : index
    %616 = vector.load %arg29[%615, %c0_275, %c0_276] : memref<8x2x32xf32, #tpu.memory_space<vmem>>, vector<1x2x32xf32>
    %617 = vector.shape_cast %616 : vector<1x2x32xf32> to vector<2x32xf32>
    %618 = vector.broadcast %105 : vector<1x32xf32> to vector<2x32xf32>
    %619 = arith.addf %596, %618 : vector<2x32xf32>
    %620 = arith.mulf %605, %619 : vector<2x32xf32>
    %621 = arith.addf %617, %620 : vector<2x32xf32>
    %622 = math.tanh %621 : vector<2x32xf32>
    %cst_277 = arith.constant 1.000000e+00 : f32
    %623 = vector.broadcast %cst_277 : f32 to vector<2x32xf32>
    %624 = arith.subf %623, %614 : vector<2x32xf32>
    %625 = arith.mulf %624, %622 : vector<2x32xf32>
    %626 = arith.mulf %614, %559 : vector<2x32xf32>
    %627 = arith.addf %625, %626 : vector<2x32xf32>
    %cst_278 = arith.constant dense<0.000000e+00> : vector<2x32xf32>
    %628 = tpu.matmul %627, %106, %cst_278 {dimension_numbers = #tpu.dot_dimension_numbers<[1], [0], [0], [1], [0, 0, 1, 1], [], []>} : vector<2x32xf32>, vector<32x32xf32>, vector<2x32xf32> -> vector<2x32xf32>
    %cst_279 = arith.constant dense<0.000000e+00> : vector<2x32xf32>
    %629 = tpu.matmul %593, %109, %cst_279 {dimension_numbers = #tpu.dot_dimension_numbers<[1], [0], [0], [1], [0, 0, 1, 1], [], []>} : vector<2x32xf32>, vector<32x32xf32>, vector<2x32xf32> -> vector<2x32xf32>
    %630 = arith.addf %628, %629 : vector<2x32xf32>
    %631 = vector.broadcast %112 : vector<1x32xf32> to vector<2x32xf32>
    %632 = arith.addf %630, %631 : vector<2x32xf32>
    %633 = arith.negf %632 : vector<2x32xf32>
    %634 = math.exp %633 : vector<2x32xf32>
    %cst_280 = arith.constant 1.000000e+00 : f32
    %635 = vector.broadcast %cst_280 : f32 to vector<2x32xf32>
    %636 = arith.addf %635, %634 : vector<2x32xf32>
    %637 = arith.divf %635, %636 : vector<2x32xf32>
    %cst_281 = arith.constant dense<0.000000e+00> : vector<2x32xf32>
    %638 = tpu.matmul %627, %107, %cst_281 {dimension_numbers = #tpu.dot_dimension_numbers<[1], [0], [0], [1], [0, 0, 1, 1], [], []>} : vector<2x32xf32>, vector<32x32xf32>, vector<2x32xf32> -> vector<2x32xf32>
    %cst_282 = arith.constant dense<0.000000e+00> : vector<2x32xf32>
    %639 = tpu.matmul %593, %110, %cst_282 {dimension_numbers = #tpu.dot_dimension_numbers<[1], [0], [0], [1], [0, 0, 1, 1], [], []>} : vector<2x32xf32>, vector<32x32xf32>, vector<2x32xf32> -> vector<2x32xf32>
    %640 = arith.addf %638, %639 : vector<2x32xf32>
    %641 = vector.broadcast %113 : vector<1x32xf32> to vector<2x32xf32>
    %642 = arith.addf %640, %641 : vector<2x32xf32>
    %643 = arith.negf %642 : vector<2x32xf32>
    %644 = math.exp %643 : vector<2x32xf32>
    %cst_283 = arith.constant 1.000000e+00 : f32
    %645 = vector.broadcast %cst_283 : f32 to vector<2x32xf32>
    %646 = arith.addf %645, %644 : vector<2x32xf32>
    %647 = arith.divf %645, %646 : vector<2x32xf32>
    %cst_284 = arith.constant dense<0.000000e+00> : vector<2x32xf32>
    %648 = tpu.matmul %627, %108, %cst_284 {dimension_numbers = #tpu.dot_dimension_numbers<[1], [0], [0], [1], [0, 0, 1, 1], [], []>} : vector<2x32xf32>, vector<32x32xf32>, vector<2x32xf32> -> vector<2x32xf32>
    %649 = vector.broadcast %114 : vector<1x32xf32> to vector<2x32xf32>
    %650 = arith.addf %648, %649 : vector<2x32xf32>
    %cst_285 = arith.constant dense<0.000000e+00> : vector<2x32xf32>
    %651 = tpu.matmul %593, %111, %cst_285 {dimension_numbers = #tpu.dot_dimension_numbers<[1], [0], [0], [1], [0, 0, 1, 1], [], []>} : vector<2x32xf32>, vector<32x32xf32>, vector<2x32xf32> -> vector<2x32xf32>
    %652 = vector.broadcast %115 : vector<1x32xf32> to vector<2x32xf32>
    %653 = arith.addf %651, %652 : vector<2x32xf32>
    %654 = arith.mulf %637, %653 : vector<2x32xf32>
    %655 = arith.addf %650, %654 : vector<2x32xf32>
    %656 = math.tanh %655 : vector<2x32xf32>
    %cst_286 = arith.constant 1.000000e+00 : f32
    %657 = vector.broadcast %cst_286 : f32 to vector<2x32xf32>
    %658 = arith.subf %657, %647 : vector<2x32xf32>
    %659 = arith.mulf %658, %656 : vector<2x32xf32>
    %660 = arith.mulf %647, %593 : vector<2x32xf32>
    %661 = arith.addf %659, %660 : vector<2x32xf32>
    %c8_i32 = arith.constant 8 : i32
    %c0_287 = arith.constant 0 : index
    %c0_288 = arith.constant 0 : index
    %662 = vector.load %arg23[%c0_287, %c0_288] : memref<1x2048xf32, #tpu.memory_space<vmem>>, vector<1x2048xf32>
    %c0_289 = arith.constant 0 : index
    %c0_290 = arith.constant 0 : index
    %663 = vector.load %arg22[%c0_289, %c0_290] : memref<64x2048xf32, #tpu.memory_space<vmem>>, vector<32x2048xf32>
    %cst_291 = arith.constant dense<0.000000e+00> : vector<2x2048xf32>
    %664 = tpu.matmul %627, %663, %cst_291 {dimension_numbers = #tpu.dot_dimension_numbers<[1], [0], [0], [1], [0, 0, 1, 1], [], []>} : vector<2x32xf32>, vector<32x2048xf32>, vector<2x2048xf32> -> vector<2x2048xf32>
    %665 = vector.broadcast %662 : vector<1x2048xf32> to vector<2x2048xf32>
    %666 = arith.addf %665, %664 : vector<2x2048xf32>
    %c32 = arith.constant 32 : index
    %c0_292 = arith.constant 0 : index
    %667 = vector.load %arg22[%c32, %c0_292] : memref<64x2048xf32, #tpu.memory_space<vmem>>, vector<32x2048xf32>
    %cst_293 = arith.constant dense<0.000000e+00> : vector<2x2048xf32>
    %668 = tpu.matmul %661, %667, %cst_293 {dimension_numbers = #tpu.dot_dimension_numbers<[1], [0], [0], [1], [0, 0, 1, 1], [], []>} : vector<2x32xf32>, vector<32x2048xf32>, vector<2x2048xf32> -> vector<2x2048xf32>
    %669 = arith.addf %666, %668 : vector<2x2048xf32>
    %670 = vector.extract_strided_slice %669 {offsets = [0, 0], sizes = [2, 1024], strides = [1, 1]} : vector<2x2048xf32> to vector<2x1024xf32>
    %c0_294 = arith.constant 0 : index
    %c0_295 = arith.constant 0 : index
    %671 = vector.load %arg24[%c0_294, %c0_295] : memref<2x1024xf32, #tpu.memory_space<vmem>>, vector<2x1024xf32>
    tpu.vector_store %arg24[%c0_294, %c0_295], %670 {strides = array<i32>} : memref<2x1024xf32, #tpu.memory_space<vmem>>, vector<2x1024xf32>,
    %672 = vector.extract_strided_slice %669 {offsets = [0, 1024], sizes = [2, 1024], strides = [1, 1]} : vector<2x2048xf32> to vector<2x1024xf32>
    %c0_296 = arith.constant 0 : index
    %c0_297 = arith.constant 0 : index
    %673 = vector.load %arg25[%c0_296, %c0_297] : memref<2x1024xf32, #tpu.memory_space<vmem>>, vector<2x1024xf32>
    tpu.vector_store %arg25[%c0_296, %c0_297], %672 {strides = array<i32>} : memref<2x1024xf32, #tpu.memory_space<vmem>>, vector<2x1024xf32>,
    return
  }
}

</mosaic_0001>

<bundles_post_ra>
// kernel: tpu_custom_call.1
= control target key start
LH: loop header
LB: loop body
LE: loop exit
PB: predicated region body
PF: predicated region fallthrough
CT: control target
= control target key end

     0   :  { %s11762_s0 = inlined_call_operand.hbm [shape: s32[16], index: 0, kind: input, shape index: {}]   ;;  %s11763_s1 = inlined_call_operand.vmem [shape: f32[20,1,16], index: 1, kind: input, shape index: {}]   ;;  %s11764_s2 = inlined_call_operand.hbm [shape: f32[16,32], index: 2, kind: input, shape index: {}]   ;;  %s11765_s3 = inlined_call_operand.hbm [shape: f32[16,32], index: 3, kind: input, shape index: {}]   ;;  %s11766_s4 = inlined_call_operand.hbm [shape: f32[16,32], index: 4, kind: input, shape index: {}]   ;;  %s11767_s5 = inlined_call_operand.vmem [shape: f32[32,32], index: 5, kind: input, shape index: {}]   ;;  %s11768_s6 = inlined_call_operand.hbm [shape: f32[32,32], index: 6, kind: input, shape index: {}]   ;;  %s11769_s7 = inlined_call_operand.hbm [shape: f32[32,32], index: 7, kind: input, shape index: {}]   ;;  %s11770_s8 = inlined_call_operand.hbm [shape: f32[1,32], index: 8, kind: input, shape index: {}]   ;;  %s11771_s9 = inlined_call_operand.hbm [shape: f32[1,32], index: 9, kind: input, shape index: {}]   ;;  %s11772_s10 = inlined_call_operand.hbm [shape: f32[1,32], index: 10, kind: input, shape index: {}]   ;;  %s11773_s11 = inlined_call_operand.hbm [shape: f32[1,32], index: 11, kind: input, shape index: {}]   ;;  %s11774_s12 = inlined_call_operand.vmem [shape: f32[32,32], index: 12, kind: input, shape index: {}]   ;;  %s11775_s13 = inlined_call_operand.hbm [shape: f32[32,32], index: 13, kind: input, shape index: {}]   ;;  %s11776_s14 = inlined_call_operand.hbm [shape: f32[32,32], index: 14, kind: input, shape index: {}]   ;;  %s11777_s15 = inlined_call_operand.hbm [shape: f32[32,32], index: 15, kind: input, shape index: {}]   ;;  %s11778_s16 = inlined_call_operand.vmem [shape: f32[32,32], index: 16, kind: input, shape index: {}]   ;;  %s11779_s17 = inlined_call_operand.hbm [shape: f32[32,32], index: 17, kind: input, shape index: {}]   ;;  %s11780_s18 = inlined_call_operand.vmem [shape: f32[1,32], index: 18, kind: input, shape index: {}]   ;;  %s11781_s19 = inlined_call_operand.vmem [shape: f32[1,32], index: 19, kind: input, shape index: {}]   ;;  %s11782_s20 = inlined_call_operand.vmem [shape: f32[1,32], index: 20, kind: input, shape index: {}]   ;;  %s11783_s21 = inlined_call_operand.hbm [shape: f32[1,32], index: 21, kind: input, shape index: {}]   ;;  %s11784_s22 = inlined_call_operand.hbm [shape: f32[64,2048], index: 22, kind: input, shape index: {}]   ;;  %s11785_s23 = inlined_call_operand.vmem [shape: f32[1,2048], index: 23, kind: input, shape index: {}]   ;;  %s11786_s24 = inlined_call_operand.hbm [shape: f32[2,1024], index: 24, kind: output, shape index: {0}]   ;;  %s11787_s25 = inlined_call_operand.hbm [shape: f32[2,1024], index: 25, kind: output, shape index: {1}]  }
   0x1   :  { %11801 = sst [smem:[#allocation46_spill]] %s11762_s0 }
   0x2   :  { %11802 = sst [smem:[#allocation47_spill]] %s11763_s1 }
   0x3   :  { %11803 = sst [smem:[#allocation48_spill]] %s11764_s2 }
   0x4   :  { %11804 = sst [smem:[#allocation49_spill]] %s11765_s3 }
   0x5   :  { %11805 = sst [smem:[#allocation50_spill]] %s11766_s4 }
   0x6   :  { %11806 = sst [smem:[#allocation51_spill]] %s11767_s5 }
   0x7   :  { %11807 = sst [smem:[#allocation52_spill]] %s11768_s6 }
   0x8   :  { %11808 = sst [smem:[#allocation53_spill]] %s11769_s7 }
   0x9   :  { %11809 = sst [smem:[#allocation54_spill]] %s11770_s8 }
   0xa   :  { %11810 = sst [smem:[#allocation55_spill]] %s11771_s9 }
   0xb   :  { %11811 = sst [smem:[#allocation56_spill]] %s11785_s23 }
   0xc   :  { %11812 = sst [smem:[#allocation57_spill]] %s11786_s24 }
   0xd   :  { %11813 = sst [smem:[#allocation58_spill]] %s11787_s25 }
   0xe   :  { %31 = vsyncpa [#allocation9], 0 }
   0xf   :  { %32 = vsyncpa [#allocation7], 0 }
  0x10   :  { %33 = vsyncpa [#allocation12], 0 }
  0x11   :  { %34 = vsyncpa [#allocation15], 0 }
  0x12   :  { %35 = vsyncpa [#allocation18], 0 }
  0x13   :  { %36 = vsyncpa [#allocation21], 0 }
  0x14   :  { %37 = vsyncpa [#allocation24], 0 }
  0x15   :  { %38 = vsyncpa [#allocation27], 0 }
  0x16   :  { %39 = vsyncpa [#allocation30], 0 }
  0x17   :  { %40 = vsyncpa [#allocation8], 0 }
  0x18   :  { %41 = vsyncpa [#allocation34], 0  ;;  %s10365_s29 = smov [#allocation11]   ;;  %s10366_s6 = smov [#allocation14]  }
  0x19   :  { %s69_s2 = sshll.u32 %s10365_s29, 4  ;;  %s95_s30 = sshll.u32 %s10366_s6, 4  ;;  %s70_s2 = int_to_ptr.vmem [resolvable:$true] %s69_s2  ;;  %s10520_s30 = int_to_ptr.vmem [resolvable:$true] %s95_s30 }
  0x1a   :  { %s11814_s26 = sld [smem:[#allocation49_spill]] }
  0x20   :  { %s9959_s1 = scalar_lea.hbm %s11814_s26, 256 }
  0x21   :  { %p9960_p0 = scmp.ne.s32.totalorder %s11814_s26, %s9959_s1  ;;  %p9963_p1 = scmp.lt.u32.totalorder %s9959_s1, %s11814_s26 }
  0x23   :  { %p9965_p2 = pnand %p9963_p1, %p9960_p0 }
  0x25   :  { %9968 = shalt.err (!%p9965_p2)
}
  0x26   :  { %s9969_s9 = scalar_lea.vmem %s70_s2, 256  ;;  %p9974_p4 = scmp.lt.s32.totalorder %s70_s2, %s70_s2 }
  0x27   :  { %p9970_p3 = scmp.ne.s32.totalorder %s70_s2, %s9969_s9  ;;  %p9975_p5 = scmp.lt.s32.totalorder %s9969_s9, %s9969_s9 }
  0x29   :  { %p9976_p6 = por %p9975_p5, %p9974_p4 }
  0x2b   :  { %p9977_p7 = pnand %p9976_p6, %p9970_p3 }
  0x2d   :  { %9980 = shalt.err (!%p9977_p7)
}
  0x2e   :  { %s10367_s5 = smov 128   ;;  %s10368_s0 = smov 8  }
  0x2f   :  { %75 = dma.hbm_to_vmem [thread:$0]  %s11814_s26, 256, %s70_s2, [#allocation12], %s10367_s5, %s10367_s5, %s10368_s0  }
  0x30   :  { %s11815_s1 = sld [smem:[#allocation52_spill]] }
  0x36   :  { %s9981_s8 = scalar_lea.hbm %s11815_s1, 512 }
  0x37   :  { %p9982_p8 = scmp.ne.s32.totalorder %s11815_s1, %s9981_s8  ;;  %p9985_p9 = scmp.lt.u32.totalorder %s9981_s8, %s11815_s1 }
  0x39   :  { %p9987_p10 = pnand %p9985_p9, %p9982_p8 }
  0x3b   :  { %9990 = shalt.err (!%p9987_p10)
}
  0x3c   :  { %s9991_s25 = scalar_lea.vmem %s10520_s30, 512  ;;  %p9996_p12 = scmp.lt.s32.totalorder %s10520_s30, %s10520_s30 }
  0x3d   :  { %p9992_p11 = scmp.ne.s32.totalorder %s10520_s30, %s9991_s25  ;;  %p9997_p13 = scmp.lt.s32.totalorder %s9991_s25, %s9991_s25 }
  0x3f   :  { %p9998_p0 = por %p9997_p13, %p9996_p12 }
  0x41   :  { %p9999_p1 = pnand %p9998_p0, %p9992_p11 }
  0x43   :  { %10002 = shalt.err (!%p9999_p1)
}
  0x44   :  { %101 = dma.hbm_to_vmem [thread:$0]  %s11815_s1, 512, %s10520_s30, [#allocation15], %s10367_s5, %s10367_s5, %s10368_s0  }
  0x45   :  { %s10369_s29 = smov [#allocation17]   ;;  %s10370_s7 = smov [#allocation20]  }
  0x46   :  { %s120_s6 = sshll.u32 %s10369_s29, 4  ;;  %s140_s3 = sshll.u32 %s10370_s7, 4  ;;  %s121_s6 = int_to_ptr.vmem [resolvable:$true] %s120_s6  ;;  %s141_s3 = int_to_ptr.vmem [resolvable:$true] %s140_s3 }
  0x47   :  { %s11816_s25 = sld [smem:[#allocation54_spill]] }
  0x4d   :  { %s10003_s4 = scalar_lea.hbm %s11816_s25, 16 }
  0x4e   :  { %p10004_p2 = scmp.ne.s32.totalorder %s11816_s25, %s10003_s4  ;;  %p10007_p3 = scmp.lt.u32.totalorder %s10003_s4, %s11816_s25 }
  0x50   :  { %p10009_p4 = pnand %p10007_p3, %p10004_p2 }
  0x52   :  { %10012 = shalt.err (!%p10009_p4)
}
  0x53   :  { %s10013_s30 = scalar_lea.vmem %s121_s6, 16  ;;  %s10017_s1 = scalar_lea.vmem %s121_s6, 32 }
  0x54   :  { %p10014_p5 = scmp.ne.s32.totalorder %s121_s6, %s10013_s30  ;;  %p10018_p6 = scmp.lt.s32.totalorder %s121_s6, %s121_s6 }
  0x55   :  { %p10019_p7 = scmp.lt.s32.totalorder %s10017_s1, %s10013_s30 }
  0x57   :  { %p10020_p8 = por %p10019_p7, %p10018_p6 }
  0x59   :  { %p10021_p9 = pnand %p10020_p8, %p10014_p5 }
  0x5b   :  { %10024 = shalt.err (!%p10021_p9)
}
  0x5c   :  { %123 = dma.hbm_to_vmem [thread:$0]  %s11816_s25, 16, %s121_s6, [#allocation18]  }
  0x5d   :  { %s10025_s8 = scalar_lea.hbm %s11772_s10, 16 }
  0x5e   :  { %p10026_p10 = scmp.ne.s32.totalorder %s11772_s10, %s10025_s8  ;;  %p10029_p11 = scmp.lt.u32.totalorder %s10025_s8, %s11772_s10 }
  0x60   :  { %p10031_p12 = pnand %p10029_p11, %p10026_p10 }
  0x62   :  { %10034 = shalt.err (!%p10031_p12)
}
  0x63   :  { %s10035_s28 = scalar_lea.vmem %s141_s3, 16  ;;  %s10039_s9 = scalar_lea.vmem %s141_s3, 32 }
  0x64   :  { %p10036_p13 = scmp.ne.s32.totalorder %s141_s3, %s10035_s28  ;;  %p10040_p0 = scmp.lt.s32.totalorder %s141_s3, %s141_s3 }
  0x65   :  { %p10041_p1 = scmp.lt.s32.totalorder %s10039_s9, %s10035_s28 }
  0x67   :  { %p10042_p2 = por %p10041_p1, %p10040_p0 }
  0x69   :  { %p10043_p3 = pnand %p10042_p2, %p10036_p13 }
  0x6b   :  { %10046 = shalt.err (!%p10043_p3)
}
  0x6c   :  { %143 = dma.hbm_to_vmem [thread:$0]  %s11772_s10, 16, %s141_s3, [#allocation21]  }
  0x6d   :  { %s10371_s30 = smov [#allocation23]   ;;  %s10372_s2 = smov [#allocation26]  }
  0x6e   :  { %s161_s1 = sshll.u32 %s10371_s30, 4  ;;  %s185_s26 = sshll.u32 %s10372_s2, 4  ;;  %s162_s1 = int_to_ptr.vmem [resolvable:$true] %s161_s1  ;;  %s10581_s26 = int_to_ptr.vmem [resolvable:$true] %s185_s26 }
  0x6f   :  { %s10047_s8 = scalar_lea.hbm %s11775_s13, 512 }
  0x70   :  { %p10048_p4 = scmp.ne.s32.totalorder %s11775_s13, %s10047_s8  ;;  %p10051_p5 = scmp.lt.u32.totalorder %s10047_s8, %s11775_s13 }
  0x72   :  { %p10053_p6 = pnand %p10051_p5, %p10048_p4 }
  0x74   :  { %10056 = shalt.err (!%p10053_p6)
}
  0x75   :  { %s10057_s10 = scalar_lea.vmem %s162_s1, 512  ;;  %p10062_p8 = scmp.lt.s32.totalorder %s162_s1, %s162_s1 }
  0x76   :  { %p10058_p7 = scmp.ne.s32.totalorder %s162_s1, %s10057_s10  ;;  %p10063_p9 = scmp.lt.s32.totalorder %s10057_s10, %s10057_s10 }
  0x78   :  { %p10064_p10 = por %p10063_p9, %p10062_p8 }
  0x7a   :  { %p10065_p11 = pnand %p10064_p10, %p10058_p7 }
  0x7c   :  { %10068 = shalt.err (!%p10065_p11)
}
  0x7d   :  { %167 = dma.hbm_to_vmem [thread:$0]  %s11775_s13, 512, %s162_s1, [#allocation24], %s10367_s5, %s10367_s5, %s10368_s0  }
  0x7e   :  { %s10069_s25 = scalar_lea.hbm %s11777_s15, 512 }
  0x7f   :  { %p10070_p12 = scmp.ne.s32.totalorder %s11777_s15, %s10069_s25  ;;  %p10073_p13 = scmp.lt.u32.totalorder %s10069_s25, %s11777_s15 }
  0x81   :  { %p10075_p0 = pnand %p10073_p13, %p10070_p12 }
  0x83   :  { %10078 = shalt.err (!%p10075_p0)
}
  0x84   :  { %s10079_s8 = scalar_lea.vmem %s10581_s26, 512  ;;  %p10084_p2 = scmp.lt.s32.totalorder %s10581_s26, %s10581_s26 }
  0x85   :  { %p10080_p1 = scmp.ne.s32.totalorder %s10581_s26, %s10079_s8  ;;  %p10085_p3 = scmp.lt.s32.totalorder %s10079_s8, %s10079_s8 }
  0x87   :  { %p10086_p4 = por %p10085_p3, %p10084_p2 }
  0x89   :  { %p10087_p5 = pnand %p10086_p4, %p10080_p1 }
  0x8b   :  { %10090 = shalt.err (!%p10087_p5)
}
  0x8c   :  { %191 = dma.hbm_to_vmem [thread:$0]  %s11777_s15, 512, %s10581_s26, [#allocation27], %s10367_s5, %s10367_s5, %s10368_s0  }
  0x8d   :  { %s10373_s23 = smov [#allocation29]   ;;  %s10374_s27 = smov [#allocation10]  }
  0x8e   :  { %s218_s24 = sshll.u32 %s10373_s23, 4  ;;  %s57_s4 = sshll.u32 %s10374_s27, 4  ;;  %s219_s24 = int_to_ptr.vmem [resolvable:$true] %s218_s24  ;;  %s58_s4 = int_to_ptr.vmem [resolvable:$true] %s57_s4 }
  0x8f   :  { %s10091_s28 = scalar_lea.hbm %s11783_s21, 16 }
  0x90   :  { %p10092_p6 = scmp.ne.s32.totalorder %s11783_s21, %s10091_s28  ;;  %p10095_p7 = scmp.lt.u32.totalorder %s10091_s28, %s11783_s21 }
  0x92   :  { %p10097_p8 = pnand %p10095_p7, %p10092_p6 }
  0x94   :  { %10100 = shalt.err (!%p10097_p8)
}
  0x95   :  { %s10101_s15 = scalar_lea.vmem %s219_s24, 16  ;;  %s10105_s26 = scalar_lea.vmem %s219_s24, 32 }
  0x96   :  { %p10102_p9 = scmp.ne.s32.totalorder %s219_s24, %s10101_s15  ;;  %p10106_p10 = scmp.lt.s32.totalorder %s219_s24, %s219_s24 }
  0x97   :  { %p10107_p11 = scmp.lt.s32.totalorder %s10105_s26, %s10101_s15 }
  0x99   :  { %p10108_p12 = por %p10107_p11, %p10106_p10 }
  0x9b   :  { %p10109_p13 = pnand %p10108_p12, %p10102_p9 }
  0x9d   :  { %10112 = shalt.err (!%p10109_p13)
}
  0x9e   :  { %221 = dma.hbm_to_vmem [thread:$0]  %s11783_s21, 16, %s219_s24, [#allocation30]  }
  0x9f   :  { %s11817_s13 = sld [smem:[#allocation46_spill]] }
  0xa5   :  { %s10113_s1 = scalar_lea.hbm %s11817_s13, 16 }
  0xa6   :  { %p10114_p0 = scmp.ne.s32.totalorder %s11817_s13, %s10113_s1  ;;  %p10117_p1 = scmp.lt.u32.totalorder %s10113_s1, %s11817_s13 }
  0xa8   :  { %p10119_p2 = pnand %p10117_p1, %p10114_p0 }
  0xaa   :  { %10122 = shalt.err (!%p10119_p2)
}
  0xab   :  { %s10375_s28 = smov [#allocation6]   ;;  %s11818_s25 = sld [smem:[#allocation48_spill]] }
  0xac   :  { %49 = dma.hbm_to_smem %s11817_s13, 16, %s10375_s28, [#allocation9]  }
  0xb1   :  { %s10123_s30 = scalar_lea.hbm %s11818_s25, 256 }
  0xb2   :  { %p10124_p3 = scmp.ne.s32.totalorder %s11818_s25, %s10123_s30  ;;  %p10127_p4 = scmp.lt.u32.totalorder %s10123_s30, %s11818_s25 }
  0xb4   :  { %p10129_p5 = pnand %p10127_p4, %p10124_p3 }
  0xb6   :  { %10132 = shalt.err (!%p10129_p5)
}
  0xb7   :  { %s10133_s7 = scalar_lea.vmem %s58_s4, 256  ;;  %p10138_p7 = scmp.lt.s32.totalorder %s58_s4, %s58_s4 }
  0xb8   :  { %p10134_p6 = scmp.ne.s32.totalorder %s58_s4, %s10133_s7  ;;  %p10139_p8 = scmp.lt.s32.totalorder %s10133_s7, %s10133_s7 }
  0xba   :  { %p10140_p9 = por %p10139_p8, %p10138_p7 }
  0xbc   :  { %p10141_p10 = pnand %p10140_p9, %p10134_p6 }
  0xbe   :  { %10144 = shalt.err (!%p10141_p10)
}
  0xbf   :  { %63 = dma.hbm_to_vmem [thread:$0]  %s11818_s25, 256, %s58_s4, [#allocation7], %s10367_s5, %s10367_s5, %s10368_s0  }
  0xc0   :  { %s10376_s1 = smov [#allocation13]   ;;  %s10377_s27 = smov [#allocation16]  }
  0xc1   :  { %s81_s23 = sshll.u32 %s10376_s1, 4  ;;  %s107_s10 = sshll.u32 %s10377_s27, 4  ;;  %s82_s23 = int_to_ptr.vmem [resolvable:$true] %s81_s23  ;;  %s108_s10 = int_to_ptr.vmem [resolvable:$true] %s107_s10 }
  0xc2   :  { %s11819_s9 = sld [smem:[#allocation50_spill]] }
  0xc8   :  { %s10145_s6 = scalar_lea.hbm %s11819_s9, 256 }
  0xc9   :  { %p10146_p11 = scmp.ne.s32.totalorder %s11819_s9, %s10145_s6  ;;  %p10149_p12 = scmp.lt.u32.totalorder %s10145_s6, %s11819_s9 }
  0xcb   :  { %p10151_p13 = pnand %p10149_p12, %p10146_p11 }
  0xcd   :  { %10154 = shalt.err (!%p10151_p13)
}
  0xce   :  { %s10155_s4 = scalar_lea.vmem %s82_s23, 256  ;;  %p10160_p1 = scmp.lt.s32.totalorder %s82_s23, %s82_s23 }
  0xcf   :  { %p10156_p0 = scmp.ne.s32.totalorder %s82_s23, %s10155_s4  ;;  %p10161_p2 = scmp.lt.s32.totalorder %s10155_s4, %s10155_s4 }
  0xd1   :  { %p10162_p3 = por %p10161_p2, %p10160_p1 }
  0xd3   :  { %p10163_p4 = pnand %p10162_p3, %p10156_p0 }
  0xd5   :  { %10166 = shalt.err (!%p10163_p4)
}
  0xd6   :  { %87 = dma.hbm_to_vmem [thread:$0]  %s11819_s9, 256, %s82_s23, [#allocation12], %s10367_s5, %s10367_s5, %s10368_s0  }
  0xd7   :  { %s11820_s7 = sld [smem:[#allocation53_spill]] }
  0xdd   :  { %s10167_s8 = scalar_lea.hbm %s11820_s7, 512 }
  0xde   :  { %p10168_p5 = scmp.ne.s32.totalorder %s11820_s7, %s10167_s8  ;;  %p10171_p6 = scmp.lt.u32.totalorder %s10167_s8, %s11820_s7 }
  0xe0   :  { %p10173_p7 = pnand %p10171_p6, %p10168_p5 }
  0xe2   :  { %10176 = shalt.err (!%p10173_p7)
}
  0xe3   :  { %s10177_s28 = scalar_lea.vmem %s108_s10, 512  ;;  %p10182_p9 = scmp.lt.s32.totalorder %s108_s10, %s108_s10 }
  0xe4   :  { %p10178_p8 = scmp.ne.s32.totalorder %s108_s10, %s10177_s28  ;;  %p10183_p10 = scmp.lt.s32.totalorder %s10177_s28, %s10177_s28 }
  0xe6   :  { %p10184_p11 = por %p10183_p10, %p10182_p9 }
  0xe8   :  { %p10185_p12 = pnand %p10184_p11, %p10178_p8 }
  0xea   :  { %10188 = shalt.err (!%p10185_p12)
}
  0xeb   :  { %113 = dma.hbm_to_vmem [thread:$0]  %s11820_s7, 512, %s108_s10, [#allocation15], %s10367_s5, %s10367_s5, %s10368_s0  }
  0xec   :  { %s10378_s6 = smov [#allocation19]   ;;  %s10379_s24 = smov [#allocation22]  }
  0xed   :  { %s130_s21 = sshll.u32 %s10378_s6, 4  ;;  %s150_s30 = sshll.u32 %s10379_s24, 4  ;;  %s131_s21 = int_to_ptr.vmem [resolvable:$true] %s130_s21  ;;  %s151_s30 = int_to_ptr.vmem [resolvable:$true] %s150_s30 }
  0xee   :  { %s11821_s25 = sld [smem:[#allocation55_spill]] }
  0xf4   :  { %s10189_s26 = scalar_lea.hbm %s11821_s25, 16 }
  0xf5   :  { %p10190_p13 = scmp.ne.s32.totalorder %s11821_s25, %s10189_s26  ;;  %p10193_p0 = scmp.lt.u32.totalorder %s10189_s26, %s11821_s25 }
  0xf7   :  { %p10195_p1 = pnand %p10193_p0, %p10190_p13 }
  0xf9   :  { %10198 = shalt.err (!%p10195_p1)
}
  0xfa   :  { %s10199_s10 = scalar_lea.vmem %s131_s21, 16  ;;  %s10203_s7 = scalar_lea.vmem %s131_s21, 32 }
  0xfb   :  { %p10200_p2 = scmp.ne.s32.totalorder %s131_s21, %s10199_s10  ;;  %p10204_p3 = scmp.lt.s32.totalorder %s131_s21, %s131_s21 }
  0xfc   :  { %p10205_p4 = scmp.lt.s32.totalorder %s10203_s7, %s10199_s10 }
  0xfe   :  { %p10206_p5 = por %p10205_p4, %p10204_p3 }
 0x100   :  { %p10207_p6 = pnand %p10206_p5, %p10200_p2 }
 0x102   :  { %10210 = shalt.err (!%p10207_p6)
}
 0x103   :  { %133 = dma.hbm_to_vmem [thread:$0]  %s11821_s25, 16, %s131_s21, [#allocation18]  }
 0x104   :  { %s10211_s23 = scalar_lea.hbm %s11773_s11, 16 }
 0x105   :  { %p10212_p7 = scmp.ne.s32.totalorder %s11773_s11, %s10211_s23  ;;  %p10215_p8 = scmp.lt.u32.totalorder %s10211_s23, %s11773_s11 }
 0x107   :  { %p10217_p9 = pnand %p10215_p8, %p10212_p7 }
 0x109   :  { %10220 = shalt.err (!%p10217_p9)
}
 0x10a   :  { %s10221_s4 = scalar_lea.vmem %s151_s30, 16  ;;  %s10225_s26 = scalar_lea.vmem %s151_s30, 32 }
 0x10b   :  { %p10222_p10 = scmp.ne.s32.totalorder %s151_s30, %s10221_s4  ;;  %p10226_p11 = scmp.lt.s32.totalorder %s151_s30, %s151_s30 }
 0x10c   :  { %p10227_p12 = scmp.lt.s32.totalorder %s10225_s26, %s10221_s4 }
 0x10e   :  { %p10228_p13 = por %p10227_p12, %p10226_p11 }
 0x110   :  { %p10229_p0 = pnand %p10228_p13, %p10222_p10 }
 0x112   :  { %10232 = shalt.err (!%p10229_p0)
}
 0x113   :  { %153 = dma.hbm_to_vmem [thread:$0]  %s11773_s11, 16, %s151_s30, [#allocation21]  }
 0x114   :  { %s10380_s2 = smov [#allocation25]   ;;  %s10381_s8 = smov [#allocation28]  }
 0x115   :  { %s173_s29 = sshll.u32 %s10380_s2, 4  ;;  %s199_s13 = sshll.u32 %s10381_s8, 4  ;;  %s174_s29 = int_to_ptr.vmem [resolvable:$true] %s173_s29  ;;  %s200_s13 = int_to_ptr.vmem [resolvable:$true] %s199_s13 }
 0x116   :  { %s10233_s1 = scalar_lea.hbm %s11776_s14, 512 }
 0x117   :  { %p10234_p1 = scmp.ne.s32.totalorder %s11776_s14, %s10233_s1  ;;  %p10237_p2 = scmp.lt.u32.totalorder %s10233_s1, %s11776_s14 }
 0x119   :  { %p10239_p3 = pnand %p10237_p2, %p10234_p1 }
 0x11b   :  { %10242 = shalt.err (!%p10239_p3)
}
 0x11c   :  { %s10243_s11 = scalar_lea.vmem %s174_s29, 512  ;;  %p10248_p5 = scmp.lt.s32.totalorder %s174_s29, %s174_s29 }
 0x11d   :  { %p10244_p4 = scmp.ne.s32.totalorder %s174_s29, %s10243_s11  ;;  %p10249_p6 = scmp.lt.s32.totalorder %s10243_s11, %s10243_s11 }
 0x11f   :  { %p10250_p7 = por %p10249_p6, %p10248_p5 }
 0x121   :  { %p10251_p8 = pnand %p10250_p7, %p10244_p4 }
 0x123   :  { %10254 = shalt.err (!%p10251_p8)
}
 0x124   :  { %179 = dma.hbm_to_vmem [thread:$0]  %s11776_s14, 512, %s174_s29, [#allocation24], %s10367_s5, %s10367_s5, %s10368_s0  }
 0x125   :  { %s10255_s15 = scalar_lea.hbm %s11779_s17, 512 }
 0x126   :  { %p10256_p9 = scmp.ne.s32.totalorder %s11779_s17, %s10255_s15  ;;  %p10259_p10 = scmp.lt.u32.totalorder %s10255_s15, %s11779_s17 }
 0x128   :  { %p10261_p11 = pnand %p10259_p10, %p10256_p9 }
 0x12a   :  { %10264 = shalt.err (!%p10261_p11)
}
 0x12b   :  { %s10265_s2 = scalar_lea.vmem %s200_s13, 512  ;;  %p10270_p13 = scmp.lt.s32.totalorder %s200_s13, %s200_s13 }
 0x12c   :  { %p10266_p12 = scmp.ne.s32.totalorder %s200_s13, %s10265_s2  ;;  %p10271_p0 = scmp.lt.s32.totalorder %s10265_s2, %s10265_s2 }
 0x12e   :  { %p10272_p1 = por %p10271_p0, %p10270_p13 }
 0x130   :  { %p10273_p2 = pnand %p10272_p1, %p10266_p12 }
 0x132   :  { %10276 = shalt.err (!%p10273_p2)
}
 0x133   :  { %205 = dma.hbm_to_vmem [thread:$0]  %s11779_s17, 512, %s200_s13, [#allocation27], %s10367_s5, %s10367_s5, %s10368_s0  }
 0x134   :  { %s10382_s8 = smov [#allocation31]   ;;  %s10277_s27 = scalar_lea.hbm %s11784_s22, 16384 }
 0x135   :  { %s227_s10 = sshll.u32 %s10382_s8, 4  ;;  %p10278_p3 = scmp.ne.s32.totalorder %s11784_s22, %s10277_s27  ;;  %s228_s10 = int_to_ptr.vmem [resolvable:$true] %s227_s10 }
 0x136   :  { %p10281_p4 = scmp.lt.u32.totalorder %s10277_s27, %s11784_s22 }
 0x138   :  { %p10283_p5 = pnand %p10281_p4, %p10278_p3 }
 0x13a   :  { %10286 = shalt.err (!%p10283_p5)
}
 0x13b   :  { %s10287_s30 = scalar_lea.vmem %s228_s10, 16384  ;;  %p10292_p7 = scmp.lt.s32.totalorder %s228_s10, %s228_s10 }
 0x13c   :  { %p10288_p6 = scmp.ne.s32.totalorder %s228_s10, %s10287_s30  ;;  %p10293_p8 = scmp.lt.s32.totalorder %s10287_s30, %s10287_s30 }
 0x13e   :  { %p10294_p9 = por %p10293_p8, %p10292_p7 }
 0x140   :  { %p10295_p10 = pnand %p10294_p9, %p10288_p6 }
 0x142   :  { %10298 = shalt.err (!%p10295_p10)
}
 0x143   :  { %s10383_s17 = smov 2048  }
 0x144   :  { %233 = dma.hbm_to_vmem [thread:$0]  %s11784_s22, 16384, %s228_s10, [#allocation30], %s10383_s17, %s10383_s17, %s10367_s5  }
 0x145   :  { %10343 = dma.done.wait [#allocation9], 16  }
 0x146   :  { %10344 = vsyncadd [#allocation9], 4294967280 }
 0x147   :  { %10345 = dma.done.wait [#allocation7], 256  }
 0x148   :  { %10346 = vsyncadd [#allocation7], 4294967040 }
 0x149   :  { %10347 = dma.done.wait [#allocation12], 512  }
 0x14a   :  { %10348 = vsyncadd [#allocation12], 4294966784 }
 0x14b   :  { %10349 = dma.done.wait [#allocation15], 1024  }
 0x14c   :  { %10350 = vsyncadd [#allocation15], 4294966272 }
 0x14d   :  { %10351 = dma.done.wait [#allocation18], 32  }
 0x14e   :  { %10352 = vsyncadd [#allocation18], 4294967264 }
 0x14f   :  { %10353 = dma.done.wait [#allocation21], 32  }
 0x150   :  { %10354 = vsyncadd [#allocation21], 4294967264 }
 0x151   :  { %10355 = dma.done.wait [#allocation24], 1024  }
 0x152   :  { %10356 = vsyncadd [#allocation24], 4294966272 }
 0x153   :  { %10357 = dma.done.wait [#allocation27], 1024  }
 0x154   :  { %10358 = vsyncadd [#allocation27], 4294966272 }
 0x155   :  { %10359 = dma.done.wait [#allocation30], 16400  }
 0x156   :  { %10360 = vsyncadd [#allocation30], 4294950896 }
 0x157   :  { %284 = sfence }
 0x158   :  { %v352_v0 = vld [vmem:[#allocation10] sm:$0xff]  ;;  %v353_v1 = vld [vmem:[#allocation10 + $0x8] sm:$0xff]  ;;  %s285_s22 = sld [smem:[#allocation6]]  ;;  %s10754_s5 = sld [smem:[#allocation6 + $0x1]]  ;;  %v496_v3 = vld [vmem:[#allocation11] sm:$0xff]  ;;  %vm288_vm0 = vcmask 122880  }
 0x159   :  { %v9165_v2 = vpack.c.bf16 %v353_v1, %v352_v0  ;;  %s10756_s9 = sld [smem:[#allocation6 + $0x2]]  ;;  %v497_v4 = vld [vmem:[#allocation11 + $0x8] sm:$0xff]  ;;  %s10758_s6 = sld [smem:[#allocation6 + $0x3]]  ;;  %v632_v6 = vld [vmem:[#allocation13] sm:$0xff]  ;;  %v633_v7 = vld [vmem:[#allocation13 + $0x8] sm:$0xff]  ;;  %v10384_v9 = vmov 0.0|0.0  }
 0x15a   :  { %s10760_s24 = sld [smem:[#allocation6 + $0x4]]  ;;  %v9169_v5 = vpack.c.bf16 %v497_v4, %v496_v3  ;;  %s10762_s15 = sld [smem:[#allocation6 + $0x5]]  ;;  %v10774_v8 = vpack.c.bf16 %v633_v7, %v632_v6  ;;  %vm361_vm1 = vcmask 130048   ;;  %v772_v32 = vld [vmem:[#allocation14] sm:$0xff]  ;;  %v773_v33 = vld [vmem:[#allocation14 + $0x8] sm:$0xff]  ;;  %v774_v37 = vld [vmem:[#allocation14 + $0x10] sm:$0xff] }
 0x15b   :  { %9166 = vmatprep.subr.bf16.mxu0 %v9165_v2  ;;  %s10764_s4 = sld [smem:[#allocation6 + $0x6]]  ;;  %s10766_s26 = sld [smem:[#allocation6 + $0x7]]  ;;  %v10877_v36 = vpack.c.bf16 %v773_v33, %v772_v32  ;;  %v775_v38 = vld [vmem:[#allocation14 + $0x18] sm:$0xff]  ;;  %v776_v39 = vld [vmem:[#allocation16] sm:$0xff]  ;;  %v777_v40 = vld [vmem:[#allocation16 + $0x8] sm:$0xff]  ;;  %vm10385_vm2 = vmmov 0  }
 0x15c   :  { %9168 = vmatpush3.bf16.msra.mxu0 %v9165_v2  ;;  %s10768_s21 = sld [smem:[#allocation6 + $0x8]]  ;;  %9170 = vmatprep.subr.bf16.mxu1 %v9169_v5  ;;  %s10770_s25 = sld [smem:[#allocation6 + $0x9]]  ;;  %v10386_v41 = vmov 0.0   ;;  %v10887_v42 = vpack.c.bf16 %v775_v38, %v774_v37  ;;  %v10889_v43 = vpack.c.bf16 %v777_v40, %v776_v39  ;;  %v778_v44 = vld [vmem:[#allocation16 + $0x10] sm:$0xff]  ;;  %v779_v45 = vld [vmem:[#allocation16 + $0x18] sm:$0xff]  ;;  %v793_v47 = vld [vmem:[#allocation26] sm:$0xff] }
 0x15d   :  { %s10772_s2 = sld [smem:[#allocation6 + $0xa]]  ;;  %9172 = vmatpush3.bf16.msra.mxu1 %v9169_v5  ;;  %s11822_s8 = sld [smem:[#allocation47_spill]]  ;;  %9174 = vmatprep.subr.bf16.mxu0 %v10774_v8  ;;  %v10898_v46 = vpack.c.bf16 %v779_v45, %v778_v44  ;;  %v794_v48 = vld [vmem:[#allocation26 + $0x8] sm:$0xff]  ;;  %v795_v50 = vld [vmem:[#allocation26 + $0x10] sm:$0xff]  ;;  %v796_v51 = vld [vmem:[#allocation26 + $0x18] sm:$0xff]  ;;  %vm487_vm3 = vcmask 254976  }
 0x15e   :  { %s10779_s7 = sld [smem:[#allocation6 + $0xb]]  ;;  %9177 = vmatprep.subr.bf16.mxu1 %v10384_v9  ;;  %v10912_v49 = vpack.c.bf16 %v794_v48, %v793_v47  ;;  %v10916_v52 = vpack.c.bf16 %v796_v51, %v795_v50  ;;  %v797_v53 = vld [vmem:[%s11778_s16] sm:$0xff]  ;;  %v798_v54 = vld [vmem:[%s11778_s16 + $0x8] sm:$0xff]  ;;  %v799_v56 = vld [vmem:[%s11778_s16 + $0x10] sm:$0xff]  ;;  %v10387_v7 = vmov 1983009808  }
 0x15f   :  { %v10926_v55 = vpack.c.bf16 %v798_v54, %v797_v53  ;;  %v800_v57 = vld [vmem:[%s11778_s16 + $0x18] sm:$0xff]  ;;  %v781_v59 = vld [vmem:[%s11774_s12] sm:$0xff]  ;;  %v782_v60 = vld [vmem:[%s11774_s12 + $0x8] sm:$0xff]  ;;  %vm809_vm4 = vcmask 261120  }
 0x160   :  { %v10939_v58 = vpack.c.bf16 %v800_v57, %v799_v56  ;;  %v789_v61 = vld [vmem:[#allocation25] sm:$0xff]  ;;  %v10949_v62 = vpack.c.bf16 %v782_v60, %v781_v59  ;;  %v790_v63 = vld [vmem:[#allocation25 + $0x8] sm:$0xff]  ;;  %v783_v1 = vld [vmem:[%s11774_s12 + $0x10] sm:$0xff] }
 0x161   :  { %v10952_v0 = vpack.c.bf16 %v790_v63, %v789_v61  ;;  %v784_v2 = vld [vmem:[%s11774_s12 + $0x18] sm:$0xff]  ;;  %v791_v3 = vld [vmem:[#allocation25 + $0x10] sm:$0xff]  ;;  %v792_v5 = vld [vmem:[#allocation25 + $0x18] sm:$0xff] }
 0x162   :  { %v10966_v4 = vpack.c.bf16 %v784_v2, %v783_v1  ;;  %v10968_v6 = vpack.c.bf16 %v792_v5, %v791_v3 }
 0x163   :  { %s286_s10 = scalar_lea.vmem %s11822_s8, %s285_s22  ;;  %s291_s3 = scalar_lea.vmem %s11822_s8, %s10754_s5 }
 0x164   :  { %v287_v10 = vld [vmem:[%s286_s10] sm:$0x1]  ;;  %s295_s11 = scalar_lea.vmem %s11822_s8, %s10756_s9  ;;  %s299_s0 = scalar_lea.vmem %s11822_s8, %s10758_s6 }
 0x165   :  { %289 = vst.msk [vmem:[#allocation2] sm:$0x1] %vm288_vm0, %v287_v10  ;;  %v292_v11 = vld [vmem:[%s291_s3] sm:$0x1]  ;;  %s303_s5 = scalar_lea.vmem %s11822_s8, %s10760_s24  ;;  %s307_s29 = scalar_lea.vmem %s11822_s8, %s10762_s15  ;;  %v449_v10 = vlaneseq }
 0x166   :  { %v296_v12 = vld [vmem:[%s295_s11] sm:$0x1]  ;;  %293 = vst.msk [vmem:[#allocation2 + $0x1] sm:$0x1] %vm288_vm0, %v292_v11  ;;  %s311_s6 = scalar_lea.vmem %s11822_s8, %s10764_s4  ;;  %s315_s3 = scalar_lea.vmem %s11822_s8, %s10766_s26 }
 0x167   :  { %297 = vst.msk [vmem:[#allocation2 + $0x2] sm:$0x1] %vm288_vm0, %v296_v12  ;;  %v300_v13 = vld [vmem:[%s299_s0] sm:$0x1]  ;;  %s319_s11 = scalar_lea.vmem %s11822_s8, %s10768_s21  ;;  %s323_s30 = scalar_lea.vmem %s11822_s8, %s10770_s25  ;;  %v10974_v12 = vshrl.u32 %v449_v10, 7 }
 0x168   :  { %v304_v14 = vld [vmem:[%s303_s5] sm:$0x1]  ;;  %301 = vst.msk [vmem:[#allocation2 + $0x3] sm:$0x1] %vm288_vm0, %v300_v13  ;;  %s327_s13 = scalar_lea.vmem %s11822_s8, %s10772_s2  ;;  %s331_s22 = scalar_lea.vmem %s11822_s8, %s10779_s7  ;;  %v7852_v13 = vld [vmem:[#allocation17] ss:$0 sm:$0xff] }
 0x169   :  { %305 = vst.msk [vmem:[#allocation2 + $0x4] sm:$0x1] %vm288_vm0, %v304_v14  ;;  %v308_v15 = vld [vmem:[%s307_s29] sm:$0x1]  ;;  %s7848_s5 = sld [smem:[#allocation6 + $0xc]]  ;;  %s7849_s25 = sld [smem:[#allocation6 + $0xd]] }
 0x16a   :  { %v312_v16 = vld [vmem:[%s311_s6] sm:$0x1]  ;;  %309 = vst.msk [vmem:[#allocation2 + $0x5] sm:$0x1] %vm288_vm0, %v308_v15  ;;  %s7850_s9 = sld [smem:[#allocation6 + $0xe]]  ;;  %s7851_s2 = sld [smem:[#allocation6 + $0xf]] }
 0x16b   :  { %313 = vst.msk [vmem:[#allocation2 + $0x6] sm:$0x1] %vm288_vm0, %v312_v16  ;;  %v316_v17 = vld [vmem:[%s315_s3] sm:$0x1]  ;;  %v7855_v14 = vld [vmem:[#allocation19] ss:$0 sm:$0xff] }
 0x16c   :  { %v320_v18 = vld [vmem:[%s319_s11] sm:$0x1]  ;;  %317 = vst.msk [vmem:[#allocation2 + $0x7] sm:$0x1] %vm288_vm0, %v316_v17  ;;  %s11824_s21 = sld [smem:[#allocation56_spill]] }
 0x16d   :  { %321 = vst.msk [vmem:[#allocation2 + $0x8] sm:$0x1] %vm288_vm0, %v320_v18  ;;  %v324_v19 = vld [vmem:[%s323_s30] sm:$0x1]  ;;  %s11823_s30 = sld [smem:[#allocation51_spill]] }
 0x16e   :  { %v328_v20 = vld [vmem:[%s327_s13] sm:$0x1]  ;;  %325 = vst.msk [vmem:[#allocation2 + $0x9] sm:$0x1] %vm288_vm0, %v324_v19 }
 0x16f   :  { %329 = vst.msk [vmem:[#allocation2 + $0xa] sm:$0x1] %vm288_vm0, %v328_v20  ;;  %v332_v21 = vld [vmem:[%s331_s22] sm:$0x1]  ;;  %s335_s10 = scalar_lea.vmem %s11822_s8, %s7848_s5  ;;  %s339_s6 = scalar_lea.vmem %s11822_s8, %s7849_s25 }
 0x170   :  { %333 = vst.msk [vmem:[#allocation2 + $0xb] sm:$0x1] %vm288_vm0, %v332_v21  ;;  %v336_v23 = vld [vmem:[%s335_s10] sm:$0x1]  ;;  %s343_s3 = scalar_lea.vmem %s11822_s8, %s7850_s9  ;;  %s347_s11 = scalar_lea.vmem %s11822_s8, %s7851_s2 }
 0x171   :  { %337 = vst.msk [vmem:[#allocation2 + $0xc] sm:$0x1] %vm288_vm0, %v336_v23  ;;  %v340_v24 = vld [vmem:[%s339_s6] sm:$0x1]  ;;  %s10388_s25 = smov [#allocation32]  }
 0x172   :  { %v344_v25 = vld [vmem:[%s343_s3] sm:$0x1]  ;;  %341 = vst.msk [vmem:[#allocation2 + $0xd] sm:$0x1] %vm288_vm0, %v340_v24  ;;  %s7790_s9 = sshll.u32 %s10388_s25, 4  ;;  %s7791_s9 = int_to_ptr.vmem [resolvable:$true] %s7790_s9 }
 0x173   :  { %v350_v22 = vld [vmem:[#allocation2] sm:$0xff]  ;;  %345 = vst.msk [vmem:[#allocation2 + $0xe] sm:$0x1] %vm288_vm0, %v344_v25  ;;  %v769_v28 = vld [vmem:[%s11823_s30 + $0x8] sm:$0xff]  ;;  %v770_v30 = vld [vmem:[%s11823_s30 + $0x10] sm:$0xff]  ;;  %s10299_s2 = scalar_lea.vmem %s7791_s9, 256  ;;  %p10304_p12 = scmp.lt.s32.totalorder %s7791_s9, %s7791_s9 }
 0x174   :  { %8356 = vmatprep.mubr.msk.f32.mxu0 %vm361_vm1, %v350_v22  ;;  %8363 = vmatprep.mubr.msk.f32.mxu1 %vm361_vm1, %v350_v22  ;;  %v348_v26 = vld [vmem:[%s347_s11] sm:$0x1]  ;;  %v771_v31 = vld [vmem:[%s11823_s30 + $0x18] sm:$0xff]  ;;  %p10300_p11 = scmp.ne.s32.totalorder %s7791_s9, %s10299_s2  ;;  %p10305_p13 = scmp.lt.s32.totalorder %s10299_s2, %s10299_s2 }
 0x175   :  { %349 = vst.msk [vmem:[#allocation2 + $0xf] sm:$0x1] %vm288_vm0, %v348_v26  ;;  %v768_v27 = vld [vmem:[%s11823_s30] sm:$0xff]  ;;  %v10875_v35 = vpack.c.bf16 %v771_v31, %v770_v30 }
 0x176   :  { %v10863_v29 = vpack.c.bf16 %v769_v28, %v768_v27  ;;  %p10306_p0 = por %p10305_p13, %p10304_p12 }
 0x178   :  { %p10307_p1 = pnand %p10306_p0, %p10300_p11 }
 0x17c   :  { %v351_v34 = vld [vmem:[#allocation2 + $0x8] sm:$0xff] }
 0x17d   :  { %8357 = vmatmul.mubr.msk.f32.vlgmr.msra.gmra.mrb[0].mxu0 %vm361_vm1, %v351_v34  ;;  %8364 = vmatmul.mubr.msk.f32.vlgmr.msra.gmra.mrb[0].mxu1 %vm361_vm1, %v351_v34 }
 0x17e   :  { %9179 = vmatpush3.bf16.msra.mxu1 %v10863_v29  ;;  %9176 = vmatpush3.bf16.msra.mxu0 %v10774_v8  ;;  %v447_v8 = vunpack.c.l.s4 %v10387_v7 }
 0x17f   :  { %9180 = vmatprep.subr.bf16.mxu1 %v10384_v9  ;;  %8370 = vmatprep.mubr.msk.f32.mxu0 %vm361_vm1, %v350_v22 }
 0x180   :  { %9183 = vmatprep.subr.bf16.mxu0 %v10384_v9  ;;  %8381 = vmatprep.mubr.msk.f32.mxu1 %vm10385_vm2, %v10386_v41  ;;  %v448_v11 = vunpack.c.0.s8 %v447_v8 }
 0x181   :  { %8371 = vmatmul.mubr.msk.f32.vlgmr.msra.gmra.mrb[2].mxu0 %vm361_vm1, %v351_v34  ;;  %v7858_v34 = vld [vmem:[#allocation20] ss:$0 sm:$0xff] }
 0x182   :  { %9182 = vmatpush3.bf16.msra.mxu1 %v10875_v35  ;;  %9185 = vmatpush3.bf16.msra.mxu0 %v10877_v36  ;;  %v10977_v15 = vsub.s32 %v448_v11, %v10974_v12 }
 0x183   :  { %9186 = vmatprep.subr.bf16.mxu0 %v10384_v9  ;;  %8392 = vmatprep.mubr.msk.f32.mxu0 %vm10385_vm2, %v10386_v41 }
 0x184   :  { %9189 = vmatprep.subr.bf16.mxu1 %v10384_v9 }
 0x185   :  { %8382 = vmatmul.mubr.f32.vlgmr.msra.gmra.mrb[2].mxu1 %v10386_v41 }
 0x186   :  { %9188 = vmatpush3.bf16.msra.mxu0 %v10887_v42  ;;  %9191 = vmatpush3.bf16.msra.mxu1 %v10889_v43 }
 0x187   :  { %9192 = vmatprep.subr.bf16.mxu1 %v10384_v9  ;;  %8403 = vmatprep.mubr.msk.f32.mxu1 %vm10385_vm2, %v10386_v41 }
 0x188   :  { %9195 = vmatprep.subr.bf16.mxu0 %v10384_v9 }
 0x189   :  { %8393 = vmatmul.mubr.f32.vlgmr.msra.gmra.mrb[4].mxu0 %v10386_v41 }
 0x18a   :  { %9194 = vmatpush3.bf16.msra.mxu1 %v10898_v46  ;;  %8414 = vmatprep.mubr.msk.f32.mxu0 %vm10385_vm2, %v10386_v41 }
 0x18b   :  { %9201 = vmatprep.subr.bf16.mxu1 %v10384_v9  ;;  %9197 = vmatpush3.bf16.msra.mxu0 %v10912_v49 }
 0x18c   :  { %9198 = vmatprep.subr.bf16.mxu0 %v10384_v9 }
 0x18d   :  { %8404 = vmatmul.mubr.f32.vlgmr.msra.gmra.mrb[4].mxu1 %v10386_v41 }
 0x18e   :  { %8425 = vmatprep.mubr.msk.f32.mxu1 %vm10385_vm2, %v10386_v41  ;;  %9203 = vmatpush3.bf16.msra.mxu1 %v10949_v62 }
 0x18f   :  { %9200 = vmatpush3.bf16.msra.mxu0 %v10916_v52  ;;  %9204 = vmatprep.subr.bf16.mxu1 %v10384_v9 }
 0x190   :  { %9207 = vmatprep.subr.bf16.mxu0 %v10384_v9 }
 0x192   :  { %8415 = vmatmul.mubr.f32.vlgmr.msra.gmra.mrb[6].mxu0 %v10386_v41  ;;  %9206 = vmatpush3.bf16.msra.mxu1 %v10966_v4 }
 0x193   :  { %9209 = vmatpush3.bf16.msra.mxu0 %v10926_v55  ;;  %8436 = vmatprep.mubr.msk.f32.mxu0 %vm10385_vm2, %v10386_v41 }
 0x194   :  { %9210 = vmatprep.subr.bf16.mxu0 %v10384_v9  ;;  %9213 = vmatprep.subr.bf16.mxu1 %v10384_v9 }
 0x197   :  { %9212 = vmatpush3.bf16.msra.mxu0 %v10939_v58 }
 0x198   :  { %9219 = vmatprep.subr.bf16.mxu0 %v10384_v9 }
 0x19a   :  { %8437 = vmatmul.mubr.f32.vlgmr.msra.gmra.mrb[8].mxu0 %v10386_v41 }
 0x19b   :  { %8458 = vmatprep.mubr.msk.f32.mxu0 %vm10385_vm2, %v10386_v41  ;;  %9221 = vmatpush3.bf16.msra.mxu0 %v10952_v0 }
 0x19c   :  { %9222 = vmatprep.subr.bf16.mxu0 %v10384_v9 }
 0x19f   :  { %9224 = vmatpush3.bf16.msra.mxu0 %v10968_v6 }
 0x1a0   :  { %9231 = vmatprep.subr.bf16.mxu0 %v10384_v9 }
 0x250   :  { %v8358_v16 = vpop.f32.mrb[0].mxu0  ;;  %v8365_v17 = vpop.f32.mrb[0].mxu1 }
 0x251   :  { %v440_v18 = vadd.f32 %v8358_v16, %v7852_v13  ;;  %v434_v19 = vpop.f32.mrb[1].mxu0  ;;  %v577_v20 = vadd.f32 %v8365_v17, %v7855_v14  ;;  %v571_v21 = vpop.f32.mrb[1].mxu1 }
 0x252   :  { %v435_v22 = vadd.f32 %v7852_v13, %v434_v19  ;;  %v572_v23 = vadd.f32 %v7855_v14, %v571_v21 }
 0x253   :  { %v462_v24 = vcombine.high %v440_v18, %v440_v18  ;;  %v469_v25 = vrot.slane %v440_v18, %v10977_v15  ;;  %v599_v26 = vcombine.high %v577_v20, %v577_v20  ;;  %v606_v27 = vrot.slane %v577_v20, %v10977_v15 }
 0x254   :  { %v445_v28 = vcombine.high %v435_v22, %v435_v22  ;;  %v452_v30 = vrot.slane %v435_v22, %v10977_v15  ;;  %v582_v31 = vcombine.high %v572_v23, %v572_v23  ;;  %v589_v32 = vrot.slane %v572_v23, %v10977_v15  ;;  %v8372_v33 = vpop.f32.mrb[2].mxu0 }
 0x255   :  { %v476_v37 = vrot.slane %v462_v24, %v10977_v15  ;;  %v477_v38 = vcombine.high %v469_v25, %v469_v25  ;;  %492 = vst.msk [vmem:[#allocation3 + $0x8] sm:$0x3] %vm487_vm3, %v469_v25  ;;  %v613_v39 = vrot.slane %v599_v26, %v10977_v15  ;;  %v614_v40 = vcombine.high %v606_v27, %v606_v27  ;;  %v707_v44 = vpop.f32.mrb[3].mxu0 }
 0x256   :  { %628 = vst.msk [vmem:[#allocation4 + $0x8] sm:$0x3] %vm487_vm3, %v606_v27  ;;  %v459_v45 = vrot.slane %v445_v28, %v10977_v15  ;;  %v460_v47 = vcombine.high %v452_v30, %v452_v30  ;;  %488 = vst.msk [vmem:[#allocation3] sm:$0x3] %vm487_vm3, %v452_v30  ;;  %v596_v48 = vrot.slane %v582_v31, %v10977_v15  ;;  %v11015_v28 = vld [vmem:[#allocation22] ss:$0 sm:$0xff] }
 0x257   :  { %v597_v50 = vcombine.high %v589_v32, %v589_v32  ;;  %624 = vst.msk [vmem:[#allocation4] sm:$0x3] %vm487_vm3, %v589_v32  ;;  %v478_v51 = vcombine.high %v476_v37, %v476_v37  ;;  %493 = vst.msk [vmem:[#allocation3 + $0xa] sm:$0x3] %vm487_vm3, %v477_v38  ;;  %v615_v53 = vcombine.high %v613_v39, %v613_v39 }
 0x258   :  { %494 = vst.msk [vmem:[#allocation3 + $0xc] sm:$0x3] %vm487_vm3, %v476_v37  ;;  %629 = vst.msk [vmem:[#allocation4 + $0xa] sm:$0x3] %vm487_vm3, %v614_v40  ;;  %v713_v54 = vadd.f32 %v8372_v33, %v7858_v34  ;;  %v708_v56 = vadd.f32 %v7858_v34, %v707_v44  ;;  %v461_v57 = vcombine.high %v459_v45, %v459_v45  ;;  %v879_v60 = vpop.f32.mrb[2].mxu1  ;;  %v785_v40 = vld [vmem:[#allocation23] sm:$0xff] }
 0x259   :  { %630 = vst.msk [vmem:[#allocation4 + $0xc] sm:$0x3] %vm487_vm3, %v613_v39  ;;  %489 = vst.msk [vmem:[#allocation3 + $0x2] sm:$0x3] %vm487_vm3, %v460_v47  ;;  %v598_v59 = vcombine.high %v596_v48, %v596_v48  ;;  %v8383_v61 = vpop.f32.mrb[3].mxu1  ;;  %v786_v44 = vld [vmem:[#allocation23 + $0x8] sm:$0xff] }
 0x25a   :  { %490 = vst.msk [vmem:[#allocation3 + $0x4] sm:$0x3] %vm487_vm3, %v459_v45  ;;  %625 = vst.msk [vmem:[#allocation4 + $0x2] sm:$0x3] %vm487_vm3, %v597_v50  ;;  %v735_v63 = vcombine.high %v713_v54, %v713_v54  ;;  %v742_v1 = vrot.slane %v713_v54, %v10977_v15  ;;  %v718_v2 = vcombine.high %v708_v56, %v708_v56  ;;  %v788_v54 = vld [vmem:[#allocation23 + $0x18] sm:$0xff]  ;;  %v803_v61 = vld [vmem:[#allocation28 + $0x10] sm:$0xff] }
 0x25b   :  { %626 = vst.msk [vmem:[#allocation4 + $0x4] sm:$0x3] %vm487_vm3, %v596_v48  ;;  %495 = vst.msk [vmem:[#allocation3 + $0xe] sm:$0x3] %vm487_vm3, %v478_v51  ;;  %v725_v3 = vrot.slane %v708_v56, %v10977_v15  ;;  %v11018_v50 = vpack.c.bf16 %v786_v44, %v785_v40 }
 0x25c   :  { %631 = vst.msk [vmem:[#allocation4 + $0xe] sm:$0x3] %vm487_vm3, %v615_v53  ;;  %491 = vst.msk [vmem:[#allocation3 + $0x6] sm:$0x3] %vm487_vm3, %v461_v57  ;;  %v749_v5 = vrot.slane %v735_v63, %v10977_v15  ;;  %v750_v7 = vcombine.high %v742_v1, %v742_v1  ;;  %v732_v8 = vrot.slane %v718_v2, %v10977_v15  ;;  %v949_v11 = vpop.f32.mrb[4].mxu0  ;;  %v787_v53 = vld [vmem:[#allocation23 + $0x10] sm:$0xff] }
 0x25d   :  { %627 = vst.msk [vmem:[#allocation4 + $0x6] sm:$0x3] %vm487_vm3, %v598_v59  ;;  %764 = vst.msk [vmem:[#allocation5 + $0x8] sm:$0x3] %vm487_vm3, %v742_v1  ;;  %v733_v10 = vcombine.high %v725_v3, %v725_v3  ;;  %v953_v13 = vld [vmem:[#allocation3] sm:$0x3]  ;;  %v11028_v56 = vpack.c.bf16 %v788_v54, %v787_v53 }
 0x25e   :  { %760 = vst.msk [vmem:[#allocation5] sm:$0x3] %vm487_vm3, %v725_v3  ;;  %v751_v14 = vcombine.high %v749_v5, %v749_v5  ;;  %765 = vst.msk [vmem:[#allocation5 + $0xa] sm:$0x3] %vm487_vm3, %v750_v7  ;;  %v734_v16 = vcombine.high %v732_v8, %v732_v8  ;;  %v8394_v17 = vpop.f32.mrb[5].mxu0  ;;  %v954_v18 = vadd.f32 %v953_v13, %v879_v60  ;;  %v801_v57 = vld [vmem:[#allocation28] sm:$0xff] }
 0x25f   :  { %766 = vst.msk [vmem:[#allocation5 + $0xc] sm:$0x3] %vm487_vm3, %v749_v5  ;;  %761 = vst.msk [vmem:[#allocation5 + $0x2] sm:$0x3] %vm487_vm3, %v733_v10  ;;  %v961_v19 = vld [vmem:[#allocation4] sm:$0x3] }
 0x260   :  { %762 = vst.msk [vmem:[#allocation5 + $0x4] sm:$0x3] %vm487_vm3, %v732_v8  ;;  %767 = vst.msk [vmem:[#allocation5 + $0xe] sm:$0x3] %vm487_vm3, %v751_v14  ;;  %v7861_v20 = vmul.f32 -1.442695, %v954_v18  ;;  %v962_v22 = vadd.f32 %v961_v19, %v949_v11 }
 0x261   :  { %763 = vst.msk [vmem:[#allocation5 + $0x6] sm:$0x3] %vm487_vm3, %v734_v16  ;;  %v1042_v21 = vpop.f32.mrb[4].mxu1  ;;  %v802_v59 = vld [vmem:[#allocation28 + $0x8] sm:$0xff]  ;;  %v804_v63 = vld [vmem:[#allocation28 + $0x18] sm:$0xff] }
 0x262   :  { %v8405_v23 = vpop.f32.mrb[5].mxu1  ;;  %9794 = vpow2.f32 %v7861_v20  ;;  %v7862_v24 = vmul.f32 -1.442695, %v962_v22  ;;  %v1043_v31 = vadd.f32 %v11015_v28, %v1042_v21  ;;  %v11038_v60 = vpack.c.bf16 %v802_v59, %v801_v57  ;;  %v11086_v8 = vld [vmem:[%s11780_s18] ss:$0 sm:$0xff] }
 0x263   :  { %v11048_v1 = vpack.c.bf16 %v804_v63, %v803_v61  ;;  %v11092_v19 = vld [vmem:[%s11781_s19] ss:$0 sm:$0xff]  ;;  %v1662_v22 = vld [vmem:[#allocation3 + $0x2] sm:$0x3]  ;;  %v11095_v57 = vld [vmem:[#allocation29] ss:$0 sm:$0xff] }
 0x264   :  { %9796 = vpow2.f32 %v7862_v24  ;;  %v11100_v63 = vld [vmem:[%s11782_s20] ss:$0 sm:$0xff] }
 0x265   :  { %v969_v34 = vld [vmem:[#allocation5] sm:$0x3]  ;;  %v1119_v2 = vpop.f32.mrb[6].mxu0 }
 0x266   :  { %v8416_v3 = vpop.f32.mrb[7].mxu0 }
 0x26c   :  { %v9795_v25 = vpop.eup %9794 }
 0x26d   :  { %v958_v26 = vadd.f32 1.0, %v9795_v25  ;;  %v1275_v5 = vpop.f32.mrb[8].mxu0 }
 0x26e   :  { %v9797_v27 = vpop.eup %9796  ;;  %v8438_v7 = vpop.f32.mrb[9].mxu0 }
 0x26f   :  { %9798 = vrcp.f32 %v958_v26  ;;  %v966_v30 = vadd.f32 1.0, %v9797_v27 }
 0x271   :  { %9800 = vrcp.f32 %v966_v30 }
 0x279   :  { %v9799_v32 = vpop.eup %9798 }
 0x27a   :  { %v1046_v33 = vmul.f32 %v9799_v32, %v1043_v31 }
 0x27b   :  { %v9801_v38 = vpop.eup %9800 }
 0x27c   :  { %v1047_v37 = vadd.f32 %v1046_v33, %v969_v34  ;;  %v1049_v39 = vsub.f32 1.0, %v9801_v38  ;;  %v1051_v47 = vmul.f32 0.0, %v9801_v38 }
 0x27e   :  { %9802 = vtanh.f32 %v1047_v37 }
 0x288   :  { %v9803_v45 = vpop.eup %9802 }
 0x289   :  { %v1050_v48 = vmul.f32 %v9803_v45, %v1049_v39 }
 0x28b   :  { %v11020_v51 = vadd.f32 %v1051_v47, %v1050_v48  ;;  %v1671_v47 = vld [vmem:[#allocation4 + $0x2] sm:$0x3] }
 0x28d   :  { %8426 = vmatmul.mubr.msk.f32.vlgmr.msra.gmra.mrb[6].mxu1 %vm809_vm4, %v11020_v51  ;;  %8459 = vmatmul.mubr.msk.f32.vlgmr.msra.gmra.mrb[10].mxu0 %vm809_vm4, %v11020_v51 }
 0x28e   :  { %9215 = vmatpush3.bf16.msra.mxu1 %v11018_v50  ;;  %9233 = vmatpush3.bf16.msra.mxu0 %v10863_v29 }
 0x28f   :  { %9216 = vmatprep.subr.bf16.mxu1 %v10384_v9  ;;  %9234 = vmatprep.subr.bf16.mxu0 %v10384_v9 }
 0x290   :  { %8447 = vmatprep.mubr.msk.f32.mxu1 %vm10385_vm2, %v10386_v41  ;;  %8480 = vmatprep.mubr.msk.f32.mxu0 %vm10385_vm2, %v10386_v41 }
 0x292   :  { %9218 = vmatpush3.bf16.msra.mxu1 %v11028_v56  ;;  %9236 = vmatpush3.bf16.msra.mxu0 %v10875_v35 }
 0x293   :  { %9225 = vmatprep.subr.bf16.mxu1 %v10384_v9  ;;  %9243 = vmatprep.subr.bf16.mxu0 %v10384_v9 }
 0x295   :  { %8448 = vmatmul.mubr.msk.f32.vlgmr.msra.gmra.mrb[8].mxu1 %vm809_vm4, %v11020_v51  ;;  %8481 = vmatmul.mubr.msk.f32.vlgmr.msra.gmra.mrb[12].mxu0 %vm809_vm4, %v11020_v51 }
 0x296   :  { %9227 = vmatpush3.bf16.msra.mxu1 %v11038_v60  ;;  %9245 = vmatpush3.bf16.msra.mxu0 %v10889_v43 }
 0x297   :  { %9228 = vmatprep.subr.bf16.mxu1 %v10384_v9  ;;  %9246 = vmatprep.subr.bf16.mxu0 %v10384_v9 }
 0x298   :  { %8469 = vmatprep.mubr.msk.f32.mxu1 %vm10385_vm2, %v10386_v41  ;;  %8502 = vmatprep.mubr.msk.f32.mxu0 %vm10385_vm2, %v10386_v41 }
 0x29a   :  { %9230 = vmatpush3.bf16.msra.mxu1 %v11048_v1  ;;  %9248 = vmatpush3.bf16.msra.mxu0 %v10898_v46 }
 0x29b   :  { %9237 = vmatprep.subr.bf16.mxu1 %v10384_v9  ;;  %9255 = vmatprep.subr.bf16.mxu0 %v10384_v9 }
 0x29d   :  { %8470 = vmatmul.mubr.f32.vlgmr.msra.gmra.mrb[10].mxu1 %v10386_v41  ;;  %8503 = vmatmul.mubr.msk.f32.vlgmr.msra.gmra.mrb[14].mxu0 %vm809_vm4, %v11020_v51 }
 0x29e   :  { %9239 = vmatpush3.bf16.msra.mxu1 %v10877_v36  ;;  %8491 = vmatprep.mubr.msk.f32.mxu1 %vm10385_vm2, %v10386_v41 }
 0x29f   :  { %9240 = vmatprep.subr.bf16.mxu1 %v10384_v9  ;;  %9257 = vmatpush3.bf16.msra.mxu0 %v10949_v62 }
 0x2a0   :  { %9258 = vmatprep.subr.bf16.mxu0 %v10384_v9  ;;  %8524 = vmatprep.mubr.msk.f32.mxu0 %vm10385_vm2, %v10386_v41 }
 0x2a2   :  { %9242 = vmatpush3.bf16.msra.mxu1 %v10887_v42 }
 0x2a3   :  { %9249 = vmatprep.subr.bf16.mxu1 %v10384_v9  ;;  %9260 = vmatpush3.bf16.msra.mxu0 %v10966_v4 }
 0x2a4   :  { %9267 = vmatprep.subr.bf16.mxu0 %v10384_v9 }
 0x2a5   :  { %8492 = vmatmul.mubr.msk.f32.vlgmr.msra.gmra.mrb[12].mxu1 %vm809_vm4, %v11020_v51 }
 0x2a6   :  { %9251 = vmatpush3.bf16.msra.mxu1 %v10912_v49  ;;  %8513 = vmatprep.mubr.msk.f32.mxu1 %vm10385_vm2, %v10386_v41 }
 0x2a7   :  { %9252 = vmatprep.subr.bf16.mxu1 %v10384_v9 }
 0x2aa   :  { %9254 = vmatpush3.bf16.msra.mxu1 %v10916_v52 }
 0x2ab   :  { %9261 = vmatprep.subr.bf16.mxu1 %v10384_v9 }
 0x360   :  { %v1192_v10 = vpop.f32.mrb[6].mxu1  ;;  %v1434_v11 = vpop.f32.mrb[10].mxu0 }
 0x361   :  { %v1193_v13 = vadd.f32 %v1192_v10, %v1119_v2  ;;  %v8427_v14 = vpop.f32.mrb[7].mxu1  ;;  %v8460_v16 = vpop.f32.mrb[11].mxu0 }
 0x363   :  { %v1202_v17 = vadd.f32 %v11086_v8, %v1193_v13 }
 0x365   :  { %v7866_v18 = vmul.f32 -1.442695, %v1202_v17 }
 0x367   :  { %9804 = vpow2.f32 %v7866_v18  ;;  %v1680_v18 = vld [vmem:[#allocation5 + $0x2] sm:$0x3] }
 0x368   :  { %v1345_v20 = vpop.f32.mrb[8].mxu1  ;;  %v1587_v21 = vpop.f32.mrb[12].mxu0 }
 0x369   :  { %v1346_v23 = vadd.f32 %v1345_v20, %v1275_v5  ;;  %v1663_v24 = vadd.f32 %v1662_v22, %v1587_v21  ;;  %v8449_v25 = vpop.f32.mrb[9].mxu1  ;;  %v8482_v26 = vpop.f32.mrb[13].mxu0  ;;  %v1435_v5 = vadd.f32 %v11100_v63, %v1434_v11 }
 0x36b   :  { %v1355_v27 = vadd.f32 %v11092_v19, %v1346_v23  ;;  %v7875_v30 = vmul.f32 -1.442695, %v1663_v24 }
 0x36d   :  { %v7869_v31 = vmul.f32 -1.442695, %v1355_v27  ;;  %9806 = vpow2.f32 %v7875_v30 }
 0x36f   :  { %9808 = vpow2.f32 %v7869_v31 }
 0x370   :  { %v1510_v32 = vpop.f32.mrb[10].mxu1  ;;  %v1747_v33 = vpop.f32.mrb[14].mxu0 }
 0x371   :  { %v9805_v34 = vpop.eup %9804  ;;  %v8471_v37 = vpop.f32.mrb[11].mxu1  ;;  %v1511_v2 = vadd.f32 %v11095_v57, %v1510_v32  ;;  %v1748_v13 = vadd.f32 %v11015_v28, %v1747_v33 }
 0x372   :  { %v8504_v38 = vpop.f32.mrb[15].mxu0  ;;  %v1206_v39 = vadd.f32 1.0, %v9805_v34 }
 0x374   :  { %9810 = vrcp.f32 %v1206_v39 }
 0x377   :  { %v9807_v40 = vpop.eup %9806 }
 0x378   :  { %v1667_v44 = vadd.f32 1.0, %v9807_v40  ;;  %v1657_v45 = vpop.f32.mrb[12].mxu1 }
 0x379   :  { %v9809_v48 = vpop.eup %9808  ;;  %v1672_v53 = vadd.f32 %v1671_v47, %v1657_v45  ;;  %v8493_v54 = vpop.f32.mrb[13].mxu1 }
 0x37a   :  { %9812 = vrcp.f32 %v1667_v44  ;;  %v1359_v59 = vadd.f32 1.0, %v9809_v48 }
 0x37b   :  { %v7876_v61 = vmul.f32 -1.442695, %v1672_v53 }
 0x37d   :  { %9814 = vpow2.f32 %v7876_v61 }
 0x37e   :  { %v9811_v3 = vpop.eup %9810  ;;  %9816 = vrcp.f32 %v1359_v59 }
 0x37f   :  { %v1514_v7 = vmul.f32 %v9811_v3, %v1511_v2 }
 0x381   :  { %v1515_v10 = vadd.f32 %v1514_v7, %v1435_v5 }
 0x383   :  { %9818 = vtanh.f32 %v1515_v10  ;;  %v2346_v10 = vld [vmem:[#allocation3 + $0x4] sm:$0x3] }
 0x384   :  { %v9813_v14 = vpop.eup %9812 }
 0x385   :  { %v1751_v16 = vmul.f32 %v9813_v14, %v1748_v13 }
 0x387   :  { %v9815_v17 = vpop.eup %9814  ;;  %v1752_v20 = vadd.f32 %v1751_v16, %v1680_v18 }
 0x388   :  { %v1676_v21 = vadd.f32 1.0, %v9815_v17  ;;  %v9817_v22 = vpop.eup %9816 }
 0x389   :  { %v1517_v23 = vsub.f32 1.0, %v9817_v22  ;;  %v1519_v26 = vmul.f32 0.0, %v9817_v22 }
 0x38a   :  { %9820 = vrcp.f32 %v1676_v21 }
 0x38b   :  { %9822 = vtanh.f32 %v1752_v20 }
 0x38d   :  { %v9819_v24 = vpop.eup %9818 }
 0x38e   :  { %v1518_v25 = vmul.f32 %v9819_v24, %v1517_v23  ;;  %v2355_v24 = vld [vmem:[#allocation4 + $0x4] sm:$0x3] }
 0x390   :  { %v11105_v11 = vadd.f32 %v1519_v26, %v1518_v25 }
 0x392   :  { %8514 = vmatmul.mubr.msk.f32.vlgmr.msra.gmra.mrb[14].mxu1 %vm809_vm4, %v11105_v11 }
 0x393   :  { %9263 = vmatpush3.bf16.msra.mxu1 %v10926_v55  ;;  %8535 = vmatprep.mubr.msk.f32.mxu1 %vm10385_vm2, %v10386_v41 }
 0x394   :  { %v9821_v27 = vpop.eup %9820  ;;  %9264 = vmatprep.subr.bf16.mxu1 %v10384_v9 }
 0x395   :  { %v1754_v30 = vsub.f32 1.0, %v9821_v27  ;;  %v9823_v31 = vpop.eup %9822  ;;  %v1756_v33 = vmul.f32 %v9821_v27, %v11020_v51 }
 0x397   :  { %v1755_v32 = vmul.f32 %v9823_v31, %v1754_v30  ;;  %9266 = vmatpush3.bf16.msra.mxu1 %v10939_v58 }
 0x398   :  { %9273 = vmatprep.subr.bf16.mxu1 %v10384_v9 }
 0x399   :  { %v11116_v34 = vadd.f32 %v1756_v33, %v1755_v32 }
 0x39a   :  { %8536 = vmatmul.mubr.msk.f32.vlgmr.msra.gmra.mrb[16].mxu1 %vm809_vm4, %v11105_v11 }
 0x39b   :  { %8525 = vmatmul.mubr.msk.f32.vlgmr.msra.gmra.mrb[16].mxu0 %vm809_vm4, %v11116_v34  ;;  %9275 = vmatpush3.bf16.msra.mxu1 %v10952_v0 }
 0x39c   :  { %9269 = vmatpush3.bf16.msra.mxu0 %v11018_v50  ;;  %9276 = vmatprep.subr.bf16.mxu1 %v10384_v9 }
 0x39d   :  { %9270 = vmatprep.subr.bf16.mxu0 %v10384_v9  ;;  %8546 = vmatprep.mubr.msk.f32.mxu0 %vm10385_vm2, %v10386_v41 }
 0x39e   :  { %8557 = vmatprep.mubr.msk.f32.mxu1 %vm10385_vm2, %v10386_v41 }
 0x39f   :  { %9278 = vmatpush3.bf16.msra.mxu1 %v10968_v6 }
 0x3a0   :  { %9272 = vmatpush3.bf16.msra.mxu0 %v11028_v56  ;;  %9285 = vmatprep.subr.bf16.mxu1 %v10384_v9 }
 0x3a1   :  { %9279 = vmatprep.subr.bf16.mxu0 %v10384_v9 }
 0x3a2   :  { %8558 = vmatmul.mubr.msk.f32.vlgmr.msra.gmra.mrb[18].mxu1 %vm809_vm4, %v11116_v34 }
 0x3a3   :  { %8547 = vmatmul.mubr.msk.f32.vlgmr.msra.gmra.mrb[18].mxu0 %vm809_vm4, %v11116_v34  ;;  %9287 = vmatpush3.bf16.msra.mxu1 %v10863_v29 }
 0x3a4   :  { %9281 = vmatpush3.bf16.msra.mxu0 %v11038_v60  ;;  %9288 = vmatprep.subr.bf16.mxu1 %v10384_v9 }
 0x3a5   :  { %9282 = vmatprep.subr.bf16.mxu0 %v10384_v9  ;;  %8568 = vmatprep.mubr.msk.f32.mxu0 %vm10385_vm2, %v10386_v41 }
 0x3a6   :  { %8579 = vmatprep.mubr.msk.f32.mxu1 %vm10385_vm2, %v10386_v41 }
 0x3a7   :  { %9290 = vmatpush3.bf16.msra.mxu1 %v10875_v35 }
 0x3a8   :  { %9284 = vmatpush3.bf16.msra.mxu0 %v11048_v1  ;;  %9297 = vmatprep.subr.bf16.mxu1 %v10384_v9 }
 0x3a9   :  { %9291 = vmatprep.subr.bf16.mxu0 %v10384_v9 }
 0x3aa   :  { %8580 = vmatmul.mubr.msk.f32.vlgmr.msra.gmra.mrb[20].mxu1 %vm809_vm4, %v11116_v34 }
 0x3ab   :  { %8569 = vmatmul.mubr.msk.f32.vlgmr.msra.gmra.mrb[20].mxu0 %vm809_vm4, %v11105_v11  ;;  %9299 = vmatpush3.bf16.msra.mxu1 %v10889_v43 }
 0x3ac   :  { %9293 = vmatpush3.bf16.msra.mxu0 %v10877_v36  ;;  %9300 = vmatprep.subr.bf16.mxu1 %v10384_v9 }
 0x3ad   :  { %9294 = vmatprep.subr.bf16.mxu0 %v10384_v9  ;;  %8590 = vmatprep.mubr.msk.f32.mxu0 %vm10385_vm2, %v10386_v41 }
 0x3ae   :  { %8601 = vmatprep.mubr.msk.f32.mxu1 %vm10385_vm2, %v10386_v41 }
 0x3af   :  { %9302 = vmatpush3.bf16.msra.mxu1 %v10898_v46 }
 0x3b0   :  { %9296 = vmatpush3.bf16.msra.mxu0 %v10887_v42  ;;  %9309 = vmatprep.subr.bf16.mxu1 %v10384_v9 }
 0x3b1   :  { %9303 = vmatprep.subr.bf16.mxu0 %v10384_v9 }
 0x3b2   :  { %8602 = vmatmul.mubr.msk.f32.vlgmr.msra.gmra.mrb[22].mxu1 %vm809_vm4, %v11116_v34 }
 0x3b3   :  { %8591 = vmatmul.mubr.msk.f32.vlgmr.msra.gmra.mrb[22].mxu0 %vm809_vm4, %v11116_v34  ;;  %9311 = vmatpush3.bf16.msra.mxu1 %v10949_v62 }
 0x3b4   :  { %9305 = vmatpush3.bf16.msra.mxu0 %v10912_v49  ;;  %8612 = vmatprep.mubr.msk.f32.mxu0 %vm10385_vm2, %v10386_v41 }
 0x3b5   :  { %9306 = vmatprep.subr.bf16.mxu0 %v10384_v9  ;;  %9312 = vmatprep.subr.bf16.mxu1 %v10384_v9 }
 0x3b6   :  { %8623 = vmatprep.mubr.msk.f32.mxu1 %vm10385_vm2, %v10386_v41 }
 0x3b7   :  { %9314 = vmatpush3.bf16.msra.mxu1 %v10966_v4 }
 0x3b8   :  { %9308 = vmatpush3.bf16.msra.mxu0 %v10916_v52  ;;  %9321 = vmatprep.subr.bf16.mxu1 %v10384_v9 }
 0x3b9   :  { %9315 = vmatprep.subr.bf16.mxu0 %v10384_v9 }
 0x465   :  { %v1827_v51 = vpop.f32.mrb[14].mxu1 }
 0x466   :  { %v8515_v37 = vpop.f32.mrb[15].mxu1 }
 0x46d   :  { %v1977_v38 = vpop.f32.mrb[16].mxu1 }
 0x46e   :  { %v1900_v39 = vpop.f32.mrb[16].mxu0  ;;  %v8537_v40 = vpop.f32.mrb[17].mxu1 }
 0x46f   :  { %v1901_v44 = vadd.f32 %v1900_v39, %v1827_v51  ;;  %v8526_v45 = vpop.f32.mrb[17].mxu0 }
 0x471   :  { %v1904_v47 = vadd.f32 %v11086_v8, %v1901_v44 }
 0x473   :  { %v7880_v48 = vmul.f32 -1.442695, %v1904_v47 }
 0x475   :  { %9824 = vpow2.f32 %v7880_v48  ;;  %v2124_v53 = vpop.f32.mrb[18].mxu1 }
 0x476   :  { %v2047_v54 = vpop.f32.mrb[18].mxu0  ;;  %v8559_v59 = vpop.f32.mrb[19].mxu1 }
 0x477   :  { %v2048_v61 = vadd.f32 %v2047_v54, %v1977_v38  ;;  %v8548_v2 = vpop.f32.mrb[19].mxu0  ;;  %v2125_v38 = vadd.f32 %v11100_v63, %v2124_v53 }
 0x479   :  { %v2051_v3 = vadd.f32 %v11092_v19, %v2048_v61 }
 0x47b   :  { %v7883_v5 = vmul.f32 -1.442695, %v2051_v3 }
 0x47d   :  { %9826 = vpow2.f32 %v7883_v5  ;;  %v2271_v7 = vpop.f32.mrb[20].mxu1  ;;  %v2364_v5 = vld [vmem:[#allocation5 + $0x4] sm:$0x3] }
 0x47e   :  { %v2194_v13 = vpop.f32.mrb[20].mxu0  ;;  %v2347_v14 = vadd.f32 %v2346_v10, %v2271_v7  ;;  %v8581_v16 = vpop.f32.mrb[21].mxu1 }
 0x47f   :  { %v9825_v17 = vpop.eup %9824  ;;  %v8570_v18 = vpop.f32.mrb[21].mxu0  ;;  %v2195_v33 = vadd.f32 %v11095_v57, %v2194_v13 }
 0x480   :  { %v1908_v20 = vadd.f32 1.0, %v9825_v17  ;;  %v7888_v21 = vmul.f32 -1.442695, %v2347_v14 }
 0x482   :  { %9828 = vrcp.f32 %v1908_v20 }
 0x483   :  { %9830 = vpow2.f32 %v7888_v21 }
 0x485   :  { %v2431_v22 = vpop.f32.mrb[22].mxu1 }
 0x486   :  { %v2341_v23 = vpop.f32.mrb[22].mxu0  ;;  %v8603_v25 = vpop.f32.mrb[23].mxu1  ;;  %v2432_v54 = vadd.f32 %v11015_v28, %v2431_v22 }
 0x487   :  { %v9827_v26 = vpop.eup %9826  ;;  %v2356_v27 = vadd.f32 %v2355_v24, %v2341_v23  ;;  %v8592_v30 = vpop.f32.mrb[23].mxu0 }
 0x488   :  { %v2055_v31 = vadd.f32 1.0, %v9827_v26 }
 0x489   :  { %v7889_v32 = vmul.f32 -1.442695, %v2356_v27 }
 0x48b   :  { %9832 = vpow2.f32 %v7889_v32 }
 0x48c   :  { %v9829_v51 = vpop.eup %9828  ;;  %9834 = vrcp.f32 %v2055_v31 }
 0x48d   :  { %v9831_v37 = vpop.eup %9830  ;;  %v2198_v39 = vmul.f32 %v9829_v51, %v2195_v33 }
 0x48e   :  { %v2351_v40 = vadd.f32 1.0, %v9831_v37 }
 0x48f   :  { %v2199_v44 = vadd.f32 %v2198_v39, %v2125_v38  ;;  %v3030_v39 = vld [vmem:[#allocation3 + $0x6] sm:$0x3] }
 0x490   :  { %9836 = vrcp.f32 %v2351_v40 }
 0x491   :  { %9838 = vtanh.f32 %v2199_v44 }
 0x495   :  { %v9833_v45 = vpop.eup %9832 }
 0x496   :  { %v9835_v47 = vpop.eup %9834  ;;  %v2360_v48 = vadd.f32 1.0, %v9833_v45 }
 0x497   :  { %v2201_v61 = vsub.f32 1.0, %v9835_v47  ;;  %v2203_v10 = vmul.f32 %v9835_v47, %v11105_v11 }
 0x498   :  { %9840 = vrcp.f32 %v2360_v48 }
 0x49a   :  { %v9837_v59 = vpop.eup %9836 }
 0x49b   :  { %v9839_v2 = vpop.eup %9838  ;;  %v2435_v3 = vmul.f32 %v9837_v59, %v2432_v54 }
 0x49c   :  { %v2202_v7 = vmul.f32 %v9839_v2, %v2201_v61 }
 0x49d   :  { %v2436_v53 = vadd.f32 %v2435_v3, %v2364_v5 }
 0x49e   :  { %v11188_v13 = vadd.f32 %v2203_v10, %v2202_v7  ;;  %v3039_v10 = vld [vmem:[#allocation4 + $0x6] sm:$0x3] }
 0x49f   :  { %9842 = vtanh.f32 %v2436_v53 }
 0x4a0   :  { %8613 = vmatmul.mubr.msk.f32.vlgmr.msra.gmra.mrb[24].mxu0 %vm809_vm4, %v11188_v13 }
 0x4a1   :  { %9317 = vmatpush3.bf16.msra.mxu0 %v10926_v55  ;;  %8634 = vmatprep.mubr.msk.f32.mxu0 %vm10385_vm2, %v10386_v41 }
 0x4a2   :  { %9318 = vmatprep.subr.bf16.mxu0 %v10384_v9  ;;  %v9841_v14 = vpop.eup %9840 }
 0x4a3   :  { %v2438_v11 = vsub.f32 1.0, %v9841_v14  ;;  %v2440_v17 = vmul.f32 %v9841_v14, %v11116_v34 }
 0x4a5   :  { %9320 = vmatpush3.bf16.msra.mxu0 %v10939_v58 }
 0x4a6   :  { %9327 = vmatprep.subr.bf16.mxu0 %v10384_v9 }
 0x4a8   :  { %8635 = vmatmul.mubr.msk.f32.vlgmr.msra.gmra.mrb[26].mxu0 %vm809_vm4, %v11188_v13 }
 0x4a9   :  { %v9843_v16 = vpop.eup %9842  ;;  %9329 = vmatpush3.bf16.msra.mxu0 %v10952_v0  ;;  %8656 = vmatprep.mubr.msk.f32.mxu0 %vm10385_vm2, %v10386_v41 }
 0x4aa   :  { %v2439_v18 = vmul.f32 %v9843_v16, %v2438_v11  ;;  %9330 = vmatprep.subr.bf16.mxu0 %v10384_v9 }
 0x4ac   :  { %v11205_v20 = vadd.f32 %v2440_v17, %v2439_v18 }
 0x4ad   :  { %9332 = vmatpush3.bf16.msra.mxu0 %v10968_v6 }
 0x4ae   :  { %8624 = vmatmul.mubr.msk.f32.vlgmr.msra.gmra.mrb[24].mxu1 %vm809_vm4, %v11205_v20  ;;  %9339 = vmatprep.subr.bf16.mxu0 %v10384_v9 }
 0x4af   :  { %9323 = vmatpush3.bf16.msra.mxu1 %v11018_v50  ;;  %8645 = vmatprep.mubr.msk.f32.mxu1 %vm10385_vm2, %v10386_v41 }
 0x4b0   :  { %8657 = vmatmul.mubr.msk.f32.vlgmr.msra.gmra.mrb[28].mxu0 %vm809_vm4, %v11205_v20  ;;  %9324 = vmatprep.subr.bf16.mxu1 %v10384_v9 }
 0x4b1   :  { %9341 = vmatpush3.bf16.msra.mxu0 %v10863_v29  ;;  %8678 = vmatprep.mubr.msk.f32.mxu0 %vm10385_vm2, %v10386_v41 }
 0x4b2   :  { %9342 = vmatprep.subr.bf16.mxu0 %v10384_v9 }
 0x4b3   :  { %9326 = vmatpush3.bf16.msra.mxu1 %v11028_v56 }
 0x4b4   :  { %9333 = vmatprep.subr.bf16.mxu1 %v10384_v9 }
 0x4b5   :  { %9344 = vmatpush3.bf16.msra.mxu0 %v10875_v35 }
 0x4b6   :  { %8646 = vmatmul.mubr.msk.f32.vlgmr.msra.gmra.mrb[26].mxu1 %vm809_vm4, %v11205_v20  ;;  %9351 = vmatprep.subr.bf16.mxu0 %v10384_v9 }
 0x4b7   :  { %9335 = vmatpush3.bf16.msra.mxu1 %v11038_v60  ;;  %8667 = vmatprep.mubr.msk.f32.mxu1 %vm10385_vm2, %v10386_v41 }
 0x4b8   :  { %8679 = vmatmul.mubr.msk.f32.vlgmr.msra.gmra.mrb[30].mxu0 %vm809_vm4, %v11205_v20  ;;  %9336 = vmatprep.subr.bf16.mxu1 %v10384_v9 }
 0x4b9   :  { %9353 = vmatpush3.bf16.msra.mxu0 %v10889_v43  ;;  %8700 = vmatprep.mubr.msk.f32.mxu0 %vm10385_vm2, %v10386_v41 }
 0x4ba   :  { %9354 = vmatprep.subr.bf16.mxu0 %v10384_v9 }
 0x4bb   :  { %9338 = vmatpush3.bf16.msra.mxu1 %v11048_v1 }
 0x4bc   :  { %9345 = vmatprep.subr.bf16.mxu1 %v10384_v9 }
 0x4bd   :  { %9356 = vmatpush3.bf16.msra.mxu0 %v10898_v46 }
 0x4be   :  { %8668 = vmatmul.mubr.msk.f32.vlgmr.msra.gmra.mrb[28].mxu1 %vm809_vm4, %v11188_v13  ;;  %9363 = vmatprep.subr.bf16.mxu0 %v10384_v9 }
 0x4bf   :  { %9347 = vmatpush3.bf16.msra.mxu1 %v10877_v36  ;;  %8689 = vmatprep.mubr.msk.f32.mxu1 %vm10385_vm2, %v10386_v41 }
 0x4c0   :  { %8701 = vmatmul.mubr.msk.f32.vlgmr.msra.gmra.mrb[32].mxu0 %vm809_vm4, %v11205_v20  ;;  %9348 = vmatprep.subr.bf16.mxu1 %v10384_v9 }
 0x4c1   :  { %9365 = vmatpush3.bf16.msra.mxu0 %v10949_v62  ;;  %8722 = vmatprep.mubr.msk.f32.mxu0 %vm10385_vm2, %v10386_v41 }
 0x4c2   :  { %9366 = vmatprep.subr.bf16.mxu0 %v10384_v9 }
 0x4c3   :  { %9350 = vmatpush3.bf16.msra.mxu1 %v10887_v42 }
 0x4c4   :  { %9357 = vmatprep.subr.bf16.mxu1 %v10384_v9 }
 0x4c5   :  { %9368 = vmatpush3.bf16.msra.mxu0 %v10966_v4 }
 0x4c6   :  { %8690 = vmatmul.mubr.msk.f32.vlgmr.msra.gmra.mrb[30].mxu1 %vm809_vm4, %v11205_v20  ;;  %9375 = vmatprep.subr.bf16.mxu0 %v10384_v9 }
 0x4c7   :  { %9359 = vmatpush3.bf16.msra.mxu1 %v10912_v49  ;;  %8711 = vmatprep.mubr.msk.f32.mxu1 %vm10385_vm2, %v10386_v41 }
 0x4c8   :  { %9360 = vmatprep.subr.bf16.mxu1 %v10384_v9 }
 0x4cb   :  { %9362 = vmatpush3.bf16.msra.mxu1 %v10916_v52 }
 0x4cc   :  { %9369 = vmatprep.subr.bf16.mxu1 %v10384_v9 }
 0x573   :  { %v2511_v34 = vpop.f32.mrb[24].mxu0 }
 0x574   :  { %v8614_v21 = vpop.f32.mrb[25].mxu0 }
 0x57b   :  { %v2661_v22 = vpop.f32.mrb[26].mxu0 }
 0x57c   :  { %v8636_v23 = vpop.f32.mrb[27].mxu0 }
 0x581   :  { %v2584_v24 = vpop.f32.mrb[24].mxu1 }
 0x582   :  { %v2585_v25 = vadd.f32 %v2584_v24, %v2511_v34  ;;  %v8625_v26 = vpop.f32.mrb[25].mxu1 }
 0x583   :  { %v2808_v27 = vpop.f32.mrb[28].mxu0 }
 0x584   :  { %v2588_v30 = vadd.f32 %v11086_v8, %v2585_v25  ;;  %v8658_v31 = vpop.f32.mrb[29].mxu0  ;;  %v2809_v23 = vadd.f32 %v11100_v63, %v2808_v27 }
 0x586   :  { %v7893_v32 = vmul.f32 -1.442695, %v2588_v30 }
 0x588   :  { %9844 = vpow2.f32 %v7893_v32 }
 0x589   :  { %v2731_v33 = vpop.f32.mrb[26].mxu1 }
 0x58a   :  { %v2732_v51 = vadd.f32 %v2731_v33, %v2661_v22  ;;  %v8647_v37 = vpop.f32.mrb[27].mxu1 }
 0x58b   :  { %v2955_v38 = vpop.f32.mrb[30].mxu0 }
 0x58c   :  { %v2735_v40 = vadd.f32 %v11092_v19, %v2732_v51  ;;  %v3031_v44 = vadd.f32 %v3030_v39, %v2955_v38  ;;  %v8680_v45 = vpop.f32.mrb[31].mxu0  ;;  %v3048_v51 = vld [vmem:[#allocation5 + $0x6] sm:$0x3] }
 0x58e   :  { %v7896_v47 = vmul.f32 -1.442695, %v2735_v40  ;;  %v7901_v48 = vmul.f32 -1.442695, %v3031_v44 }
 0x590   :  { %9846 = vpow2.f32 %v7896_v47 }
 0x591   :  { %9848 = vpow2.f32 %v7901_v48  ;;  %v2878_v54 = vpop.f32.mrb[28].mxu1 }
 0x592   :  { %v9845_v59 = vpop.eup %9844  ;;  %v8669_v61 = vpop.f32.mrb[29].mxu1  ;;  %v2879_v21 = vadd.f32 %v11095_v57, %v2878_v54 }
 0x593   :  { %v2592_v2 = vadd.f32 1.0, %v9845_v59  ;;  %v3115_v3 = vpop.f32.mrb[32].mxu0 }
 0x594   :  { %v8702_v5 = vpop.f32.mrb[33].mxu0  ;;  %v3116_v26 = vadd.f32 %v11015_v28, %v3115_v3 }
 0x595   :  { %9850 = vrcp.f32 %v2592_v2 }
 0x599   :  { %v3025_v7 = vpop.f32.mrb[30].mxu1 }
 0x59a   :  { %v9847_v53 = vpop.eup %9846  ;;  %v3040_v14 = vadd.f32 %v3039_v10, %v3025_v7  ;;  %v8691_v11 = vpop.f32.mrb[31].mxu1 }
 0x59b   :  { %v9849_v16 = vpop.eup %9848  ;;  %v2739_v17 = vadd.f32 1.0, %v9847_v53 }
 0x59c   :  { %v3035_v18 = vadd.f32 1.0, %v9849_v16  ;;  %v7902_v34 = vmul.f32 -1.442695, %v3040_v14 }
 0x59e   :  { %9852 = vrcp.f32 %v3035_v18 }
 0x59f   :  { %v9851_v22 = vpop.eup %9850  ;;  %9854 = vpow2.f32 %v7902_v34 }
 0x5a0   :  { %9856 = vrcp.f32 %v2739_v17  ;;  %v2882_v24 = vmul.f32 %v9851_v22, %v2879_v21 }
 0x5a2   :  { %v2883_v25 = vadd.f32 %v2882_v24, %v2809_v23 }
 0x5a4   :  { %9858 = vtanh.f32 %v2883_v25  ;;  %v3714_v25 = vld [vmem:[#allocation3 + $0x8] sm:$0x3] }
 0x5a8   :  { %v9853_v30 = vpop.eup %9852 }
 0x5a9   :  { %v9855_v31 = vpop.eup %9854  ;;  %v3119_v32 = vmul.f32 %v9853_v30, %v3116_v26 }
 0x5aa   :  { %v9857_v33 = vpop.eup %9856  ;;  %v3044_v37 = vadd.f32 1.0, %v9855_v31 }
 0x5ab   :  { %v3120_v38 = vadd.f32 %v3119_v32, %v3048_v51  ;;  %v2885_v39 = vsub.f32 1.0, %v9857_v33  ;;  %v2887_v27 = vmul.f32 %v9857_v33, %v11188_v13 }
 0x5ac   :  { %9860 = vrcp.f32 %v3044_v37 }
 0x5ad   :  { %9862 = vtanh.f32 %v3120_v38 }
 0x5ae   :  { %v9859_v40 = vpop.eup %9858 }
 0x5af   :  { %v2886_v44 = vmul.f32 %v9859_v40, %v2885_v39 }
 0x5b1   :  { %v11271_v45 = vadd.f32 %v2887_v27, %v2886_v44  ;;  %v3723_v44 = vld [vmem:[#allocation4 + $0x8] sm:$0x3] }
 0x5b3   :  { %8712 = vmatmul.mubr.msk.f32.vlgmr.msra.gmra.mrb[32].mxu1 %vm809_vm4, %v11271_v45 }
 0x5b4   :  { %9371 = vmatpush3.bf16.msra.mxu1 %v10926_v55  ;;  %8733 = vmatprep.mubr.msk.f32.mxu1 %vm10385_vm2, %v10386_v41 }
 0x5b5   :  { %9372 = vmatprep.subr.bf16.mxu1 %v10384_v9 }
 0x5b6   :  { %v9861_v47 = vpop.eup %9860 }
 0x5b7   :  { %v9863_v48 = vpop.eup %9862  ;;  %v3122_v54 = vsub.f32 1.0, %v9861_v47  ;;  %v3124_v13 = vmul.f32 %v9861_v47, %v11205_v20 }
 0x5b8   :  { %9374 = vmatpush3.bf16.msra.mxu1 %v10939_v58 }
 0x5b9   :  { %v3123_v59 = vmul.f32 %v9863_v48, %v3122_v54  ;;  %9381 = vmatprep.subr.bf16.mxu1 %v10384_v9 }
 0x5bb   :  { %v11282_v61 = vadd.f32 %v3124_v13, %v3123_v59  ;;  %8734 = vmatmul.mubr.msk.f32.vlgmr.msra.gmra.mrb[34].mxu1 %vm809_vm4, %v11271_v45 }
 0x5bc   :  { %9383 = vmatpush3.bf16.msra.mxu1 %v10952_v0  ;;  %8755 = vmatprep.mubr.msk.f32.mxu1 %vm10385_vm2, %v10386_v41 }
 0x5bd   :  { %8723 = vmatmul.mubr.msk.f32.vlgmr.msra.gmra.mrb[34].mxu0 %vm809_vm4, %v11282_v61  ;;  %9384 = vmatprep.subr.bf16.mxu1 %v10384_v9 }
 0x5be   :  { %9377 = vmatpush3.bf16.msra.mxu0 %v11018_v50  ;;  %8744 = vmatprep.mubr.msk.f32.mxu0 %vm10385_vm2, %v10386_v41 }
 0x5bf   :  { %9378 = vmatprep.subr.bf16.mxu0 %v10384_v9 }
 0x5c0   :  { %9386 = vmatpush3.bf16.msra.mxu1 %v10968_v6 }
 0x5c1   :  { %9393 = vmatprep.subr.bf16.mxu1 %v10384_v9 }
 0x5c2   :  { %9380 = vmatpush3.bf16.msra.mxu0 %v11028_v56 }
 0x5c3   :  { %8756 = vmatmul.mubr.msk.f32.vlgmr.msra.gmra.mrb[36].mxu1 %vm809_vm4, %v11282_v61  ;;  %9387 = vmatprep.subr.bf16.mxu0 %v10384_v9 }
 0x5c4   :  { %9395 = vmatpush3.bf16.msra.mxu1 %v10863_v29  ;;  %8777 = vmatprep.mubr.msk.f32.mxu1 %vm10385_vm2, %v10386_v41 }
 0x5c5   :  { %8745 = vmatmul.mubr.msk.f32.vlgmr.msra.gmra.mrb[36].mxu0 %vm809_vm4, %v11282_v61  ;;  %9396 = vmatprep.subr.bf16.mxu1 %v10384_v9 }
 0x5c6   :  { %9389 = vmatpush3.bf16.msra.mxu0 %v11038_v60  ;;  %8766 = vmatprep.mubr.msk.f32.mxu0 %vm10385_vm2, %v10386_v41 }
 0x5c7   :  { %9390 = vmatprep.subr.bf16.mxu0 %v10384_v9 }
 0x5c8   :  { %9398 = vmatpush3.bf16.msra.mxu1 %v10875_v35 }
 0x5c9   :  { %9405 = vmatprep.subr.bf16.mxu1 %v10384_v9 }
 0x5ca   :  { %9392 = vmatpush3.bf16.msra.mxu0 %v11048_v1 }
 0x5cb   :  { %8778 = vmatmul.mubr.msk.f32.vlgmr.msra.gmra.mrb[38].mxu1 %vm809_vm4, %v11282_v61  ;;  %9399 = vmatprep.subr.bf16.mxu0 %v10384_v9 }
 0x5cc   :  { %9407 = vmatpush3.bf16.msra.mxu1 %v10889_v43  ;;  %8799 = vmatprep.mubr.msk.f32.mxu1 %vm10385_vm2, %v10386_v41 }
 0x5cd   :  { %8767 = vmatmul.mubr.msk.f32.vlgmr.msra.gmra.mrb[38].mxu0 %vm809_vm4, %v11271_v45  ;;  %9408 = vmatprep.subr.bf16.mxu1 %v10384_v9 }
 0x5ce   :  { %9401 = vmatpush3.bf16.msra.mxu0 %v10877_v36  ;;  %8788 = vmatprep.mubr.msk.f32.mxu0 %vm10385_vm2, %v10386_v41 }
 0x5cf   :  { %9402 = vmatprep.subr.bf16.mxu0 %v10384_v9 }
 0x5d0   :  { %9410 = vmatpush3.bf16.msra.mxu1 %v10898_v46 }
 0x5d1   :  { %9417 = vmatprep.subr.bf16.mxu1 %v10384_v9 }
 0x5d2   :  { %9404 = vmatpush3.bf16.msra.mxu0 %v10887_v42 }
 0x5d3   :  { %8800 = vmatmul.mubr.msk.f32.vlgmr.msra.gmra.mrb[40].mxu1 %vm809_vm4, %v11282_v61  ;;  %9411 = vmatprep.subr.bf16.mxu0 %v10384_v9 }
 0x5d4   :  { %9419 = vmatpush3.bf16.msra.mxu1 %v10949_v62  ;;  %8821 = vmatprep.mubr.msk.f32.mxu1 %vm10385_vm2, %v10386_v41 }
 0x5d5   :  { %8789 = vmatmul.mubr.msk.f32.vlgmr.msra.gmra.mrb[40].mxu0 %vm809_vm4, %v11282_v61  ;;  %9420 = vmatprep.subr.bf16.mxu1 %v10384_v9 }
 0x5d6   :  { %9413 = vmatpush3.bf16.msra.mxu0 %v10912_v49  ;;  %8810 = vmatprep.mubr.msk.f32.mxu0 %vm10385_vm2, %v10386_v41 }
 0x5d7   :  { %9414 = vmatprep.subr.bf16.mxu0 %v10384_v9 }
 0x5d8   :  { %9422 = vmatpush3.bf16.msra.mxu1 %v10966_v4 }
 0x5d9   :  { %9429 = vmatprep.subr.bf16.mxu1 %v10384_v9 }
 0x5da   :  { %9416 = vmatpush3.bf16.msra.mxu0 %v10916_v52 }
 0x5db   :  { %9423 = vmatprep.subr.bf16.mxu0 %v10384_v9 }
 0x686   :  { %v3195_v20 = vpop.f32.mrb[32].mxu1 }
 0x687   :  { %v8713_v2 = vpop.f32.mrb[33].mxu1 }
 0x68e   :  { %v3345_v3 = vpop.f32.mrb[34].mxu1 }
 0x68f   :  { %v8735_v5 = vpop.f32.mrb[35].mxu1 }
 0x690   :  { %v3268_v7 = vpop.f32.mrb[34].mxu0 }
 0x691   :  { %v3269_v10 = vadd.f32 %v3268_v7, %v3195_v20  ;;  %v8724_v53 = vpop.f32.mrb[35].mxu0 }
 0x693   :  { %v3272_v14 = vadd.f32 %v11086_v8, %v3269_v10 }
 0x695   :  { %v7906_v11 = vmul.f32 -1.442695, %v3272_v14 }
 0x696   :  { %v3492_v16 = vpop.f32.mrb[36].mxu1 }
 0x697   :  { %9864 = vpow2.f32 %v7906_v11  ;;  %v8757_v17 = vpop.f32.mrb[37].mxu1  ;;  %v3493_v5 = vadd.f32 %v11100_v63, %v3492_v16 }
 0x698   :  { %v3415_v18 = vpop.f32.mrb[36].mxu0 }
 0x699   :  { %v3416_v34 = vadd.f32 %v3415_v18, %v3345_v3  ;;  %v8746_v21 = vpop.f32.mrb[37].mxu0 }
 0x69a   :  { %v3732_v21 = vld [vmem:[#allocation5 + $0x8] sm:$0x3] }
 0x69b   :  { %v3419_v22 = vadd.f32 %v11092_v19, %v3416_v34 }
 0x69d   :  { %v7909_v23 = vmul.f32 -1.442695, %v3419_v22 }
 0x69e   :  { %v3639_v24 = vpop.f32.mrb[38].mxu1 }
 0x69f   :  { %9866 = vpow2.f32 %v7909_v23  ;;  %v3715_v26 = vadd.f32 %v3714_v25, %v3639_v24  ;;  %v8779_v30 = vpop.f32.mrb[39].mxu1 }
 0x6a0   :  { %v3562_v31 = vpop.f32.mrb[38].mxu0 }
 0x6a1   :  { %v9865_v32 = vpop.eup %9864  ;;  %v7914_v33 = vmul.f32 -1.442695, %v3715_v26  ;;  %v8768_v51 = vpop.f32.mrb[39].mxu0  ;;  %v3563_v20 = vadd.f32 %v11095_v57, %v3562_v31 }
 0x6a2   :  { %v3276_v37 = vadd.f32 1.0, %v9865_v32 }
 0x6a3   :  { %9868 = vpow2.f32 %v7914_v33 }
 0x6a4   :  { %9870 = vrcp.f32 %v3276_v37 }
 0x6a6   :  { %v3799_v38 = vpop.f32.mrb[40].mxu1 }
 0x6a7   :  { %v8801_v39 = vpop.f32.mrb[41].mxu1  ;;  %v3800_v17 = vadd.f32 %v11015_v28, %v3799_v38 }
 0x6a8   :  { %v3709_v40 = vpop.f32.mrb[40].mxu0 }
 0x6a9   :  { %v9867_v27 = vpop.eup %9866  ;;  %v3724_v47 = vadd.f32 %v3723_v44, %v3709_v40  ;;  %v8790_v48 = vpop.f32.mrb[41].mxu0 }
 0x6aa   :  { %v3423_v54 = vadd.f32 1.0, %v9867_v27 }
 0x6ab   :  { %v7915_v59 = vmul.f32 -1.442695, %v3724_v47 }
 0x6ad   :  { %v9869_v13 = vpop.eup %9868  ;;  %9872 = vpow2.f32 %v7915_v59 }
 0x6ae   :  { %v9871_v2 = vpop.eup %9870  ;;  %v3719_v3 = vadd.f32 1.0, %v9869_v13  ;;  %9874 = vrcp.f32 %v3423_v54 }
 0x6af   :  { %v3566_v7 = vmul.f32 %v9871_v2, %v3563_v20 }
 0x6b0   :  { %9876 = vrcp.f32 %v3719_v3 }
 0x6b1   :  { %v3567_v10 = vadd.f32 %v3566_v7, %v3493_v5  ;;  %v4398_v5 = vld [vmem:[#allocation3 + $0xa] sm:$0x3] }
 0x6b3   :  { %9878 = vtanh.f32 %v3567_v10 }
 0x6b7   :  { %v9873_v53 = vpop.eup %9872 }
 0x6b8   :  { %v3728_v14 = vadd.f32 1.0, %v9873_v53  ;;  %v9875_v11 = vpop.eup %9874 }
 0x6b9   :  { %v3569_v22 = vsub.f32 1.0, %v9875_v11  ;;  %v3571_v26 = vmul.f32 %v9875_v11, %v11271_v45 }
 0x6ba   :  { %v9877_v18 = vpop.eup %9876  ;;  %9880 = vrcp.f32 %v3728_v14 }
 0x6bb   :  { %v3803_v34 = vmul.f32 %v9877_v18, %v3800_v17 }
 0x6bd   :  { %v9879_v23 = vpop.eup %9878  ;;  %v3804_v24 = vadd.f32 %v3803_v34, %v3732_v21 }
 0x6be   :  { %v3570_v25 = vmul.f32 %v9879_v23, %v3569_v22  ;;  %v4407_v23 = vld [vmem:[#allocation4 + $0xa] sm:$0x3] }
 0x6bf   :  { %9882 = vtanh.f32 %v3804_v24 }
 0x6c0   :  { %v11354_v16 = vadd.f32 %v3571_v26, %v3570_v25 }
 0x6c2   :  { %8811 = vmatmul.mubr.msk.f32.vlgmr.msra.gmra.mrb[42].mxu0 %vm809_vm4, %v11354_v16 }
 0x6c3   :  { %9425 = vmatpush3.bf16.msra.mxu0 %v10926_v55  ;;  %8832 = vmatprep.mubr.msk.f32.mxu0 %vm10385_vm2, %v10386_v41 }
 0x6c4   :  { %9426 = vmatprep.subr.bf16.mxu0 %v10384_v9  ;;  %v9881_v28 = vpop.eup %9880 }
 0x6c5   :  { %v3806_v30 = vsub.f32 1.0, %v9881_v28  ;;  %v3808_v31 = vmul.f32 %v9881_v28, %v11282_v61 }
 0x6c7   :  { %9428 = vmatpush3.bf16.msra.mxu0 %v10939_v58 }
 0x6c8   :  { %9435 = vmatprep.subr.bf16.mxu0 %v10384_v9 }
 0x6c9   :  { %v9883_v45 = vpop.eup %9882 }
 0x6ca   :  { %v3807_v32 = vmul.f32 %v9883_v45, %v3806_v30  ;;  %8833 = vmatmul.mubr.msk.f32.vlgmr.msra.gmra.mrb[44].mxu0 %vm809_vm4, %v11354_v16 }
 0x6cb   :  { %9437 = vmatpush3.bf16.msra.mxu0 %v10952_v0  ;;  %8854 = vmatprep.mubr.msk.f32.mxu0 %vm10385_vm2, %v10386_v41 }
 0x6cc   :  { %v11370_v33 = vadd.f32 %v3808_v31, %v3807_v32  ;;  %9438 = vmatprep.subr.bf16.mxu0 %v10384_v9 }
 0x6ce   :  { %8822 = vmatmul.mubr.msk.f32.vlgmr.msra.gmra.mrb[42].mxu1 %vm809_vm4, %v11370_v33 }
 0x6cf   :  { %9440 = vmatpush3.bf16.msra.mxu0 %v10968_v6  ;;  %9431 = vmatpush3.bf16.msra.mxu1 %v11018_v50 }
 0x6d0   :  { %9447 = vmatprep.subr.bf16.mxu0 %v10384_v9  ;;  %9432 = vmatprep.subr.bf16.mxu1 %v10384_v9 }
 0x6d1   :  { %8843 = vmatprep.mubr.msk.f32.mxu1 %vm10385_vm2, %v10386_v41 }
 0x6d2   :  { %8855 = vmatmul.mubr.msk.f32.vlgmr.msra.gmra.mrb[46].mxu0 %vm809_vm4, %v11370_v33 }
 0x6d3   :  { %9449 = vmatpush3.bf16.msra.mxu0 %v10863_v29  ;;  %9434 = vmatpush3.bf16.msra.mxu1 %v11028_v56 }
 0x6d4   :  { %9450 = vmatprep.subr.bf16.mxu0 %v10384_v9  ;;  %9441 = vmatprep.subr.bf16.mxu1 %v10384_v9 }
 0x6d5   :  { %8876 = vmatprep.mubr.msk.f32.mxu0 %vm10385_vm2, %v10386_v41 }
 0x6d6   :  { %8844 = vmatmul.mubr.msk.f32.vlgmr.msra.gmra.mrb[44].mxu1 %vm809_vm4, %v11370_v33 }
 0x6d7   :  { %9452 = vmatpush3.bf16.msra.mxu0 %v10875_v35  ;;  %9443 = vmatpush3.bf16.msra.mxu1 %v11038_v60 }
 0x6d8   :  { %9459 = vmatprep.subr.bf16.mxu0 %v10384_v9  ;;  %9444 = vmatprep.subr.bf16.mxu1 %v10384_v9 }
 0x6d9   :  { %8865 = vmatprep.mubr.msk.f32.mxu1 %vm10385_vm2, %v10386_v41 }
 0x6da   :  { %8877 = vmatmul.mubr.msk.f32.vlgmr.msra.gmra.mrb[48].mxu0 %vm809_vm4, %v11370_v33 }
 0x6db   :  { %9461 = vmatpush3.bf16.msra.mxu0 %v10889_v43  ;;  %9446 = vmatpush3.bf16.msra.mxu1 %v11048_v1 }
 0x6dc   :  { %9462 = vmatprep.subr.bf16.mxu0 %v10384_v9  ;;  %9453 = vmatprep.subr.bf16.mxu1 %v10384_v9 }
 0x6dd   :  { %8898 = vmatprep.mubr.msk.f32.mxu0 %vm10385_vm2, %v10386_v41 }
 0x6de   :  { %8866 = vmatmul.mubr.msk.f32.vlgmr.msra.gmra.mrb[46].mxu1 %vm809_vm4, %v11354_v16 }
 0x6df   :  { %9464 = vmatpush3.bf16.msra.mxu0 %v10898_v46  ;;  %9455 = vmatpush3.bf16.msra.mxu1 %v10877_v36 }
 0x6e0   :  { %9456 = vmatprep.subr.bf16.mxu1 %v10384_v9  ;;  %8887 = vmatprep.mubr.msk.f32.mxu1 %vm10385_vm2, %v10386_v41 }
 0x6e1   :  { %9471 = vmatprep.subr.bf16.mxu0 %v10384_v9 }
 0x6e2   :  { %8899 = vmatmul.mubr.msk.f32.vlgmr.msra.gmra.mrb[50].mxu0 %vm809_vm4, %v11370_v33 }
 0x6e3   :  { %9458 = vmatpush3.bf16.msra.mxu1 %v10887_v42  ;;  %9473 = vmatpush3.bf16.msra.mxu0 %v10949_v62 }
 0x6e4   :  { %9465 = vmatprep.subr.bf16.mxu1 %v10384_v9  ;;  %9474 = vmatprep.subr.bf16.mxu0 %v10384_v9 }
 0x6e5   :  { %8920 = vmatprep.mubr.msk.f32.mxu0 %vm10385_vm2, %v10386_v41 }
 0x6e6   :  { %8888 = vmatmul.mubr.msk.f32.vlgmr.msra.gmra.mrb[48].mxu1 %vm809_vm4, %v11370_v33 }
 0x6e7   :  { %9467 = vmatpush3.bf16.msra.mxu1 %v10912_v49  ;;  %8909 = vmatprep.mubr.msk.f32.mxu1 %vm10385_vm2, %v10386_v41 }
 0x6e8   :  { %9468 = vmatprep.subr.bf16.mxu1 %v10384_v9  ;;  %9476 = vmatpush3.bf16.msra.mxu0 %v10966_v4 }
 0x6e9   :  { %9483 = vmatprep.subr.bf16.mxu0 %v10384_v9 }
 0x6eb   :  { %9470 = vmatpush3.bf16.msra.mxu1 %v10916_v52 }
 0x6ec   :  { %9477 = vmatprep.subr.bf16.mxu1 %v10384_v9 }
 0x795   :  { %v3879_v61 = vpop.f32.mrb[42].mxu0 }
 0x796   :  { %v8812_v51 = vpop.f32.mrb[43].mxu0 }
 0x79d   :  { %v4029_v37 = vpop.f32.mrb[44].mxu0 }
 0x79e   :  { %v8834_v38 = vpop.f32.mrb[45].mxu0 }
 0x7a1   :  { %v3952_v39 = vpop.f32.mrb[42].mxu1 }
 0x7a2   :  { %v3953_v40 = vadd.f32 %v3952_v39, %v3879_v61  ;;  %v8823_v44 = vpop.f32.mrb[43].mxu1  ;;  %v11435_v39 = vld [vmem:[#allocation22] ss:$0 sm:$0xff] }
 0x7a4   :  { %v3956_v27 = vadd.f32 %v11086_v8, %v3953_v40 }
 0x7a5   :  { %v4176_v47 = vpop.f32.mrb[46].mxu0 }
 0x7a6   :  { %v7919_v48 = vmul.f32 -1.442695, %v3956_v27  ;;  %v8856_v54 = vpop.f32.mrb[47].mxu0  ;;  %v4177_v61 = vadd.f32 %v11100_v63, %v4176_v47 }
 0x7a8   :  { %9884 = vpow2.f32 %v7919_v48 }
 0x7a9   :  { %v4099_v59 = vpop.f32.mrb[44].mxu1 }
 0x7aa   :  { %v4100_v13 = vadd.f32 %v4099_v59, %v4029_v37  ;;  %v8845_v20 = vpop.f32.mrb[45].mxu1  ;;  %v4416_v59 = vld [vmem:[#allocation5 + $0xa] sm:$0x3] }
 0x7ac   :  { %v4103_v2 = vadd.f32 %v11092_v19, %v4100_v13 }
 0x7ad   :  { %v4323_v3 = vpop.f32.mrb[48].mxu0 }
 0x7ae   :  { %v7922_v7 = vmul.f32 -1.442695, %v4103_v2  ;;  %v4399_v10 = vadd.f32 %v4398_v5, %v4323_v3  ;;  %v8878_v53 = vpop.f32.mrb[49].mxu0 }
 0x7b0   :  { %9886 = vpow2.f32 %v7922_v7  ;;  %v7927_v14 = vmul.f32 -1.442695, %v4399_v10 }
 0x7b1   :  { %v4246_v11 = vpop.f32.mrb[46].mxu1 }
 0x7b2   :  { %v9885_v17 = vpop.eup %9884  ;;  %9888 = vpow2.f32 %v7927_v14  ;;  %v8867_v8 = vpop.f32.mrb[47].mxu1  ;;  %v4247_v31 = vadd.f32 %v11095_v57, %v4246_v11 }
 0x7b3   :  { %v3960_v18 = vadd.f32 1.0, %v9885_v17 }
 0x7b5   :  { %9890 = vrcp.f32 %v3960_v18  ;;  %v4483_v34 = vpop.f32.mrb[50].mxu0 }
 0x7b6   :  { %v8900_v21 = vpop.f32.mrb[51].mxu0  ;;  %v4484_v40 = vadd.f32 %v11435_v39, %v4483_v34 }
 0x7b7   :  { %v11519_v21 = vld [vmem:[%s11780_s18] ss:$0 sm:$0xff] }
 0x7b9   :  { %v4393_v22 = vpop.f32.mrb[48].mxu1 }
 0x7ba   :  { %v9887_v24 = vpop.eup %9886  ;;  %v4408_v25 = vadd.f32 %v4407_v23, %v4393_v22  ;;  %v8889_v19 = vpop.f32.mrb[49].mxu1 }
 0x7bb   :  { %v4107_v28 = vadd.f32 1.0, %v9887_v24 }
 0x7bc   :  { %v9889_v26 = vpop.eup %9888  ;;  %v7928_v30 = vmul.f32 -1.442695, %v4408_v25 }
 0x7bd   :  { %v4403_v45 = vadd.f32 1.0, %v9889_v26 }
 0x7be   :  { %9892 = vpow2.f32 %v7928_v30  ;;  %v11525_v30 = vld [vmem:[%s11781_s19] ss:$0 sm:$0xff] }
 0x7bf   :  { %v9891_v32 = vpop.eup %9890  ;;  %9894 = vrcp.f32 %v4403_v45 }
 0x7c0   :  { %9896 = vrcp.f32 %v4107_v28  ;;  %v4250_v51 = vmul.f32 %v9891_v32, %v4247_v31 }
 0x7c2   :  { %v4251_v37 = vadd.f32 %v4250_v51, %v4177_v61  ;;  %v5082_v61 = vld [vmem:[#allocation3 + $0xc] sm:$0x3] }
 0x7c4   :  { %9898 = vtanh.f32 %v4251_v37 }
 0x7c8   :  { %v9893_v38 = vpop.eup %9892 }
 0x7c9   :  { %v9895_v44 = vpop.eup %9894  ;;  %v4412_v27 = vadd.f32 1.0, %v9893_v38 }
 0x7ca   :  { %v9897_v48 = vpop.eup %9896  ;;  %v4487_v54 = vmul.f32 %v9895_v44, %v4484_v40 }
 0x7cb   :  { %9900 = vrcp.f32 %v4412_v27  ;;  %v4253_v13 = vsub.f32 1.0, %v9897_v48  ;;  %v4255_v47 = vmul.f32 %v9897_v48, %v11354_v16 }
 0x7cc   :  { %v4488_v57 = vadd.f32 %v4487_v54, %v4416_v59 }
 0x7ce   :  { %v9899_v20 = vpop.eup %9898  ;;  %9902 = vtanh.f32 %v4488_v57 }
 0x7cf   :  { %v4254_v63 = vmul.f32 %v9899_v20, %v4253_v13  ;;  %v5091_v13 = vld [vmem:[#allocation4 + $0xc] sm:$0x3] }
 0x7d1   :  { %v11439_v2 = vadd.f32 %v4255_v47, %v4254_v63 }
 0x7d3   :  { %8910 = vmatmul.mubr.msk.f32.vlgmr.msra.gmra.mrb[50].mxu1 %vm809_vm4, %v11439_v2 }
 0x7d4   :  { %9479 = vmatpush3.bf16.msra.mxu1 %v10926_v55  ;;  %8931 = vmatprep.mubr.msk.f32.mxu1 %vm10385_vm2, %v10386_v41 }
 0x7d5   :  { %v9901_v3 = vpop.eup %9900  ;;  %9480 = vmatprep.subr.bf16.mxu1 %v10384_v9 }
 0x7d6   :  { %v4490_v5 = vsub.f32 1.0, %v9901_v3  ;;  %v4492_v16 = vmul.f32 %v9901_v3, %v11370_v33 }
 0x7d8   :  { %v9903_v7 = vpop.eup %9902  ;;  %9482 = vmatpush3.bf16.msra.mxu1 %v10939_v58 }
 0x7d9   :  { %v4491_v10 = vmul.f32 %v9903_v7, %v4490_v5  ;;  %9489 = vmatprep.subr.bf16.mxu1 %v10384_v9 }
 0x7db   :  { %v11450_v53 = vadd.f32 %v4492_v16, %v4491_v10  ;;  %8932 = vmatmul.mubr.msk.f32.vlgmr.msra.gmra.mrb[52].mxu1 %vm809_vm4, %v11439_v2  ;;  %v11528_v10 = vld [vmem:[#allocation29] ss:$0 sm:$0xff] }
 0x7dc   :  { %9491 = vmatpush3.bf16.msra.mxu1 %v10952_v0  ;;  %8953 = vmatprep.mubr.msk.f32.mxu1 %vm10385_vm2, %v10386_v41 }
 0x7dd   :  { %8921 = vmatmul.mubr.msk.f32.vlgmr.msra.gmra.mrb[52].mxu0 %vm809_vm4, %v11450_v53  ;;  %9492 = vmatprep.subr.bf16.mxu1 %v10384_v9 }
 0x7de   :  { %9485 = vmatpush3.bf16.msra.mxu0 %v11018_v50  ;;  %8942 = vmatprep.mubr.msk.f32.mxu0 %vm10385_vm2, %v10386_v41 }
 0x7df   :  { %9486 = vmatprep.subr.bf16.mxu0 %v10384_v9 }
 0x7e0   :  { %9494 = vmatpush3.bf16.msra.mxu1 %v10968_v6 }
 0x7e1   :  { %9501 = vmatprep.subr.bf16.mxu1 %v10384_v9 }
 0x7e2   :  { %9488 = vmatpush3.bf16.msra.mxu0 %v11028_v56 }
 0x7e3   :  { %8954 = vmatmul.mubr.msk.f32.vlgmr.msra.gmra.mrb[54].mxu1 %vm809_vm4, %v11450_v53  ;;  %9495 = vmatprep.subr.bf16.mxu0 %v10384_v9 }
 0x7e4   :  { %9503 = vmatpush3.bf16.msra.mxu1 %v10863_v29  ;;  %8975 = vmatprep.mubr.msk.f32.mxu1 %vm10385_vm2, %v10386_v41 }
 0x7e5   :  { %8943 = vmatmul.mubr.msk.f32.vlgmr.msra.gmra.mrb[54].mxu0 %vm809_vm4, %v11450_v53  ;;  %9504 = vmatprep.subr.bf16.mxu1 %v10384_v9 }
 0x7e6   :  { %9497 = vmatpush3.bf16.msra.mxu0 %v11038_v60  ;;  %8964 = vmatprep.mubr.msk.f32.mxu0 %vm10385_vm2, %v10386_v41 }
 0x7e7   :  { %9498 = vmatprep.subr.bf16.mxu0 %v10384_v9 }
 0x7e8   :  { %9506 = vmatpush3.bf16.msra.mxu1 %v10875_v35 }
 0x7e9   :  { %9513 = vmatprep.subr.bf16.mxu1 %v10384_v9 }
 0x7ea   :  { %9500 = vmatpush3.bf16.msra.mxu0 %v11048_v1 }
 0x7eb   :  { %8976 = vmatmul.mubr.msk.f32.vlgmr.msra.gmra.mrb[56].mxu1 %vm809_vm4, %v11450_v53  ;;  %9507 = vmatprep.subr.bf16.mxu0 %v10384_v9 }
 0x7ec   :  { %9515 = vmatpush3.bf16.msra.mxu1 %v10889_v43  ;;  %8997 = vmatprep.mubr.msk.f32.mxu1 %vm10385_vm2, %v10386_v41 }
 0x7ed   :  { %8965 = vmatmul.mubr.msk.f32.vlgmr.msra.gmra.mrb[56].mxu0 %vm809_vm4, %v11439_v2  ;;  %9516 = vmatprep.subr.bf16.mxu1 %v10384_v9 }
 0x7ee   :  { %9509 = vmatpush3.bf16.msra.mxu0 %v10877_v36  ;;  %8986 = vmatprep.mubr.msk.f32.mxu0 %vm10385_vm2, %v10386_v41 }
 0x7ef   :  { %9510 = vmatprep.subr.bf16.mxu0 %v10384_v9 }
 0x7f0   :  { %9518 = vmatpush3.bf16.msra.mxu1 %v10898_v46 }
 0x7f1   :  { %9525 = vmatprep.subr.bf16.mxu1 %v10384_v9 }
 0x7f2   :  { %9512 = vmatpush3.bf16.msra.mxu0 %v10887_v42 }
 0x7f3   :  { %8998 = vmatmul.mubr.msk.f32.vlgmr.msra.gmra.mrb[58].mxu1 %vm809_vm4, %v11450_v53  ;;  %9519 = vmatprep.subr.bf16.mxu0 %v10384_v9 }
 0x7f4   :  { %9527 = vmatpush3.bf16.msra.mxu1 %v10949_v62  ;;  %9019 = vmatprep.mubr.msk.f32.mxu1 %vm10385_vm2, %v10386_v41 }
 0x7f5   :  { %8987 = vmatmul.mubr.msk.f32.vlgmr.msra.gmra.mrb[58].mxu0 %vm809_vm4, %v11450_v53  ;;  %9528 = vmatprep.subr.bf16.mxu1 %v10384_v9 }
 0x7f6   :  { %9521 = vmatpush3.bf16.msra.mxu0 %v10912_v49  ;;  %9008 = vmatprep.mubr.msk.f32.mxu0 %vm10385_vm2, %v10386_v41 }
 0x7f7   :  { %9522 = vmatprep.subr.bf16.mxu0 %v10384_v9 }
 0x7f8   :  { %9530 = vmatpush3.bf16.msra.mxu1 %v10966_v4 }
 0x7f9   :  { %9537 = vmatprep.subr.bf16.mxu1 %v10384_v9 }
 0x7fa   :  { %9524 = vmatpush3.bf16.msra.mxu0 %v10916_v52 }
 0x7fb   :  { %9531 = vmatprep.subr.bf16.mxu0 %v10384_v9 }
 0x8a6   :  { %v4563_v33 = vpop.f32.mrb[50].mxu1 }
 0x8a7   :  { %v8911_v14 = vpop.f32.mrb[51].mxu1 }
 0x8ae   :  { %v4713_v11 = vpop.f32.mrb[52].mxu1 }
 0x8af   :  { %v8933_v17 = vpop.f32.mrb[53].mxu1 }
 0x8b0   :  { %v4636_v8 = vpop.f32.mrb[52].mxu0 }
 0x8b1   :  { %v4637_v18 = vadd.f32 %v4636_v8, %v4563_v33  ;;  %v8922_v34 = vpop.f32.mrb[53].mxu0 }
 0x8b3   :  { %v4640_v22 = vadd.f32 %v11519_v21, %v4637_v18 }
 0x8b5   :  { %v7932_v23 = vmul.f32 -1.442695, %v4640_v22 }
 0x8b6   :  { %v4860_v24 = vpop.f32.mrb[54].mxu1 }
 0x8b7   :  { %9904 = vpow2.f32 %v7932_v23  ;;  %v8955_v25 = vpop.f32.mrb[55].mxu1 }
 0x8b8   :  { %v4783_v19 = vpop.f32.mrb[54].mxu0 }
 0x8b9   :  { %v4784_v26 = vadd.f32 %v4783_v19, %v4713_v11  ;;  %v8944_v28 = vpop.f32.mrb[55].mxu0  ;;  %v11534_v11 = vld [vmem:[%s11782_s20] ss:$0 sm:$0xff] }
 0x8ba   :  { %v4861_v17 = vadd.f32 %v11534_v11, %v4860_v24  ;;  %v5100_v28 = vld [vmem:[#allocation5 + $0xc] sm:$0x3] }
 0x8bb   :  { %v4787_v45 = vadd.f32 %v11525_v30, %v4784_v26 }
 0x8bd   :  { %v7935_v31 = vmul.f32 -1.442695, %v4787_v45 }
 0x8be   :  { %v5007_v32 = vpop.f32.mrb[56].mxu1 }
 0x8bf   :  { %9906 = vpow2.f32 %v7935_v31  ;;  %v5083_v51 = vadd.f32 %v5082_v61, %v5007_v32  ;;  %v8977_v37 = vpop.f32.mrb[57].mxu1 }
 0x8c0   :  { %v4930_v38 = vpop.f32.mrb[56].mxu0 }
 0x8c1   :  { %v9905_v40 = vpop.eup %9904  ;;  %v7940_v44 = vmul.f32 -1.442695, %v5083_v51  ;;  %v8966_v27 = vpop.f32.mrb[57].mxu0  ;;  %v4931_v16 = vadd.f32 %v11528_v10, %v4930_v38 }
 0x8c2   :  { %v4644_v48 = vadd.f32 1.0, %v9905_v40 }
 0x8c3   :  { %9908 = vpow2.f32 %v7940_v44 }
 0x8c4   :  { %9910 = vrcp.f32 %v4644_v48 }
 0x8c6   :  { %v5167_v54 = vpop.f32.mrb[58].mxu1 }
 0x8c7   :  { %v8999_v59 = vpop.f32.mrb[59].mxu1  ;;  %v5168_v25 = vadd.f32 %v11435_v39, %v5167_v54 }
 0x8c8   :  { %v5077_v57 = vpop.f32.mrb[58].mxu0 }
 0x8c9   :  { %v9907_v20 = vpop.eup %9906  ;;  %v5092_v63 = vadd.f32 %v5091_v13, %v5077_v57  ;;  %v8988_v47 = vpop.f32.mrb[59].mxu0 }
 0x8ca   :  { %v4791_v3 = vadd.f32 1.0, %v9907_v20  ;;  %v5766_v20 = vld [vmem:[#allocation3 + $0xe] sm:$0x3] }
 0x8cb   :  { %v7941_v5 = vmul.f32 -1.442695, %v5092_v63 }
 0x8cd   :  { %v9909_v7 = vpop.eup %9908  ;;  %9912 = vpow2.f32 %v7941_v5 }
 0x8ce   :  { %v9911_v33 = vpop.eup %9910  ;;  %v5087_v14 = vadd.f32 1.0, %v9909_v7  ;;  %9914 = vrcp.f32 %v4791_v3 }
 0x8cf   :  { %v4934_v8 = vmul.f32 %v9911_v33, %v4931_v16 }
 0x8d0   :  { %9916 = vrcp.f32 %v5087_v14 }
 0x8d1   :  { %v4935_v18 = vadd.f32 %v4934_v8, %v4861_v17 }
 0x8d3   :  { %9918 = vtanh.f32 %v4935_v18 }
 0x8d7   :  { %v9913_v34 = vpop.eup %9912 }
 0x8d8   :  { %v5096_v22 = vadd.f32 1.0, %v9913_v34  ;;  %v9915_v23 = vpop.eup %9914  ;;  %v5775_v34 = vld [vmem:[#allocation4 + $0xe] sm:$0x3] }
 0x8d9   :  { %v4937_v45 = vsub.f32 1.0, %v9915_v23  ;;  %v4939_v51 = vmul.f32 %v9915_v23, %v11439_v2 }
 0x8da   :  { %v9917_v19 = vpop.eup %9916  ;;  %9920 = vrcp.f32 %v5096_v22 }
 0x8db   :  { %v5171_v26 = vmul.f32 %v9917_v19, %v5168_v25 }
 0x8dd   :  { %v9919_v31 = vpop.eup %9918  ;;  %v5172_v32 = vadd.f32 %v5171_v26, %v5100_v28 }
 0x8de   :  { %v4938_v61 = vmul.f32 %v9919_v31, %v4937_v45 }
 0x8df   :  { %9922 = vtanh.f32 %v5172_v32 }
 0x8e0   :  { %v11539_v24 = vadd.f32 %v4939_v51, %v4938_v61 }
 0x8e2   :  { %9009 = vmatmul.mubr.msk.f32.vlgmr.msra.gmra.mrb[60].mxu0 %vm809_vm4, %v11539_v24 }
 0x8e3   :  { %9533 = vmatpush3.bf16.msra.mxu0 %v10926_v55  ;;  %9030 = vmatprep.mubr.msk.f32.mxu0 %vm10385_vm2, %v10386_v41 }
 0x8e4   :  { %9534 = vmatprep.subr.bf16.mxu0 %v10384_v9  ;;  %v9921_v37 = vpop.eup %9920 }
 0x8e5   :  { %v5174_v38 = vsub.f32 1.0, %v9921_v37  ;;  %v5176_v40 = vmul.f32 %v9921_v37, %v11450_v53 }
 0x8e7   :  { %9536 = vmatpush3.bf16.msra.mxu0 %v10939_v58 }
 0x8e8   :  { %9543 = vmatprep.subr.bf16.mxu0 %v10384_v9 }
 0x8e9   :  { %v9923_v2 = vpop.eup %9922 }
 0x8ea   :  { %v5175_v44 = vmul.f32 %v9923_v2, %v5174_v38  ;;  %9031 = vmatmul.mubr.msk.f32.vlgmr.msra.gmra.mrb[62].mxu0 %vm809_vm4, %v11539_v24 }
 0x8eb   :  { %9545 = vmatpush3.bf16.msra.mxu0 %v10952_v0  ;;  %9052 = vmatprep.mubr.msk.f32.mxu0 %vm10385_vm2, %v10386_v41 }
 0x8ec   :  { %v11555_v27 = vadd.f32 %v5176_v40, %v5175_v44  ;;  %9546 = vmatprep.subr.bf16.mxu0 %v10384_v9 }
 0x8ee   :  { %9020 = vmatmul.mubr.msk.f32.vlgmr.msra.gmra.mrb[60].mxu1 %vm809_vm4, %v11555_v27 }
 0x8ef   :  { %9548 = vmatpush3.bf16.msra.mxu0 %v10968_v6  ;;  %9539 = vmatpush3.bf16.msra.mxu1 %v11018_v50 }
 0x8f0   :  { %9555 = vmatprep.subr.bf16.mxu0 %v10384_v9  ;;  %9540 = vmatprep.subr.bf16.mxu1 %v10384_v9 }
 0x8f1   :  { %9041 = vmatprep.mubr.msk.f32.mxu1 %vm10385_vm2, %v10386_v41 }
 0x8f2   :  { %9053 = vmatmul.mubr.msk.f32.vlgmr.msra.gmra.mrb[64].mxu0 %vm809_vm4, %v11555_v27 }
 0x8f3   :  { %9557 = vmatpush3.bf16.msra.mxu0 %v10863_v29  ;;  %9542 = vmatpush3.bf16.msra.mxu1 %v11028_v56 }
 0x8f4   :  { %9558 = vmatprep.subr.bf16.mxu0 %v10384_v9  ;;  %9549 = vmatprep.subr.bf16.mxu1 %v10384_v9 }
 0x8f5   :  { %9074 = vmatprep.mubr.msk.f32.mxu0 %vm10385_vm2, %v10386_v41 }
 0x8f6   :  { %9042 = vmatmul.mubr.msk.f32.vlgmr.msra.gmra.mrb[62].mxu1 %vm809_vm4, %v11555_v27 }
 0x8f7   :  { %9560 = vmatpush3.bf16.msra.mxu0 %v10875_v35  ;;  %9551 = vmatpush3.bf16.msra.mxu1 %v11038_v60 }
 0x8f8   :  { %9567 = vmatprep.subr.bf16.mxu0 %v10384_v9  ;;  %9552 = vmatprep.subr.bf16.mxu1 %v10384_v9 }
 0x8f9   :  { %9063 = vmatprep.mubr.msk.f32.mxu1 %vm10385_vm2, %v10386_v41 }
 0x8fa   :  { %9075 = vmatmul.mubr.msk.f32.vlgmr.msra.gmra.mrb[66].mxu0 %vm809_vm4, %v11555_v27 }
 0x8fb   :  { %9569 = vmatpush3.bf16.msra.mxu0 %v10889_v43  ;;  %9554 = vmatpush3.bf16.msra.mxu1 %v11048_v1 }
 0x8fc   :  { %9570 = vmatprep.subr.bf16.mxu0 %v10384_v9  ;;  %9561 = vmatprep.subr.bf16.mxu1 %v10384_v9 }
 0x8fd   :  { %9096 = vmatprep.mubr.msk.f32.mxu0 %vm10385_vm2, %v10386_v41 }
 0x8fe   :  { %9064 = vmatmul.mubr.msk.f32.vlgmr.msra.gmra.mrb[64].mxu1 %vm809_vm4, %v11539_v24 }
 0x8ff   :  { %9572 = vmatpush3.bf16.msra.mxu0 %v10898_v46  ;;  %9563 = vmatpush3.bf16.msra.mxu1 %v10877_v36 }
 0x900   :  { %9564 = vmatprep.subr.bf16.mxu1 %v10384_v9  ;;  %9085 = vmatprep.mubr.msk.f32.mxu1 %vm10385_vm2, %v10386_v41 }
 0x901   :  { %9579 = vmatprep.subr.bf16.mxu0 %v10384_v9 }
 0x902   :  { %9097 = vmatmul.mubr.msk.f32.vlgmr.msra.gmra.mrb[68].mxu0 %vm809_vm4, %v11555_v27 }
 0x903   :  { %9566 = vmatpush3.bf16.msra.mxu1 %v10887_v42  ;;  %9581 = vmatpush3.bf16.msra.mxu0 %v10949_v62 }
 0x904   :  { %9573 = vmatprep.subr.bf16.mxu1 %v10384_v9  ;;  %9582 = vmatprep.subr.bf16.mxu0 %v10384_v9 }
 0x905   :  { %9118 = vmatprep.mubr.msk.f32.mxu0 %vm10385_vm2, %v10386_v41 }
 0x906   :  { %9086 = vmatmul.mubr.msk.f32.vlgmr.msra.gmra.mrb[66].mxu1 %vm809_vm4, %v11555_v27 }
 0x907   :  { %9575 = vmatpush3.bf16.msra.mxu1 %v10912_v49  ;;  %9107 = vmatprep.mubr.msk.f32.mxu1 %vm10385_vm2, %v10386_v41 }
 0x908   :  { %9576 = vmatprep.subr.bf16.mxu1 %v10384_v9  ;;  %9584 = vmatpush3.bf16.msra.mxu0 %v10966_v4 }
 0x909   :  { %9591 = vmatprep.subr.bf16.mxu0 %v10384_v9 }
 0x90b   :  { %9578 = vmatpush3.bf16.msra.mxu1 %v10916_v52 }
 0x90c   :  { %9585 = vmatprep.subr.bf16.mxu1 %v10384_v9 }
 0x9b5   :  { %v5247_v29 = vpop.f32.mrb[60].mxu0 }
 0x9b6   :  { %v9010_v35 = vpop.f32.mrb[61].mxu0 }
 0x9bd   :  { %v5397_v36 = vpop.f32.mrb[62].mxu0 }
 0x9be   :  { %v9032_v42 = vpop.f32.mrb[63].mxu0 }
 0x9c1   :  { %v5320_v43 = vpop.f32.mrb[60].mxu1 }
 0x9c2   :  { %v5321_v46 = vadd.f32 %v5320_v43, %v5247_v29  ;;  %v9021_v49 = vpop.f32.mrb[61].mxu1 }
 0x9c4   :  { %v5324_v62 = vadd.f32 %v11519_v21, %v5321_v46 }
 0x9c5   :  { %v5544_v53 = vpop.f32.mrb[64].mxu0 }
 0x9c6   :  { %v7945_v48 = vmul.f32 -1.442695, %v5324_v62  ;;  %v9054_v54 = vpop.f32.mrb[65].mxu0  ;;  %v5545_v61 = vadd.f32 %v11534_v11, %v5544_v53 }
 0x9c8   :  { %9924 = vpow2.f32 %v7945_v48 }
 0x9c9   :  { %v5467_v4 = vpop.f32.mrb[62].mxu1 }
 0x9ca   :  { %v5468_v59 = vadd.f32 %v5467_v4, %v5397_v36  ;;  %v9043_v57 = vpop.f32.mrb[63].mxu1  ;;  %v5784_v36 = vld [vmem:[#allocation5 + $0xe] sm:$0x3] }
 0x9cb   :  { %v6328_v57 = vld [vmem:[#allocation31 + $0x88] sm:$0xff] }
 0x9cc   :  { %v5471_v52 = vadd.f32 %v11525_v30, %v5468_v59  ;;  %v6312_v59 = vld [vmem:[#allocation31 + $0x8] sm:$0xff] }
 0x9cd   :  { %v5691_v13 = vpop.f32.mrb[66].mxu0 }
 0x9ce   :  { %v7948_v63 = vmul.f32 -1.442695, %v5471_v52  ;;  %v5767_v47 = vadd.f32 %v5766_v20, %v5691_v13  ;;  %v9076_v3 = vpop.f32.mrb[67].mxu0  ;;  %v6344_v13 = vld [vmem:[#allocation31 + $0x108] sm:$0xff] }
 0x9cf   :  { %v6360_v20 = vld [vmem:[#allocation31 + $0x188] sm:$0xff]  ;;  %v6359_v3 = vld [vmem:[#allocation31 + $0x180] sm:$0xff] }
 0x9d0   :  { %9926 = vpow2.f32 %v7948_v63  ;;  %v7953_v5 = vmul.f32 -1.442695, %v5767_v47  ;;  %v9613_v63 = vpack.c.bf16 %v6360_v20, %v6344_v13  ;;  %v6343_v47 = vld [vmem:[#allocation31 + $0x100] sm:$0xff]  ;;  %v6322_v20 = vld [vmem:[#allocation31 + $0x58] sm:$0xff] }
 0x9d1   :  { %v5614_v7 = vpop.f32.mrb[64].mxu1 }
 0x9d2   :  { %v9925_v16 = vpop.eup %9924  ;;  %9928 = vpow2.f32 %v7953_v5  ;;  %v9065_v33 = vpop.f32.mrb[65].mxu1  ;;  %v5615_v31 = vadd.f32 %v11528_v10, %v5614_v7  ;;  %v6316_v5 = vld [vmem:[#allocation31 + $0x28] sm:$0xff] }
 0x9d3   :  { %v5328_v14 = vadd.f32 1.0, %v9925_v16  ;;  %v6332_v7 = vld [vmem:[#allocation31 + $0xa8] sm:$0xff]  ;;  %v6314_v16 = vld [vmem:[#allocation31 + $0x18] sm:$0xff] }
 0x9d4   :  { %v9625_v33 = vpack.c.bf16 %v6332_v7, %v6316_v5  ;;  %v6356_v7 = vld [vmem:[#allocation31 + $0x168] sm:$0xff] }
 0x9d5   :  { %9930 = vrcp.f32 %v5328_v14  ;;  %v5851_v17 = vpop.f32.mrb[68].mxu0  ;;  %v6315_v14 = vld [vmem:[#allocation31 + $0x20] sm:$0xff] }
 0x9d6   :  { %v9098_v8 = vpop.f32.mrb[69].mxu0  ;;  %v5852_v2 = vadd.f32 %v11435_v39, %v5851_v17  ;;  %v6348_v17 = vld [vmem:[#allocation31 + $0x128] sm:$0xff] }
 0x9d7   :  { %v6364_v8 = vld [vmem:[#allocation31 + $0x1a8] sm:$0xff] }
 0x9d9   :  { %v5761_v18 = vpop.f32.mrb[66].mxu1 }
 0x9da   :  { %v9927_v22 = vpop.eup %9926  ;;  %v5776_v23 = vadd.f32 %v5775_v34, %v5761_v18  ;;  %v9087_v25 = vpop.f32.mrb[67].mxu1  ;;  %v6313_v34 = vld [vmem:[#allocation31 + $0x10] sm:$0xff] }
 0x9db   :  { %v5475_v26 = vadd.f32 1.0, %v9927_v22  ;;  %v6329_v22 = vld [vmem:[#allocation31 + $0x90] sm:$0xff]  ;;  %v6346_v25 = vld [vmem:[#allocation31 + $0x118] sm:$0xff] }
 0x9dc   :  { %v9929_v19 = vpop.eup %9928  ;;  %v7954_v28 = vmul.f32 -1.442695, %v5776_v23 }
 0x9dd   :  { %v5771_v45 = vadd.f32 1.0, %v9929_v19  ;;  %v6362_v19 = vld [vmem:[#allocation31 + $0x198] sm:$0xff] }
 0x9de   :  { %9932 = vpow2.f32 %v7954_v28  ;;  %v6347_v28 = vld [vmem:[#allocation31 + $0x120] sm:$0xff] }
 0x9df   :  { %v9931_v32 = vpop.eup %9930  ;;  %9934 = vrcp.f32 %v5771_v45  ;;  %v6363_v45 = vld [vmem:[#allocation31 + $0x1a0] sm:$0xff] }
 0x9e0   :  { %9936 = vrcp.f32 %v5475_v26  ;;  %v5618_v51 = vmul.f32 %v9931_v32, %v5615_v31  ;;  %v9629_v26 = vpack.c.bf16 %v6364_v8, %v6348_v17  ;;  %v6320_v31 = vld [vmem:[#allocation31 + $0x48] sm:$0xff]  ;;  %v6370_v17 = vld [vmem:[#allocation31 + $0x1d8] sm:$0xff] }
 0x9e1   :  { %v6336_v32 = vld [vmem:[#allocation31 + $0xc8] sm:$0xff] }
 0x9e2   :  { %v5619_v37 = vadd.f32 %v5618_v51, %v5545_v61  ;;  %v6345_v61 = vld [vmem:[#allocation31 + $0x110] sm:$0xff] }
 0x9e3   :  { %v6361_v51 = vld [vmem:[#allocation31 + $0x190] sm:$0xff] }
 0x9e4   :  { %9938 = vtanh.f32 %v5619_v37  ;;  %v9631_v37 = vpack.c.bf16 %v6363_v45, %v6347_v28  ;;  %v6326_v28 = vld [vmem:[#allocation31 + $0x78] sm:$0xff] }
 0x9e5   :  { %v6342_v45 = vld [vmem:[#allocation31 + $0xf8] sm:$0xff] }
 0x9e8   :  { %v9933_v38 = vpop.eup %9932 }
 0x9e9   :  { %v9935_v40 = vpop.eup %9934  ;;  %v5780_v44 = vadd.f32 1.0, %v9933_v38  ;;  %v6318_v38 = vld [vmem:[#allocation31 + $0x38] sm:$0xff] }
 0x9ea   :  { %v9937_v29 = vpop.eup %9936  ;;  %v5855_v35 = vmul.f32 %v9935_v40, %v5852_v2  ;;  %v6334_v2 = vld [vmem:[#allocation31 + $0xb8] sm:$0xff]  ;;  %v6319_v40 = vld [vmem:[#allocation31 + $0x40] sm:$0xff] }
 0x9eb   :  { %9940 = vrcp.f32 %v5780_v44  ;;  %v5621_v43 = vsub.f32 1.0, %v9937_v29  ;;  %v5623_v62 = vmul.f32 %v9937_v29, %v11539_v24  ;;  %v6335_v44 = vld [vmem:[#allocation31 + $0xc0] sm:$0xff]  ;;  %v9623_v29 = vpack.c.bf16 %v6361_v51, %v6345_v61  ;;  %v6358_v61 = vld [vmem:[#allocation31 + $0x178] sm:$0xff] }
 0x9ec   :  { %v5856_v42 = vadd.f32 %v5855_v35, %v5784_v36  ;;  %v6352_v35 = vld [vmem:[#allocation31 + $0x148] sm:$0xff]  ;;  %v6374_v51 = vld [vmem:[#allocation31 + $0x1f8] sm:$0xff] }
 0x9ed   :  { %v6368_v36 = vld [vmem:[#allocation31 + $0x1c8] sm:$0xff] }
 0x9ee   :  { %v9939_v46 = vpop.eup %9938  ;;  %9942 = vtanh.f32 %v5856_v42  ;;  %v9633_v42 = vpack.c.bf16 %v6334_v2, %v6318_v38  ;;  %v9669_v38 = vpack.c.bf16 %v6374_v51, %v6358_v61  ;;  %v6357_v2 = vld [vmem:[#allocation31 + $0x170] sm:$0xff] }
 0x9ef   :  { %v5622_v49 = vmul.f32 %v9939_v46, %v5621_v43  ;;  %v6317_v43 = vld [vmem:[#allocation31 + $0x30] sm:$0xff] }
 0x9f0   :  { %v6333_v46 = vld [vmem:[#allocation31 + $0xb0] sm:$0xff] }
 0x9f1   :  { %v11622_v53 = vadd.f32 %v5623_v62, %v5622_v49  ;;  %v9643_v49 = vpack.c.bf16 %v6335_v44, %v6319_v40  ;;  %v6350_v62 = vld [vmem:[#allocation31 + $0x138] sm:$0xff]  ;;  %v7042_v44 = vld [vmem:[#allocation31 + $0x208] sm:$0xff] }
 0x9f3   :  { %9108 = vmatmul.mubr.msk.f32.vlgmr.msra.gmra.mrb[68].mxu1 %vm809_vm4, %v11622_v53 }
 0x9f4   :  { %9587 = vmatpush3.bf16.msra.mxu1 %v10926_v55  ;;  %9129 = vmatprep.mubr.msk.f32.mxu1 %vm10385_vm2, %v10386_v41  ;;  %v9609_v55 = vpack.c.bf16 %v6328_v57, %v6312_v59  ;;  %v6324_v59 = vld [vmem:[#allocation31 + $0x68] sm:$0xff] }
 0x9f5   :  { %v9941_v39 = vpop.eup %9940  ;;  %9588 = vmatprep.subr.bf16.mxu1 %v10384_v9  ;;  %v6340_v57 = vld [vmem:[#allocation31 + $0xe8] sm:$0xff] }
 0x9f6   :  { %v5858_v48 = vsub.f32 1.0, %v9941_v39  ;;  %v5860_v24 = vmul.f32 %v9941_v39, %v11555_v27  ;;  %v6327_v27 = vld [vmem:[#allocation31 + $0x80] sm:$0xff]  ;;  %v6366_v39 = vld [vmem:[#allocation31 + $0x1b8] sm:$0xff] }
 0x9f8   :  { %v9943_v54 = vpop.eup %9942  ;;  %9590 = vmatpush3.bf16.msra.mxu1 %v10939_v58  ;;  %v6311_v58 = vld [vmem:[#allocation31] sm:$0xff] }
 0x9f9   :  { %v5859_v4 = vmul.f32 %v9943_v54, %v5858_v48  ;;  %9597 = vmatprep.subr.bf16.mxu1 %v10384_v9  ;;  %v9645_v48 = vpack.c.bf16 %v6368_v36, %v6352_v35  ;;  %v6351_v54 = vld [vmem:[#allocation31 + $0x140] sm:$0xff]  ;;  %v7044_v35 = vld [vmem:[#allocation31 + $0x218] sm:$0xff] }
 0x9fb   :  { %v11633_v52 = vadd.f32 %v5860_v24, %v5859_v4  ;;  %9130 = vmatmul.mubr.msk.f32.vlgmr.msra.gmra.mrb[70].mxu1 %vm809_vm4, %v11622_v53  ;;  %v6367_v4 = vld [vmem:[#allocation31 + $0x1c0] sm:$0xff]  ;;  %v9635_v24 = vpack.c.bf16 %v6333_v46, %v6317_v43 }
 0x9fc   :  { %9599 = vmatpush3.bf16.msra.mxu1 %v10952_v0  ;;  %9151 = vmatprep.mubr.msk.f32.mxu1 %vm10385_vm2, %v10386_v41  ;;  %v9611_v0 = vpack.c.bf16 %v6327_v27, %v6311_v58  ;;  %v6349_v58 = vld [vmem:[#allocation31 + $0x130] sm:$0xff]  ;;  %v9647_v13 = vpack.c.bf16 %v6367_v4, %v6351_v54  ;;  %v7041_v43 = vld [vmem:[#allocation31 + $0x200] sm:$0xff]  ;;  %v7074_v4 = vld [vmem:[#allocation31 + $0x308] sm:$0xff] }
 0x9fd   :  { %9119 = vmatmul.mubr.msk.f32.vlgmr.msra.gmra.mrb[70].mxu0 %vm809_vm4, %v11633_v52  ;;  %9600 = vmatprep.subr.bf16.mxu1 %v10384_v9  ;;  %v6365_v27 = vld [vmem:[#allocation31 + $0x1b0] sm:$0xff]  ;;  %v7057_v46 = vld [vmem:[#allocation31 + $0x280] sm:$0xff] }
 0x9fe   :  { %9593 = vmatpush3.bf16.msra.mxu0 %v11018_v50  ;;  %9140 = vmatprep.mubr.msk.f32.mxu0 %vm10385_vm2, %v10386_v41  ;;  %v9615_v50 = vpack.c.bf16 %v6359_v3, %v6343_v47  ;;  %v6323_v47 = vld [vmem:[#allocation31 + $0x60] sm:$0xff]  ;;  %v9639_v5 = vpack.c.bf16 %v6365_v27, %v6349_v58 }
 0x9ff   :  { %9594 = vmatprep.subr.bf16.mxu0 %v10384_v9  ;;  %v6339_v3 = vld [vmem:[#allocation31 + $0xe0] sm:$0xff] }
 0xa00   :  { %9602 = vmatpush3.bf16.msra.mxu1 %v10968_v6  ;;  %v6330_v6 = vld [vmem:[#allocation31 + $0x98] sm:$0xff]  ;;  %v7089_v58 = vld [vmem:[#allocation31 + $0x380] sm:$0xff] }
 0xa01   :  { %9610 = vmatprep.subr.bf16.mxu1 %v9609_v55  ;;  %v9617_v18 = vpack.c.bf16 %v6330_v6, %v6314_v16  ;;  %v9637_v55 = vpack.c.bf16 %v6366_v39, %v6350_v62  ;;  %v6321_v6 = vld [vmem:[#allocation31 + $0x50] sm:$0xff]  ;;  %v9675_v62 = vpack.c.bf16 %v7057_v46, %v7041_v43  ;;  %v7078_v43 = vld [vmem:[#allocation31 + $0x328] sm:$0xff] }
 0xa02   :  { %9596 = vmatpush3.bf16.msra.mxu0 %v11028_v56  ;;  %v6331_v56 = vld [vmem:[#allocation31 + $0xa0] sm:$0xff]  ;;  %v7043_v39 = vld [vmem:[#allocation31 + $0x210] sm:$0xff] }
 0xa03   :  { %9152 = vmatmul.mubr.msk.f32.vlgmr.msra.gmra.mrb[72].mxu1 %vm809_vm4, %v11633_v52  ;;  %9603 = vmatprep.subr.bf16.mxu0 %v10384_v9  ;;  %v9627_v23 = vpack.c.bf16 %v6331_v56, %v6315_v14  ;;  %v9659_v14 = vpack.c.bf16 %v6339_v3, %v6323_v47  ;;  %v6354_v56 = vld [vmem:[#allocation31 + $0x158] sm:$0xff]  ;;  %v7046_v47 = vld [vmem:[#allocation31 + $0x228] sm:$0xff] }
 0xa04   :  { %9612 = vmatpush1.bf16.msra.mxu1 %v9611_v0  ;;  %6439 = vmatprep.mubr.f32.mxu1 %v10386_v41  ;;  %v6338_v0 = vld [vmem:[#allocation31 + $0xd8] sm:$0xff]  ;;  %v7062_v3 = vld [vmem:[#allocation31 + $0x2a8] sm:$0xff] }
 0xa05   :  { %9141 = vmatmul.mubr.msk.f32.vlgmr.msra.gmra.mrb[72].mxu0 %vm809_vm4, %v11633_v52  ;;  %9614 = vmatprep.subr.bf16.mxu1 %v9613_v63  ;;  %v9657_v63 = vpack.c.bf16 %v6340_v57, %v6324_v59  ;;  %v9649_v16 = vpack.c.bf16 %v6338_v0, %v6322_v20  ;;  %v7092_v57 = vld [vmem:[#allocation31 + $0x398] sm:$0xff]  ;;  %v7075_v20 = vld [vmem:[#allocation31 + $0x310] sm:$0xff] }
 0xa06   :  { %9605 = vmatpush3.bf16.msra.mxu0 %v11038_v60  ;;  %9162 = vmatprep.mubr.msk.f32.mxu0 %vm10385_vm2, %v10386_v41  ;;  %v9619_v60 = vpack.c.bf16 %v6329_v22, %v6313_v34  ;;  %v6371_v34 = vld [vmem:[#allocation31 + $0x1e0] sm:$0xff]  ;;  %v7091_v0 = vld [vmem:[#allocation31 + $0x390] sm:$0xff] }
 0xa07   :  { %9606 = vmatprep.subr.bf16.mxu0 %v10384_v9  ;;  %v9621_v9 = vpack.c.bf16 %v6362_v19, %v6346_v25  ;;  %v6353_v25 = vld [vmem:[#allocation31 + $0x150] sm:$0xff] }
 0xa08   :  { %9616 = vmatpush1.bf16.msra.mxu1 %v9615_v50  ;;  %v6372_v50 = vld [vmem:[#allocation31 + $0x1e8] sm:$0xff]  ;;  %v6369_v19 = vld [vmem:[#allocation31 + $0x1d0] sm:$0xff] }
 0xa09   :  { %9626 = vmatprep.subr.bf16.mxu1 %v9625_v33  ;;  %v6337_v33 = vld [vmem:[#allocation31 + $0xd0] sm:$0xff]  ;;  %v9661_v8 = vpack.c.bf16 %v6372_v50, %v6356_v7  ;;  %v9689_v7 = vpack.c.bf16 %v7062_v3, %v7046_v47  ;;  %v7064_v50 = vld [vmem:[#allocation31 + $0x2b8] sm:$0xff]  ;;  %v7049_v47 = vld [vmem:[#allocation31 + $0x240] sm:$0xff] }
 0xa0a   :  { %9608 = vmatpush3.bf16.msra.mxu0 %v11048_v1  ;;  %v9641_v1 = vpack.c.bf16 %v6336_v32, %v6320_v31  ;;  %v9651_v22 = vpack.c.bf16 %v6337_v33, %v6321_v6  ;;  %v9665_v31 = vpack.c.bf16 %v6342_v45, %v6326_v28  ;;  %v6325_v32 = vld [vmem:[#allocation31 + $0x70] sm:$0xff]  ;;  %v7065_v3 = vld [vmem:[#allocation31 + $0x2c0] sm:$0xff] }
 0xa0b   :  { %7964 = vmatmul.mubr.msk.f32.vlgmr.msra.gmra.mrb[74].mxu1 %vm809_vm4, %v11633_v52  ;;  %9618 = vmatprep.subr.bf16.mxu0 %v9617_v18  ;;  %v6355_v18 = vld [vmem:[#allocation31 + $0x160] sm:$0xff] }
 0xa0c   :  { %9628 = vmatpush1.bf16.msra.mxu1 %v9627_v23  ;;  %6581 = vmatprep.mubr.f32.mxu1 %v10386_v41  ;;  %v9653_v23 = vpack.c.bf16 %v6370_v17, %v6354_v56 }
 0xa0d   :  { %9163 = vmatmul.mubr.msk.f32.vlgmr.msra.gmra.mrb[74].mxu0 %vm809_vm4, %v11622_v53  ;;  %9630 = vmatprep.subr.bf16.mxu1 %v9629_v26  ;;  %v9663_v26 = vpack.c.bf16 %v6371_v34, %v6355_v18 }
 0xa0e   :  { %9620 = vmatpush1.bf16.msra.mxu0 %v9619_v60  ;;  %6510 = vmatprep.mubr.f32.mxu0 %v10386_v41  ;;  %v9655_v60 = vpack.c.bf16 %v6369_v19, %v6353_v25 }
 0xa0f   :  { %9622 = vmatprep.subr.bf16.mxu0 %v9621_v9  ;;  %v6341_v9 = vld [vmem:[#allocation31 + $0xf0] sm:$0xff] }
 0xa10   :  { %9632 = vmatpush1.bf16.msra.mxu1 %v9631_v37  ;;  %v9667_v37 = vpack.c.bf16 %v6341_v9, %v6325_v32 }
 0xa11   :  { %9642 = vmatprep.subr.bf16.mxu1 %v9641_v1  ;;  %v6373_v1 = vld [vmem:[#allocation31 + $0x1f0] sm:$0xff] }
 0xa12   :  { %9624 = vmatpush1.bf16.msra.mxu0 %v9623_v29  ;;  %v9671_v40 = vpack.c.bf16 %v6373_v1, %v6357_v2  ;;  %v7058_v29 = vld [vmem:[#allocation31 + $0x288] sm:$0xff] }
 0xa13   :  { %7966 = vmatmul.mubr.msk.f32.vlgmr.msra.gmra.mrb[76].mxu1 %vm809_vm4, %v11633_v52  ;;  %9634 = vmatprep.subr.bf16.mxu0 %v9633_v42  ;;  %v9673_v36 = vpack.c.bf16 %v7058_v29, %v7042_v44  ;;  %v7060_v42 = vld [vmem:[#allocation31 + $0x298] sm:$0xff]  ;;  %v7061_v29 = vld [vmem:[#allocation31 + $0x2a0] sm:$0xff] }
 0xa14   :  { %9644 = vmatpush1.bf16.msra.mxu1 %v9643_v49  ;;  %6723 = vmatprep.mubr.f32.mxu1 %v10386_v41  ;;  %v9681_v49 = vpack.c.bf16 %v7060_v42, %v7044_v35  ;;  %v7063_v42 = vld [vmem:[#allocation31 + $0x2b0] sm:$0xff] }
 0xa15   :  { %7965 = vmatmul.mubr.msk.f32.vlgmr.msra.gmra.mrb[76].mxu0 %vm809_vm4, %v11633_v52  ;;  %9646 = vmatprep.subr.bf16.mxu1 %v9645_v48  ;;  %v7059_v48 = vld [vmem:[#allocation31 + $0x290] sm:$0xff] }
 0xa16   :  { %9636 = vmatpush1.bf16.msra.mxu0 %v9635_v24  ;;  %6652 = vmatprep.mubr.f32.mxu0 %v10386_v41  ;;  %v9683_v54 = vpack.c.bf16 %v7059_v48, %v7043_v39  ;;  %v7090_v24 = vld [vmem:[#allocation31 + $0x388] sm:$0xff]  ;;  %v7096_v39 = vld [vmem:[#allocation31 + $0x3b8] sm:$0xff] }
 0xa17   :  { %9638 = vmatprep.subr.bf16.mxu0 %v9637_v55  ;;  %v9677_v59 = vpack.c.bf16 %v7090_v24, %v7074_v4  ;;  %v7073_v55 = vld [vmem:[#allocation31 + $0x300] sm:$0xff] }
 0xa18   :  { %9648 = vmatpush1.bf16.msra.mxu1 %v9647_v13  ;;  %v9679_v13 = vpack.c.bf16 %v7089_v58, %v7073_v55  ;;  %v7093_v24 = vld [vmem:[#allocation31 + $0x3a0] sm:$0xff]  ;;  %v7079_v55 = vld [vmem:[#allocation31 + $0x330] sm:$0xff] }
 0xa19   :  { %9658 = vmatprep.subr.bf16.mxu1 %v9657_v63  ;;  %v9687_v63 = vpack.c.bf16 %v7091_v0, %v7075_v20  ;;  %v7095_v58 = vld [vmem:[#allocation31 + $0x3b0] sm:$0xff]  ;;  %v7052_v20 = vld [vmem:[#allocation31 + $0x258] sm:$0xff] }
 0xa1a   :  { %9640 = vmatpush1.bf16.msra.mxu0 %v9639_v5  ;;  %v7048_v5 = vld [vmem:[#allocation31 + $0x238] sm:$0xff] }
 0xa1b   :  { %7968 = vmatmul.mubr.msk.f32.vlgmr.msra.gmra.mrb[78].mxu1 %vm809_vm4, %v11633_v52  ;;  %9650 = vmatprep.subr.bf16.mxu0 %v9649_v16  ;;  %v9697_v16 = vpack.c.bf16 %v7064_v50, %v7048_v5  ;;  %v7068_v0 = vld [vmem:[#allocation31 + $0x2d8] sm:$0xff]  ;;  %v7051_v50 = vld [vmem:[#allocation31 + $0x250] sm:$0xff] }
 0xa1c   :  { %9660 = vmatpush1.bf16.msra.mxu1 %v9659_v14  ;;  %6865 = vmatprep.mubr.f32.mxu1 %v10386_v41 }
 0xa1d   :  { %7967 = vmatmul.mubr.msk.f32.vlgmr.msra.gmra.mrb[78].mxu0 %vm809_vm4, %v11633_v52  ;;  %9662 = vmatprep.subr.bf16.mxu1 %v9661_v8 }
 0xa1e   :  { %9652 = vmatpush1.bf16.msra.mxu0 %v9651_v22  ;;  %6794 = vmatprep.mubr.f32.mxu0 %v10386_v41 }
 0xa1f   :  { %9654 = vmatprep.subr.bf16.mxu0 %v9653_v23 }
 0xa20   :  { %9664 = vmatpush1.bf16.msra.mxu1 %v9663_v26 }
 0xa21   :  { %9674 = vmatprep.subr.bf16.mxu1 %v9673_v36  ;;  %v7047_v36 = vld [vmem:[#allocation31 + $0x230] sm:$0xff] }
 0xa22   :  { %9656 = vmatpush1.bf16.msra.mxu0 %v9655_v60  ;;  %v9699_v4 = vpack.c.bf16 %v7063_v42, %v7047_v36 }
 0xa23   :  { %7970 = vmatmul.mubr.msk.f32.vlgmr.msra.gmra.mrb[80].mxu1 %vm809_vm4, %v11633_v52  ;;  %9666 = vmatprep.subr.bf16.mxu0 %v9665_v31 }
 0xa24   :  { %7172 = vmatprep.mubr.f32.mxu1 %v10386_v41  ;;  %9676 = vmatpush1.bf16.msra.mxu1 %v9675_v62  ;;  %v7080_v62 = vld [vmem:[#allocation31 + $0x338] sm:$0xff] }
 0xa25   :  { %7969 = vmatmul.mubr.msk.f32.vlgmr.msra.gmra.mrb[80].mxu0 %vm809_vm4, %v11633_v52  ;;  %9678 = vmatprep.subr.bf16.mxu1 %v9677_v59 }
 0xa26   :  { %9668 = vmatpush1.bf16.msra.mxu0 %v9667_v37  ;;  %6936 = vmatprep.mubr.f32.mxu0 %v10386_v41 }
 0xa27   :  { %9670 = vmatprep.subr.bf16.mxu0 %v9669_v38 }
 0xa28   :  { %9680 = vmatpush1.bf16.msra.mxu1 %v9679_v13  ;;  %v7066_v13 = vld [vmem:[#allocation31 + $0x2c8] sm:$0xff] }
 0xa29   :  { %9690 = vmatprep.subr.bf16.mxu1 %v9689_v7  ;;  %v9713_v7 = vpack.c.bf16 %v7068_v0, %v7052_v20  ;;  %v6963_v0 = vsub.s32 4, %v10974_v12 }
 0xa2a   :  { %9672 = vmatpush1.bf16.msra.mxu0 %v9671_v40 }
 0xa2b   :  { %9682 = vmatprep.subr.bf16.mxu0 %v9681_v49  ;;  %v7094_v49 = vld [vmem:[#allocation31 + $0x3a8] sm:$0xff] }
 0xa2c   :  { %v9693_v59 = vpack.c.bf16 %v7094_v49, %v7078_v43  ;;  %v7101_v43 = vld [vmem:[#allocation31 + $0x3e0] sm:$0xff]  ;;  %v7103_v49 = vld [vmem:[#allocation31 + $0x3f0] sm:$0xff] }
 0xa2d   :  { %7971 = vmatmul.mubr.msk.f32.vlgmr.msra.gmra.mrb[82].mxu0 %vm809_vm4, %v11633_v52  ;;  %v7076_v52 = vld [vmem:[#allocation31 + $0x318] sm:$0xff] }
 0xa2e   :  { %7243 = vmatprep.mubr.f32.mxu0 %v10386_v41  ;;  %9684 = vmatpush1.bf16.msra.mxu0 %v9683_v54  ;;  %v9685_v27 = vpack.c.bf16 %v7092_v57, %v7076_v52  ;;  %v9701_v57 = vpack.c.bf16 %v7096_v39, %v7080_v62 }
 0xa30   :  { %9686 = vmatprep.subr.bf16.mxu0 %v9685_v27  ;;  %v7050_v27 = vld [vmem:[#allocation31 + $0x248] sm:$0xff] }
 0xa31   :  { %v9705_v5 = vpack.c.bf16 %v7066_v13, %v7050_v27 }
 0xa32   :  { %9688 = vmatpush1.bf16.msra.mxu0 %v9687_v63  ;;  %v9703_v63 = vpack.c.bf16 %v7095_v58, %v7079_v55 }
 0xa33   :  { %9698 = vmatprep.subr.bf16.mxu0 %v9697_v16  ;;  %v7067_v16 = vld [vmem:[#allocation31 + $0x2d0] sm:$0xff] }
 0xac6   :  { %v5931_v6 = vpop.f32.mrb[68].mxu1 }
 0xac7   :  { %v9109_v33 = vpop.f32.mrb[69].mxu1 }
 0xac8   :  { %v7098_v33 = vld [vmem:[#allocation31 + $0x3c8] sm:$0xff] }
 0xace   :  { %v6081_v14 = vpop.f32.mrb[70].mxu1 }
 0xacf   :  { %v9131_v56 = vpop.f32.mrb[71].mxu1 }
 0xad0   :  { %v6004_v17 = vpop.f32.mrb[70].mxu0  ;;  %v7100_v56 = vld [vmem:[#allocation31 + $0x3d8] sm:$0xff] }
 0xad1   :  { %v6005_v8 = vadd.f32 %v6004_v17, %v5931_v6  ;;  %v9120_v18 = vpop.f32.mrb[71].mxu0  ;;  %v7082_v6 = vld [vmem:[#allocation31 + $0x348] sm:$0xff]  ;;  %v9707_v17 = vpack.c.bf16 %v7065_v3, %v7049_v47  ;;  %v6967_v3 = vsub.s32 5, %v10974_v12 }
 0xad2   :  { %v7081_v18 = vld [vmem:[#allocation31 + $0x340] sm:$0xff] }
 0xad3   :  { %v6008_v34 = vadd.f32 %v11519_v21, %v6005_v8  ;;  %v9715_v8 = vpack.c.bf16 %v7067_v16, %v7051_v50 }
 0xad5   :  { %v7958_v22 = vmul.f32 -1.442695, %v6008_v34  ;;  %v7097_v34 = vld [vmem:[#allocation31 + $0x3c0] sm:$0xff] }
 0xad6   :  { %v6228_v23 = vpop.f32.mrb[72].mxu1 }
 0xad7   :  { %9944 = vpow2.f32 %v7958_v22  ;;  %v9153_v25 = vpop.f32.mrb[73].mxu1  ;;  %v6229_v2 = vadd.f32 %v11534_v11, %v6228_v23  ;;  %v7077_v11 = vld [vmem:[#allocation31 + $0x320] sm:$0xff]  ;;  %v9709_v22 = vpack.c.bf16 %v7098_v33, %v7082_v6 }
 0xad8   :  { %v6151_v19 = vpop.f32.mrb[72].mxu0  ;;  %v7083_v25 = vld [vmem:[#allocation31 + $0x350] sm:$0xff] }
 0xad9   :  { %v6152_v26 = vadd.f32 %v6151_v19, %v6081_v14  ;;  %v9142_v28 = vpop.f32.mrb[73].mxu0  ;;  %v7084_v14 = vld [vmem:[#allocation31 + $0x358] sm:$0xff]  ;;  %v7099_v19 = vld [vmem:[#allocation31 + $0x3d0] sm:$0xff] }
 0xada   :  { %v9717_v23 = vpack.c.bf16 %v7100_v56, %v7084_v14  ;;  %v7070_v28 = vld [vmem:[#allocation31 + $0x2e8] sm:$0xff] }
 0xadb   :  { %v6155_v45 = vadd.f32 %v11525_v30, %v6152_v26  ;;  %v7045_v30 = vld [vmem:[#allocation31 + $0x220] sm:$0xff]  ;;  %v7054_v26 = vld [vmem:[#allocation31 + $0x268] sm:$0xff] }
 0xadc   :  { %v9691_v54 = vpack.c.bf16 %v7061_v29, %v7045_v30 }
 0xadd   :  { %v7961_v60 = vmul.f32 -1.442695, %v6155_v45  ;;  %v7056_v45 = vld [vmem:[#allocation31 + $0x278] sm:$0xff] }
 0xadf   :  { %9946 = vpow2.f32 %v7961_v60  ;;  %v7072_v60 = vld [vmem:[#allocation31 + $0x2f8] sm:$0xff] }
 0xae0   :  { %v6298_v31 = vpop.f32.mrb[74].mxu0 }
 0xae1   :  { %v9945_v32 = vpop.eup %9944  ;;  %v9164_v9 = vpop.f32.mrb[75].mxu0  ;;  %v6299_v21 = vadd.f32 %v11528_v10, %v6298_v31  ;;  %v9711_v31 = vpack.c.bf16 %v7097_v34, %v7081_v18 }
 0xae2   :  { %v6012_v61 = vadd.f32 1.0, %v9945_v32  ;;  %v9719_v32 = vpack.c.bf16 %v7099_v19, %v7083_v25  ;;  %v7053_v9 = vld [vmem:[#allocation31 + $0x260] sm:$0xff] }
 0xae4   :  { %9948 = vrcp.f32 %v6012_v61  ;;  %v7069_v61 = vld [vmem:[#allocation31 + $0x2e0] sm:$0xff] }
 0xae5   :  { %v9723_v30 = vpack.c.bf16 %v7069_v61, %v7053_v9 }
 0xae9   :  { %v9947_v51 = vpop.eup %9946 }
 0xaea   :  { %v6159_v37 = vadd.f32 1.0, %v9947_v51  ;;  %v9721_v51 = vpack.c.bf16 %v7070_v28, %v7054_v26 }
 0xaec   :  { %9950 = vrcp.f32 %v6159_v37  ;;  %v9729_v37 = vpack.c.bf16 %v7072_v60, %v7056_v45 }
 0xaee   :  { %v9949_v38 = vpop.eup %9948 }
 0xaef   :  { %v6302_v1 = vmul.f32 %v9949_v38, %v6299_v21  ;;  %v7055_v21 = vld [vmem:[#allocation31 + $0x270] sm:$0xff] }
 0xaf0   :  { %v7071_v38 = vld [vmem:[#allocation31 + $0x2f0] sm:$0xff] }
 0xaf1   :  { %v6303_v40 = vadd.f32 %v6302_v1, %v6229_v2  ;;  %v7086_v2 = vld [vmem:[#allocation31 + $0x368] sm:$0xff]  ;;  %v9731_v29 = vpack.c.bf16 %v7071_v38, %v7055_v21 }
 0xaf2   :  { %v7102_v1 = vld [vmem:[#allocation31 + $0x3e8] sm:$0xff] }
 0xaf3   :  { %9952 = vtanh.f32 %v6303_v40  ;;  %v7088_v40 = vld [vmem:[#allocation31 + $0x378] sm:$0xff]  ;;  %v9725_v36 = vpack.c.bf16 %v7102_v1, %v7086_v2 }
 0xaf6   :  { %v9951_v44 = vpop.eup %9950 }
 0xaf7   :  { %v6305_v35 = vsub.f32 1.0, %v9951_v44  ;;  %v6307_v10 = vmul.f32 %v9951_v44, %v11622_v53  ;;  %v9695_v53 = vpack.c.bf16 %v7093_v24, %v7077_v11  ;;  %v7104_v44 = vld [vmem:[#allocation31 + $0x3f8] sm:$0xff] }
 0xaf8   :  { %v9733_v42 = vpack.c.bf16 %v7104_v44, %v7088_v40 }
 0xafd   :  { %v9953_v46 = vpop.eup %9952 }
 0xafe   :  { %v6306_v48 = vmul.f32 %v9953_v46, %v6305_v35  ;;  %v7085_v35 = vld [vmem:[#allocation31 + $0x360] sm:$0xff]  ;;  %v7087_v46 = vld [vmem:[#allocation31 + $0x370] sm:$0xff] }
 0xaff   :  { %v9727_v62 = vpack.c.bf16 %v7101_v43, %v7085_v35  ;;  %v9735_v39 = vpack.c.bf16 %v7103_v49, %v7087_v46 }
 0xb00   :  { %v11692_v52 = vadd.f32 %v6307_v10, %v6306_v48  ;;  %v6947_v10 = vsub.s32 0, %v10974_v12  ;;  %v6955_v48 = vsub.s32 2, %v10974_v12 }
 0xb02   :  { %7972 = vmatmul.mubr.msk.f32.vlgmr.msra.gmra.mrb[74].mxu1 %vm809_vm4, %v11692_v52  ;;  %7973 = vmatmul.mubr.msk.f32.vlgmr.msra.gmra.mrb[76].mxu0 %vm809_vm4, %v11692_v52 }
 0xb03   :  { %9692 = vmatpush1.bf16.msra.mxu1 %v9691_v54  ;;  %9700 = vmatpush1.bf16.msra.mxu0 %v9699_v4  ;;  %v6309_v54 = vld [vmem:[%s11824_s21] sm:$0xff]  ;;  %v6951_v4 = vsub.s32 1, %v10974_v12 }
 0xb04   :  { %9694 = vmatprep.subr.bf16.mxu1 %v9693_v59  ;;  %9702 = vmatprep.subr.bf16.mxu0 %v9701_v57  ;;  %v6948_v11 = vrot.slane %v6309_v54, %v6947_v10  ;;  %v6956_v24 = vrot.slane %v6309_v54, %v6955_v48  ;;  %v6964_v16 = vrot.slane %v6309_v54, %v6963_v0 }
 0xb05   :  { %7314 = vmatprep.mubr.f32.mxu1 %v10386_v41  ;;  %7385 = vmatprep.mubr.f32.mxu0 %v10386_v41  ;;  %v6952_v59 = vrot.slane %v6309_v54, %v6951_v4  ;;  %v6968_v33 = vrot.slane %v6309_v54, %v6967_v3 }
 0xb07   :  { %9696 = vmatpush1.bf16.msra.mxu1 %v9695_v53  ;;  %9704 = vmatpush1.bf16.msra.mxu0 %v9703_v63  ;;  %v6971_v53 = vsub.s32 6, %v10974_v12 }
 0xb08   :  { %9706 = vmatprep.subr.bf16.mxu1 %v9705_v5  ;;  %9714 = vmatprep.subr.bf16.mxu0 %v9713_v7  ;;  %v6975_v5 = vsub.s32 7, %v10974_v12 }
 0xb09   :  { %v6972_v6 = vrot.slane %v6309_v54, %v6971_v53 }
 0xb0a   :  { %7974 = vmatmul.mubr.msk.f32.vlgmr.msra.gmra.mrb[76].mxu1 %vm809_vm4, %v11692_v52  ;;  %7975 = vmatmul.mubr.msk.f32.vlgmr.msra.gmra.mrb[78].mxu0 %vm809_vm4, %v11692_v52  ;;  %v6976_v14 = vrot.slane %v6309_v54, %v6975_v5 }
 0xb0b   :  { %9708 = vmatpush1.bf16.msra.mxu1 %v9707_v17  ;;  %9716 = vmatpush1.bf16.msra.mxu0 %v9715_v8 }
 0xb0c   :  { %9710 = vmatprep.subr.bf16.mxu1 %v9709_v22  ;;  %9718 = vmatprep.subr.bf16.mxu0 %v9717_v23 }
 0xb0d   :  { %7456 = vmatprep.mubr.f32.mxu1 %v10386_v41  ;;  %7527 = vmatprep.mubr.f32.mxu0 %v10386_v41 }
 0xb0f   :  { %9712 = vmatpush1.bf16.msra.mxu1 %v9711_v31  ;;  %9720 = vmatpush1.bf16.msra.mxu0 %v9719_v32 }
 0xb10   :  { %9722 = vmatprep.subr.bf16.mxu1 %v9721_v51  ;;  %9730 = vmatprep.subr.bf16.mxu0 %v9729_v37 }
 0xb12   :  { %7976 = vmatmul.mubr.msk.f32.vlgmr.msra.gmra.mrb[78].mxu1 %vm809_vm4, %v11692_v52  ;;  %7977 = vmatmul.mubr.msk.f32.vlgmr.msra.gmra.mrb[80].mxu0 %vm809_vm4, %v11692_v52 }
 0xb13   :  { %9724 = vmatpush1.bf16.msra.mxu1 %v9723_v30  ;;  %9732 = vmatpush1.bf16.msra.mxu0 %v9731_v29 }
 0xb14   :  { %9726 = vmatprep.subr.bf16.mxu1 %v9725_v36  ;;  %9734 = vmatprep.subr.bf16.mxu0 %v9733_v42 }
 0xb15   :  { %7598 = vmatprep.mubr.f32.mxu1 %v10386_v41  ;;  %7669 = vmatprep.mubr.f32.mxu0 %v10386_v41  ;;  %v6959_v41 = vsub.s32 3, %v10974_v12  ;;  %v6310_v12 = vld [vmem:[%s11824_s21 + $0x8] sm:$0xff] }
 0xb16   :  { %v6980_v31 = vrot.slane %v6310_v12, %v6947_v10  ;;  %v6988_v32 = vrot.slane %v6310_v12, %v6955_v48  ;;  %v6984_v9 = vrot.slane %v6310_v12, %v6951_v4 }
 0xb17   :  { %9728 = vmatpush1.bf16.msra.mxu1 %v9727_v62  ;;  %9736 = vmatpush1.bf16.msra.mxu0 %v9735_v39  ;;  %v6960_v57 = vrot.slane %v6309_v54, %v6959_v41  ;;  %v6992_v61 = vrot.slane %v6310_v12, %v6959_v41 }
 0xb1a   :  { %7978 = vmatmul.mubr.msk.f32.vlgmr.msra.gmra.mrb[80].mxu1 %vm809_vm4, %v11692_v52  ;;  %7979 = vmatmul.mubr.msk.f32.vlgmr.msra.gmra.mrb[82].mxu0 %vm809_vm4, %v11692_v52 }
 0xbd5   :  { %v7174_v55 = vpop.f32.mrb[74].mxu1  ;;  %v7245_v58 = vpop.f32.mrb[76].mxu0 }
 0xbd6   :  { %v9737_v27 = vadd.f32 %v7174_v55, %v6948_v11  ;;  %v9739_v52 = vadd.f32 %v7245_v58, %v6956_v24  ;;  %v7176_v13 = vpop.f32.mrb[75].mxu1  ;;  %v7247_v20 = vpop.f32.mrb[77].mxu0 }
 0xbd7   :  { %v9738_v63 = vadd.f32 %v7176_v13, %v6952_v59  ;;  %v9740_v47 = vadd.f32 %v7247_v20, %v6960_v57 }
 0xbd9   :  { %v7700_v7 = vcombine.low %v9737_v27, %v9738_v63  ;;  %v7701_v50 = vcombine.low %v9739_v52, %v9740_v47 }
 0xbdb   :  { %v7708_v56 = vrot.slane %v7700_v7, %v10977_v15  ;;  %v7715_v17 = vrot.slane %v7701_v50, %v10977_v15 }
 0xbdd   :  { %v7316_v8 = vpop.f32.mrb[76].mxu1  ;;  %v7387_v18 = vpop.f32.mrb[78].mxu0  ;;  %v7716_v34 = vcombine.low %v7708_v56, %v7715_v17 }
 0xbde   :  { %v9741_v22 = vadd.f32 %v7316_v8, %v6964_v16  ;;  %v9743_v23 = vadd.f32 %v7387_v18, %v6972_v6  ;;  %v7318_v25 = vpop.f32.mrb[77].mxu1  ;;  %v7389_v19 = vpop.f32.mrb[79].mxu0 }
 0xbdf   :  { %v9742_v26 = vadd.f32 %v7318_v25, %v6968_v33  ;;  %v9744_v28 = vadd.f32 %v7389_v19, %v6976_v14  ;;  %7736 = vst [vmem:[#allocation32] sm:$0xff] %v7716_v34 }
 0xbe1   :  { %v7717_v45 = vcombine.low %v9741_v22, %v9742_v26  ;;  %v7718_v60 = vcombine.low %v9743_v23, %v9744_v28 }
 0xbe3   :  { %v7725_v51 = vrot.slane %v7717_v45, %v10977_v15  ;;  %v7732_v37 = vrot.slane %v7718_v60, %v10977_v15 }
 0xbe5   :  { %v7458_v21 = vpop.f32.mrb[78].mxu1  ;;  %v7529_v38 = vpop.f32.mrb[80].mxu0  ;;  %v7733_v2 = vcombine.low %v7725_v51, %v7732_v37 }
 0xbe6   :  { %v9745_v1 = vadd.f32 %v7458_v21, %v6980_v31  ;;  %v9747_v40 = vadd.f32 %v7529_v38, %v6988_v32  ;;  %v7460_v44 = vpop.f32.mrb[79].mxu1  ;;  %v7531_v30 = vpop.f32.mrb[81].mxu0 }
 0xbe7   :  { %v9746_v29 = vadd.f32 %v7460_v44, %v6984_v9  ;;  %v9748_v35 = vadd.f32 %v7531_v30, %v6992_v61  ;;  %7737 = vst [vmem:[#allocation32 + $0x8] sm:$0xff] %v7733_v2 }
 0xbe8   :  { %10310 = shalt.err (!%p10307_p1)
}
 0xbe9   :  { %s11825_s10 = sld [smem:[#allocation57_spill]] }
 0xbef   :  { %s10311_s1 = scalar_lea.hbm %s11825_s10, 256 }
 0xbf0   :  { %p10312_p2 = scmp.ne.s32.totalorder %s11825_s10, %s10311_s1  ;;  %p10315_p3 = scmp.lt.u32.totalorder %s10311_s1, %s11825_s10 }
 0xbf2   :  { %p10317_p4 = pnand %p10315_p3, %p10312_p2 }
 0xbf4   :  { %10320 = shalt.err (!%p10317_p4)
}
 0xbf5   :  { %7793 = dma.vmem_to_hbm [thread:$0]  %s7791_s9, 256, %s11825_s10, [#allocation8]   ;;  %v7746_v36 = vcombine.low %v9745_v1, %v9746_v29  ;;  %v7747_v42 = vcombine.low %v9747_v40, %v9748_v35  ;;  %v6996_v43 = vrot.slane %v6310_v12, %v6963_v0  ;;  %v7004_v46 = vrot.slane %v6310_v12, %v6971_v53  ;;  %v7600_v48 = vpop.f32.mrb[80].mxu1  ;;  %v7671_v54 = vpop.f32.mrb[82].mxu0 }
 0xbf6   :  { %v7000_v49 = vrot.slane %v6310_v12, %v6967_v3  ;;  %v7008_v62 = vrot.slane %v6310_v12, %v6975_v5  ;;  %v7602_v24 = vpop.f32.mrb[81].mxu1  ;;  %v7673_v59 = vpop.f32.mrb[83].mxu0  ;;  %s10389_s28 = smov [#allocation33]  }
 0xbf7   :  { %v7754_v39 = vrot.slane %v7746_v36, %v10977_v15  ;;  %v7761_v10 = vrot.slane %v7747_v42, %v10977_v15  ;;  %v9749_v41 = vadd.f32 %v7600_v48, %v6996_v43  ;;  %v9751_v11 = vadd.f32 %v7671_v54, %v7004_v46  ;;  %s7800_s12 = sshll.u32 %s10389_s28, 4  ;;  %s7801_s12 = int_to_ptr.vmem [resolvable:$true] %s7800_s12 }
 0xbf8   :  { %v9750_v57 = vadd.f32 %v7602_v24, %v7000_v49  ;;  %v9752_v55 = vadd.f32 %v7673_v59, %v7008_v62  ;;  %s10321_s23 = scalar_lea.vmem %s7801_s12, 256  ;;  %p10326_p6 = scmp.lt.s32.totalorder %s7801_s12, %s7801_s12 }
 0xbf9   :  { %v7762_v4 = vcombine.low %v7754_v39, %v7761_v10  ;;  %p10322_p5 = scmp.ne.s32.totalorder %s7801_s12, %s10321_s23  ;;  %p10327_p7 = scmp.lt.s32.totalorder %s10321_s23, %s10321_s23 }
 0xbfa   :  { %v7763_v58 = vcombine.low %v9749_v41, %v9750_v57  ;;  %v7764_v27 = vcombine.low %v9751_v11, %v9752_v55 }
 0xbfb   :  { %7782 = vst [vmem:[#allocation33] sm:$0xff] %v7762_v4  ;;  %p10328_p8 = por %p10327_p7, %p10326_p6 }
 0xbfc   :  { %v7771_v52 = vrot.slane %v7763_v58, %v10977_v15  ;;  %v7778_v13 = vrot.slane %v7764_v27, %v10977_v15 }
 0xbfd   :  { %p10329_p9 = pnand %p10328_p8, %p10322_p5 }
 0xbfe   :  { %v7779_v20 = vcombine.low %v7771_v52, %v7778_v13 }
 0xc00   :  { %7783 = vst [vmem:[#allocation33 + $0x8] sm:$0xff] %v7779_v20 }
 0xc01   :  { %10332 = shalt.err (!%p10329_p9)
}
 0xc02   :  { %s11826_s4 = sld [smem:[#allocation58_spill]] }
 0xc08   :  { %s10333_s30 = scalar_lea.hbm %s11826_s4, 256 }
 0xc09   :  { %p10334_p10 = scmp.ne.s32.totalorder %s11826_s4, %s10333_s30  ;;  %p10337_p11 = scmp.lt.u32.totalorder %s10333_s30, %s11826_s4 }
 0xc0b   :  { %p10339_p12 = pnand %p10337_p11, %p10334_p10 }
 0xc0d   :  { %10342 = shalt.err (!%p10339_p12)
}
 0xc0e   :  { %7803 = dma.vmem_to_hbm [thread:$0]  %s7801_s12, 256, %s11826_s4, [#allocation34]  }
 0xc0f   :  { %10361 = dma.done.wait [#allocation8], 256  }
 0xc10   :  { %10362 = vsyncadd [#allocation8], 4294967040 }
 0xc11   :  { %10363 = dma.done.wait [#allocation34], 256  }
 0xc12   :  { %10364 = vsyncadd [#allocation34], 4294967040 }
 0xc13   :  { %7810 = vsyncpa [#allocation7], 1 }
 0xc14   :  { %7811 = vsyncpa [#allocation12], 1 }
 0xc15   :  { %7812 = vsyncpa [#allocation15], 1 }
 0xc16   :  { %7813 = vsyncpa [#allocation18], 1 }
 0xc17   :  { %7814 = vsyncpa [#allocation21], 1 }
 0xc18   :  { %7815 = vsyncpa [#allocation24], 1 }
 0xc19   :  { %7816 = vsyncpa [#allocation27], 1 }
 0xc1a   :  { %7817 = vsyncpa [#allocation30], 1 }
 0xc1b   :  { %7818 = vsyncpa [#allocation8], 1 }
 0xc1c   :  { %7819 = vsyncpa [#allocation34], 1 }
 0xc1d   :  { %7820 = vsyncpa [#allocation9], 1 }

</bundles_post_ra>
